<compile_context>
chip_gen: v7x
topology: tpu7x:2x2x1
jax: 0.10.0
libtpu: 0.0.40
codegen_flags: <defaults>
</compile_context>

<pallas_src>
import math

import jax
import jax.numpy as jnp
from jax import lax
from jax.experimental import pallas as pl
from jax.experimental.pallas import tpu as pltpu


def _round_up(x: int, m: int) -> int:
    return (x + m - 1) // m * m


def _scoped_vmem_limit(block_bytes_sum: int, scratch_bytes: int = 0) -> int:
    # Double-buffered pipeline blocks + scratch, 2x safety margin, floored at the
    # v6e/v7x default scoped limit (32 MiB) and capped well below v5e/v6e physical.
    est = 2 * block_bytes_sum + scratch_bytes
    return int(min(max(32 * 1024 * 1024, 2 * est), 120 * 1024 * 1024))


# ---------------------------------------------------------------------------
# Pass 1: QKV projection -> q/k/v slabs of shape (B, n_head, T, hd_pad), bf16
# ---------------------------------------------------------------------------
def _make_qkv_kernel(n_head: int, head_dim: int, hd_pad: int, n_embd: int, tm: int):
    def kernel(x_ref, w_ref, b_ref, q_ref, k_ref, v_ref):
        x = x_ref[0].astype(jnp.bfloat16)                           # (tm, C)
        # bf16 x bf16 -> f32 accumulate on the MXU
        qkv = jnp.dot(x, w_ref[...], preferred_element_type=jnp.float32)
        qkv = qkv + b_ref[0]                                        # (tm, 3C) f32

        def heads(t):  # (tm, C) f32 -> (n_head, tm, hd_pad) bf16
            # Cast BEFORE the cross-lane relayout: halves the vregs moved
            # through the XLU shuffle.
            t = t.astype(jnp.bfloat16)
            t = t.reshape(tm, n_head, head_dim).transpose(1, 0, 2)  # (H, tm, hd)
            if hd_pad > head_dim:
                # Lane-pad head_dim up to a 128 multiple so q/k/v slabs are
                # stored and re-loaded lane-dense (and QK^T uses full MXU depth).
                pad = jnp.zeros((n_head, tm, hd_pad - head_dim), jnp.bfloat16)
                t = jnp.concatenate([t, pad], axis=-1)
            return t

        # q/k/v column slices start at multiples of C (lane-aligned for typical C).
        q_ref[0] = heads(qkv[:, 0 * n_embd:1 * n_embd])
        k_ref[0] = heads(qkv[:, 1 * n_embd:2 * n_embd])
        v_ref[0] = heads(qkv[:, 2 * n_embd:3 * n_embd])

    return kernel


# ---------------------------------------------------------------------------
# Pass 2: flash attention (online softmax over KV tiles) + output projection
# ---------------------------------------------------------------------------
def _make_flash_kernel(n_head: int, head_dim: int, hd_pad: int, n_embd: int,
                       tq: int, tk: int):
    scale = 1.0 / math.sqrt(head_dim)
    NEG = -1e30  # large finite negative: exp underflows to 0, never NaN

    def kernel(q_ref, k_ref, v_ref, wp_ref, bp_ref, o_ref, m_sc, l_sc, acc_sc):
        qi = pl.program_id(1)
        ki = pl.program_id(2)
        nk = pl.num_programs(2)

        @pl.when(ki == 0)
        def _init():
            m_sc[...] = jnp.full(m_sc.shape, NEG, jnp.float32)
            l_sc[...] = jnp.zeros(l_sc.shape, jnp.float32)
            acc_sc[...] = jnp.zeros(acc_sc.shape, jnp.float32)

        q_start = qi * tq
        k_start = ki * tk

        def tile_update(apply_mask: bool):
            q = q_ref[0]                                            # (H, tq, hd_pad) bf16
            k = k_ref[0]                                            # (H, tk, hd_pad) bf16
            v = v_ref[0]                                            # (H, tk, hd_pad) bf16

            # Head-batched QK^T: contract on head_dim directly (no transpose,
            # frees the XLU slot); f32 accumulation on the MXU.
            s = lax.dot_general(
                q, k,
                dimension_numbers=(((2,), (2,)), ((0,), (0,))),
                preferred_element_type=jnp.float32) * scale         # (H, tq, tk)

            if apply_mask:
                # Element-wise causal mask in global coordinates; only emitted
                # for diagonal-straddling tiles.
                row = q_start + lax.broadcasted_iota(jnp.int32, (tq, tk), 0)
                col = k_start + lax.broadcasted_iota(jnp.int32, (tq, tk), 1)
                s = jnp.where((col <= row)[None], s, NEG)

            # Online-softmax update, statistics kept in f32.
            m_prev = m_sc[...]                                      # (H, tq, 1)
            m_new = jnp.maximum(m_prev, jnp.max(s, axis=-1, keepdims=True))
            alpha = jnp.exp(m_prev - m_new)
            p = jnp.exp(s - m_new)                                  # (H, tq, tk)
            l_sc[...] = alpha * l_sc[...] + jnp.sum(p, axis=-1, keepdims=True)

            pv = lax.dot_general(
                p.astype(v.dtype), v,
                dimension_numbers=(((2,), (1,)), ((0,), (0,))),
                preferred_element_type=jnp.float32)                 # (H, tq, hd_pad)
            acc_sc[...] = alpha * acc_sc[...] + pv
            m_sc[...] = m_new

        # A tile is computed iff it has at least one unmasked element:
        #   k_start < q_start + tq.
        # Within that, the mask is only needed if some (row, col) has col > row:
        #   k_start + tk - 1 > q_start.
        # KV tile 0 is always computed first, so every row's running max m is
        # finite before any fully-masked row chunk can appear (no exp(0)=1 bug).
        below = (k_start + tk - 1) <= q_start                      # fully unmasked
        straddles = jnp.logical_and(k_start < q_start + tq,
                                    (k_start + tk - 1) > q_start)  # needs mask

        @pl.when(below)
        def _unmasked():
            tile_update(apply_mask=False)

        @pl.when(straddles)
        def _masked():
            tile_update(apply_mask=True)

        @pl.when(ki == nk - 1)
        def _finalize():
            inv_l = pl.reciprocal(l_sc[...], approx=True)           # EUP slot, ~free
            if hd_pad > head_dim:
                acc = acc_sc[:, :, :head_dim]                       # drop lane padding
            else:
                acc = acc_sc[...]
            y = (acc * inv_l).astype(jnp.bfloat16)                  # (H, tq, hd)
            # concat heads -> (tq, C); one full C-deep projection matmul.
            # TODO(synk): for C >~ 2048, split c_proj into its own pallas_call /
            # XLA GEMM instead of keeping (C, C) w_proj resident here (v7x VMEM).
            y = y.transpose(1, 0, 2).reshape(tq, n_embd)
            out = jnp.dot(y, wp_ref[...], preferred_element_type=jnp.float32)
            out = out + bp_ref[0]
            o_ref[0] = out.astype(o_ref.dtype)

    return kernel


# ---------------------------------------------------------------------------
# Wrapper
# ---------------------------------------------------------------------------
def causal_self_attention(x, w_attn, b_attn, w_proj, b_proj, *, n_head: int,
                          tq: int = 128, tk: int = 256):
    """x: (B, T, C).  Returns y: (B, T, C) in x.dtype.

    Implements the forward of CausalSelfAttention with dropout=0, past_kv=None,
    use_cache=False (only y is returned; `present` is None).
    Tiles: tq=128 everywhere; tk=256 fills the 2x256^2 MXU on v6e/v7x
    (pass tk=128 on v5e, where the MXU is 4x128^2).
    Numerics: bf16 MXU operands with f32 accumulation + approx reciprocal, so
    expect ~1e-2-level relative error vs an f32 reference (not bit-exact).
    """
    B, T, C = x.shape
    assert C % n_head == 0
    hd = C // n_head
    hd_pad = _round_up(hd, 128)   # lane-dense head slabs (zero padded if hd < 128)

    tq = min(tq, T)
    tk = min(tk, T)
    assert T % tq == 0 and T % tk == 0, "T must be divisible by the tile sizes"

    # bf16 weights: native MXU rate + half the resident VMEM footprint.
    w_attn_bf = w_attn.astype(jnp.bfloat16)
    w_proj_bf = w_proj.astype(jnp.bfloat16)
    b_attn_f32 = b_attn.astype(jnp.float32)
    b_proj_f32 = b_proj.astype(jnp.float32)

    itemsize = jnp.dtype(x.dtype).itemsize

    # ---- pass 1: QKV projection -> per-head bf16 slabs (B, H, T, hd_pad) ----
    # TODO(synk): for very large C (>~2048) tile w_attn over its 3C output
    # columns with an extra grid axis instead of keeping the full (C, 3C)
    # weight resident (needed to fit v7x's 64 MiB VMEM).
    qkv_kernel = _make_qkv_kernel(n_head, hd, hd_pad, C, tq)
    qkv_shape = jax.ShapeDtypeStruct((B, n_head, T, hd_pad), jnp.bfloat16)
    p1_blocks = (tq * C * itemsize + C * 3 * C * 2 + 3 * C * 4
                 + 3 * n_head * tq * hd_pad * 2)
    q, k, v = pl.pallas_call(
        qkv_kernel,
        out_shape=(qkv_shape, qkv_shape, qkv_shape),
        grid_spec=pltpu.PrefetchScalarGridSpec(
            num_scalar_prefetch=0,
            grid=(B, T // tq),
            in_specs=[
                pl.BlockSpec((1, tq, C), lambda b, i: (b, i, 0)),       # x tile
                pl.BlockSpec((C, 3 * C), lambda b, i: (0, 0)),          # w_attn (resident)
                pl.BlockSpec((1, 3 * C), lambda b, i: (0, 0)),          # b_attn
            ],
            out_specs=[
                pl.BlockSpec((1, n_head, tq, hd_pad), lambda b, i: (b, 0, i, 0)),
                pl.BlockSpec((1, n_head, tq, hd_pad), lambda b, i: (b, 0, i, 0)),
                pl.BlockSpec((1, n_head, tq, hd_pad), lambda b, i: (b, 0, i, 0)),
            ],
        ),
        compiler_params=pltpu.CompilerParams(
            dimension_semantics=("parallel", "parallel"),
            vmem_limit_bytes=_scoped_vmem_limit(p1_blocks)),
    )(x, w_attn_bf, b_attn_f32)

    # ---- pass 2: flash attention over KV tiles + fused c_proj ----
    def kv_map(b, i, j):
        # Clamp the KV block index to the last tile this query tile actually
        # needs under the causal mask.  Repeated block indices are not
        # re-fetched by the pipeline, so fully-masked KV tiles cost zero HBM
        # traffic (their compute is skipped inside the kernel as well).
        j_last = (i * tq + tq - 1) // tk
        return (b, 0, jnp.minimum(j, j_last), 0)

    flash_kernel = _make_flash_kernel(n_head, hd, hd_pad, C, tq, tk)
    p2_blocks = (n_head * tq * hd_pad * 2 + 2 * n_head * tk * hd_pad * 2
                 + C * C * 2 + C * 4 + tq * C * itemsize)
    p2_scratch = n_head * tq * (hd_pad + 2) * 4
    y = pl.pallas_call(
        flash_kernel,
        out_shape=jax.ShapeDtypeStruct((B, T, C), x.dtype),
        grid_spec=pltpu.PrefetchScalarGridSpec(
            num_scalar_prefetch=0,
            grid=(B, T // tq, T // tk),
            in_specs=[
                pl.BlockSpec((1, n_head, tq, hd_pad),
                             lambda b, i, j: (b, 0, i, 0)),              # Q (resident over KV axis)
                pl.BlockSpec((1, n_head, tk, hd_pad), kv_map),           # K tile (causally clamped)
                pl.BlockSpec((1, n_head, tk, hd_pad), kv_map),           # V tile (causally clamped)
                pl.BlockSpec((C, C), lambda b, i, j: (0, 0)),            # w_proj (resident)
                pl.BlockSpec((1, C), lambda b, i, j: (0, 0)),            # b_proj
            ],
            out_specs=pl.BlockSpec((1, tq, C), lambda b, i, j: (b, i, 0)),
            scratch_shapes=[
                pltpu.VMEM((n_head, tq, 1), jnp.float32),      # running max m
                pltpu.VMEM((n_head, tq, 1), jnp.float32),      # running sum l
                pltpu.VMEM((n_head, tq, hd_pad), jnp.float32), # output accumulator
            ],
        ),
        compiler_params=pltpu.CompilerParams(
            # batch and query-tile axes are independent -> megacore-shardable
            # (B*(T/tq) grid points keep both v7x TCs busy); the KV axis
            # carries the online-softmax accumulator.
            dimension_semantics=("parallel", "parallel", "arbitrary"),
            vmem_limit_bytes=_scoped_vmem_limit(p2_blocks, p2_scratch)),
    )(q, k, v, w_proj_bf, b_proj_f32)
    return y


# ---------------------------------------------------------------------------
# Pure-JAX reference mirroring the PyTorch forward (dropout=0, no cache)
# ---------------------------------------------------------------------------
def _reference(x, w_attn, b_attn, w_proj, b_proj, n_head):
    B, T, C = x.shape
    hd = C // n_head
    qkv = jnp.einsum("btc,cd->btd", x, w_attn) + b_attn[0]
    q, k, v = jnp.split(qkv, 3, axis=-1)
    q = q.reshape(B, T, n_head, hd).transpose(0, 2, 1, 3)
    k = k.reshape(B, T, n_head, hd).transpose(0, 2, 1, 3)
    v = v.reshape(B, T, n_head, hd).transpose(0, 2, 1, 3)
    att = jnp.einsum("bhqd,bhkd->bhqk", q, k) / math.sqrt(hd)
    mask = jnp.tril(jnp.ones((T, T), bool))
    att = jnp.where(mask[None, None], att, -jnp.inf)
    att = jax.nn.softmax(att, axis=-1)
    y = jnp.einsum("bhqk,bhkd->bhqd", att, v)
    y = y.transpose(0, 2, 1, 3).reshape(B, T, C)
    return jnp.einsum("btc,cd->btd", y, w_proj) + b_proj[0]


if __name__ == "__main__":
    # Small-but-tiled config: hd = 64 (same as GPTConfig's 768/12) exercises the
    # lane padding, T=512 with tq=128 / tk=256 exercises multiple query tiles,
    # fully-skipped KV tiles (clamped DMA), unmasked below-diagonal tiles and
    # masked diagonal-straddling tiles.
    B, T, C, n_head = 2, 512, 256, 4

    key = jax.random.PRNGKey(0)
    k_x, k_wa, k_ba, k_wp, k_bp = jax.random.split(key, 5)

    x = jax.random.normal(k_x, (B, T, C), jnp.float32)
    # deterministic synthetic parameters (PyTorch Linear shapes, pre-transposed to (in, out))
    w_attn = jax.random.normal(k_wa, (C, 3 * C), jnp.float32) * (1.0 / math.sqrt(C))
    b_attn = jax.random.normal(k_ba, (1, 3 * C), jnp.float32) * 0.02
    w_proj = jax.random.normal(k_wp, (C, C), jnp.float32) * (1.0 / math.sqrt(C))
    b_proj = jax.random.normal(k_bp, (1, C), jnp.float32) * 0.02

    y = causal_self_attention(x, w_attn, b_attn, w_proj, b_proj, n_head=n_head)
    y = jax.block_until_ready(y)

    y_ref = _reference(x, w_attn, b_attn, w_proj, b_proj, n_head)
    # kernel uses bf16 MXU operands with f32 accumulation + approx reciprocal;
    # reference is pure f32 -> loose tolerance is expected.
    assert jnp.allclose(y, y_ref, rtol=5e-2, atol=5e-2), (
        f"mismatch vs reference: max abs err {float(jnp.max(jnp.abs(y - y_ref)))}")

    # TODO(synk): past_kv / use_cache (KV-cache concat + `present` output) not
    # implemented; this kernel covers the default causal, no-cache forward path.
    print("KERNEL_OK")
</pallas_src>

<mosaic_0001>
module attributes {stable_mosaic.version = 11 : i64} {
  func.func @kernel(%arg0: i32, %arg1: i32, %arg2: memref<1x128x256xf32, #tpu.memory_space<vmem>>, %arg3: memref<256x768xbf16, #tpu.memory_space<vmem>>, %arg4: memref<1x768xf32, #tpu.memory_space<vmem>>, %arg5: memref<1x4x128x128xbf16, #tpu.memory_space<vmem>>, %arg6: memref<1x4x128x128xbf16, #tpu.memory_space<vmem>>, %arg7: memref<1x4x128x128xbf16, #tpu.memory_space<vmem>>) attributes {dimension_semantics = [#tpu.dimension_semantics<parallel>, #tpu.dimension_semantics<parallel>], iteration_bounds = array<i64: 2, 4>, scalar_prefetch = 0 : i64, scratch_operands = 0 : i64, tpu.core_type = #tpu.core_type<tc>, window_params = [{transform_indices = @transform_0, window_bounds = array<i64: 1, 128, 256>}, {pipeline_mode = #tpu.pipeline_mode<synchronous>, transform_indices = @transform_1, window_bounds = array<i64: 256, 768>}, {pipeline_mode = #tpu.pipeline_mode<synchronous>, transform_indices = @transform_2, window_bounds = array<i64: 1, 768>}, {transform_indices = @transform_3, window_bounds = array<i64: 1, 4, 128, 128>}, {transform_indices = @transform_4, window_bounds = array<i64: 1, 4, 128, 128>}, {transform_indices = @transform_5, window_bounds = array<i64: 1, 4, 128, 128>}]} {
    %c0 = arith.constant 0 : index
    %c0_0 = arith.constant 0 : index
    %c0_1 = arith.constant 0 : index
    %0 = vector.load %arg2[%c0, %c0_0, %c0_1] : memref<1x128x256xf32, #tpu.memory_space<vmem>>, vector<1x128x256xf32>
    %1 = vector.shape_cast %0 : vector<1x128x256xf32> to vector<128x256xf32>
    %2 = arith.truncf %1 : vector<128x256xf32> to vector<128x256xbf16>
    %c0_2 = arith.constant 0 : index
    %c0_3 = arith.constant 0 : index
    %3 = vector.load %arg3[%c0_2, %c0_3] : memref<256x768xbf16, #tpu.memory_space<vmem>>, vector<256x768xbf16>
    %cst = arith.constant dense<0.000000e+00> : vector<128x768xf32>
    %4 = tpu.matmul %2, %3, %cst {dimension_numbers = #tpu.dot_dimension_numbers<[1], [0], [0], [1], [0, 0, 1, 1], [], []>} : vector<128x256xbf16>, vector<256x768xbf16>, vector<128x768xf32> -> vector<128x768xf32>
    %c0_4 = arith.constant 0 : index
    %c0_5 = arith.constant 0 : index
    %5 = vector.load %arg4[%c0_4, %c0_5] : memref<1x768xf32, #tpu.memory_space<vmem>>, vector<1x768xf32>
    %6 = vector.shape_cast %5 : vector<1x768xf32> to vector<768xf32>
    %7 = vector.shape_cast %6 : vector<768xf32> to vector<1x768xf32>
    %8 = vector.broadcast %7 : vector<1x768xf32> to vector<128x768xf32>
    %9 = arith.addf %4, %8 : vector<128x768xf32>
    %10 = vector.extract_strided_slice %9 {offsets = [0, 0], sizes = [128, 256], strides = [1, 1]} : vector<128x768xf32> to vector<128x256xf32>
    %11 = arith.truncf %10 : vector<128x256xf32> to vector<128x256xbf16>
    %12 = vector.shape_cast %11 : vector<128x256xbf16> to vector<128x4x64xbf16>
    %13 = tpu.transpose %12, [1, 0, 2] : vector<128x4x64xbf16> -> vector<4x128x64xbf16>
    %cst_6 = arith.constant 0.000000e+00 : bf16
    %14 = vector.broadcast %cst_6 : bf16 to vector<4x128x64xbf16>
    %15 = tpu.concatenate %13, %14 in 2 : vector<4x128x64xbf16>, vector<4x128x64xbf16> -> vector<4x128x128xbf16>
    %c0_7 = arith.constant 0 : index
    %c0_8 = arith.constant 0 : index
    %c0_9 = arith.constant 0 : index
    %c0_10 = arith.constant 0 : index
    %16 = vector.load %arg5[%c0_7, %c0_8, %c0_9, %c0_10] : memref<1x4x128x128xbf16, #tpu.memory_space<vmem>>, vector<1x4x128x128xbf16>
    %17 = vector.shape_cast %16 : vector<1x4x128x128xbf16> to vector<4x128x128xbf16>
    %18 = vector.shape_cast %15 : vector<4x128x128xbf16> to vector<1x4x128x128xbf16>
    tpu.vector_store %arg5[%c0_7, %c0_8, %c0_9, %c0_10], %18 {strides = array<i32>} : memref<1x4x128x128xbf16, #tpu.memory_space<vmem>>, vector<1x4x128x128xbf16>,
    %19 = vector.extract_strided_slice %9 {offsets = [0, 256], sizes = [128, 256], strides = [1, 1]} : vector<128x768xf32> to vector<128x256xf32>
    %20 = arith.truncf %19 : vector<128x256xf32> to vector<128x256xbf16>
    %21 = vector.shape_cast %20 : vector<128x256xbf16> to vector<128x4x64xbf16>
    %22 = tpu.transpose %21, [1, 0, 2] : vector<128x4x64xbf16> -> vector<4x128x64xbf16>
    %cst_11 = arith.constant 0.000000e+00 : bf16
    %23 = vector.broadcast %cst_11 : bf16 to vector<4x128x64xbf16>
    %24 = tpu.concatenate %22, %23 in 2 : vector<4x128x64xbf16>, vector<4x128x64xbf16> -> vector<4x128x128xbf16>
    %c0_12 = arith.constant 0 : index
    %c0_13 = arith.constant 0 : index
    %c0_14 = arith.constant 0 : index
    %c0_15 = arith.constant 0 : index
    %25 = vector.load %arg6[%c0_12, %c0_13, %c0_14, %c0_15] : memref<1x4x128x128xbf16, #tpu.memory_space<vmem>>, vector<1x4x128x128xbf16>
    %26 = vector.shape_cast %25 : vector<1x4x128x128xbf16> to vector<4x128x128xbf16>
    %27 = vector.shape_cast %24 : vector<4x128x128xbf16> to vector<1x4x128x128xbf16>
    tpu.vector_store %arg6[%c0_12, %c0_13, %c0_14, %c0_15], %27 {strides = array<i32>} : memref<1x4x128x128xbf16, #tpu.memory_space<vmem>>, vector<1x4x128x128xbf16>,
    %28 = vector.extract_strided_slice %9 {offsets = [0, 512], sizes = [128, 256], strides = [1, 1]} : vector<128x768xf32> to vector<128x256xf32>
    %29 = arith.truncf %28 : vector<128x256xf32> to vector<128x256xbf16>
    %30 = vector.shape_cast %29 : vector<128x256xbf16> to vector<128x4x64xbf16>
    %31 = tpu.transpose %30, [1, 0, 2] : vector<128x4x64xbf16> -> vector<4x128x64xbf16>
    %cst_16 = arith.constant 0.000000e+00 : bf16
    %32 = vector.broadcast %cst_16 : bf16 to vector<4x128x64xbf16>
    %33 = tpu.concatenate %31, %32 in 2 : vector<4x128x64xbf16>, vector<4x128x64xbf16> -> vector<4x128x128xbf16>
    %c0_17 = arith.constant 0 : index
    %c0_18 = arith.constant 0 : index
    %c0_19 = arith.constant 0 : index
    %c0_20 = arith.constant 0 : index
    %34 = vector.load %arg7[%c0_17, %c0_18, %c0_19, %c0_20] : memref<1x4x128x128xbf16, #tpu.memory_space<vmem>>, vector<1x4x128x128xbf16>
    %35 = vector.shape_cast %34 : vector<1x4x128x128xbf16> to vector<4x128x128xbf16>
    %36 = vector.shape_cast %33 : vector<4x128x128xbf16> to vector<1x4x128x128xbf16>
    tpu.vector_store %arg7[%c0_17, %c0_18, %c0_19, %c0_20], %36 {strides = array<i32>} : memref<1x4x128x128xbf16, #tpu.memory_space<vmem>>, vector<1x4x128x128xbf16>,
    return
  }
  func.func @transform_0(%arg0: i32, %arg1: i32) -> (i32, i32, i32) {
    %c0_i32 = arith.constant 0 : i32
    %c0_i32_0 = arith.constant 0 : i32
    return %arg0, %arg1, %c0_i32 : i32, i32, i32
  }
  func.func @transform_1(%arg0: i32, %arg1: i32) -> (i32, i32) {
    %c0_i32 = arith.constant 0 : i32
    %c0_i32_0 = arith.constant 0 : i32
    %c0_i32_1 = arith.constant 0 : i32
    return %c0_i32, %c0_i32_0 : i32, i32
  }
  func.func @transform_2(%arg0: i32, %arg1: i32) -> (i32, i32) {
    %c0_i32 = arith.constant 0 : i32
    %c0_i32_0 = arith.constant 0 : i32
    %c0_i32_1 = arith.constant 0 : i32
    return %c0_i32, %c0_i32_0 : i32, i32
  }
  func.func @transform_3(%arg0: i32, %arg1: i32) -> (i32, i32, i32, i32) {
    %c0_i32 = arith.constant 0 : i32
    %c0_i32_0 = arith.constant 0 : i32
    %c0_i32_1 = arith.constant 0 : i32
    return %arg0, %c0_i32, %arg1, %c0_i32_0 : i32, i32, i32, i32
  }
  func.func @transform_4(%arg0: i32, %arg1: i32) -> (i32, i32, i32, i32) {
    %c0_i32 = arith.constant 0 : i32
    %c0_i32_0 = arith.constant 0 : i32
    %c0_i32_1 = arith.constant 0 : i32
    return %arg0, %c0_i32, %arg1, %c0_i32_0 : i32, i32, i32, i32
  }
  func.func @transform_5(%arg0: i32, %arg1: i32) -> (i32, i32, i32, i32) {
    %c0_i32 = arith.constant 0 : i32
    %c0_i32_0 = arith.constant 0 : i32
    %c0_i32_1 = arith.constant 0 : i32
    return %arg0, %c0_i32, %arg1, %c0_i32_0 : i32, i32, i32, i32
  }
}

</mosaic_0001>

<bundles_post_ra>
// kernel: tpu_custom_call.1
= control target key start
LH: loop header
LB: loop body
LE: loop exit
PB: predicated region body
PF: predicated region fallthrough
CT: control target
= control target key end

     0   :  { %s12506_s0 = inlined_call_operand.hbm [shape: f32[2,512,256], index: 0, kind: input, shape index: {}]   ;;  %s12507_s1 = inlined_call_operand.hbm [shape: bf16[256,768], index: 1, kind: input, shape index: {}]   ;;  %s12508_s2 = inlined_call_operand.vmem [shape: f32[1,768], index: 2, kind: input, shape index: {}]   ;;  %s12509_s3 = inlined_call_operand.hbm [shape: bf16[2,4,512,128], index: 3, kind: output, shape index: {0}]   ;;  %s12510_s4 = inlined_call_operand.hbm [shape: bf16[2,4,512,128], index: 4, kind: output, shape index: {1}]   ;;  %s12511_s5 = inlined_call_operand.hbm [shape: bf16[2,4,512,128], index: 5, kind: output, shape index: {2}]  }
   0x1   :  { %12559 = sst [smem:[#allocation45_spill]] %s12507_s1 }
   0x2   :  { %12560 = sst [smem:[#allocation46_spill]] %s12511_s5 }
   0x3   :  { %11 = vsyncpa [#allocation3], 0 }
   0x4   :  { %13 = vsyncpa [#allocation3 + $0x1], 0 }
   0x5   :  { %14 = vsyncpa [#allocation6], 0 }
   0x6   :  { %15 = vsyncpa [#allocation4], 0 }
   0x7   :  { %17 = vsyncpa [#allocation4 + $0x1], 0 }
   0x8   :  { %18 = vsyncpa [#allocation9], 0 }
   0x9   :  { %20 = vsyncpa [#allocation9 + $0x1], 0  ;;  %s10046_s18 = smov 0   ;;  %s10048_s19 = smov 0  }
   0xa   :  { %s10050_s20 = smov 0   ;;  %s10052_s21 = smov 0  }
   0xb   :  { %s10054_s22 = smov 0   ;;  %s10056_s23 = smov 0  }
   0xc   :  { %s10058_s24 = smov 0   ;;  %s10060_s25 = smov 0  }
   0xd LB: > { %12561 = sst [smem:[#allocation21_spill]] %s9955_s18  ;;  %s10087_s26 = sadd.s32 4294967295, %s9983_s25   ;;  %s9983_s25 = sphi %s10060_s25, %s26_s25   ;;  %s9979_s24 = sphi %s10058_s24, %s12649_s24   ;;  %s9975_s23 = sphi %s10056_s23, %s12643_s23   ;;  %s9971_s22 = sphi %s10054_s22, %s12648_s22   ;;  %s9967_s21 = sphi %s10052_s21, %s12642_s21   ;;  %s9963_s20 = sphi %s10050_s20, %s12647_s20   ;;  %s9959_s19 = sphi %s10048_s19, %s12646_s19   ;;  %s9955_s18 = sphi %s10046_s18, %s12645_s18  }
   0xe   : > { %12562 = sst [smem:[#allocation22_spill]] %s9975_s23  ;;  %s12515_s27 = sadd.s32 4294967294, %s9983_s25  }
   0xf   : > { %p60_p0 = scmp.ne.s32.totalorder %s9959_s19, %s9955_s18  ;;  %p12512_p1 = scmp.eq.s32.totalorder %s10087_s26, 0 }
  0x10   : > { %p134_p3 = scmp.eq.s32.totalorder %s12515_s27, 7  ;;  %p9112_p5 = scmp.ge.s32.totalorder %s9983_s25, 1 }
  0x11   : > { %p10098_p4 = por %p12512_p1, %p60_p0  ;;  %p197_p7 = scmp.lt.s32.totalorder %s9983_s25, 9 }
  0x12   : > { %p10103_p6 = por %p134_p3, %p60_p0  ;;  %s9985_s6 = smov [#allocation5]  }
  0x13   : > { %s12563_s28 = scalar_select %p10098_p4, 1, 0 }
  0x14   : > { %s12564_s29 = scalar_select %p10103_p6, 1, 0 }
  0x15   : > { %p10108_p8 = pnand %p9112_p5, %p197_p7  ;;  %s209_s7 = sshll.u32 %s9985_s6, 4  ;;  %s210_s7 = int_to_ptr.vmem [resolvable:$true] %s209_s7 }
  0x16   : > { %12565 = sst [smem:[#allocation23_spill]] %s12564_s29  ;;  %s12568_s1 = sld [smem:[#allocation45_spill]] }
  0x17   : > { %s12566_s30 = scalar_select %p10108_p8, 1, 0 }
  0x18   : > { %p9587_p9 = pneg %p10108_p8 }
  0x1a   : > { %p10116_p10 = pnand %p9587_p9, %p12512_p1 }
  0x1c   : > { %s9847_s11 = scalar_lea.hbm %s12568_s1, 12288  ;;  %p9849_p12 = pneg %p10116_p10 }
  0x1d   : > { %p9848_p11 = scmp.ne.s32.totalorder %s12568_s1, %s9847_s11  ;;  %p9854_p3 = scmp.lt.u32.totalorder %s9847_s11, %s12568_s1 }
  0x1f   : > { %p9850_p13 = pnand %p9849_p12, %p9848_p11 }
  0x21   : > { %p9851_p0 = pneg %p9850_p13 }
  0x23   : > { %p9856_p5 = pnand %p9854_p3, %p9851_p0 }
  0x25   : > { %9859 = shalt.err (!%p9856_p5)
}
  0x26   : > { %s9860_s16 = scalar_lea.vmem %s210_s7, 12288  ;;  %p9868_p2 = scmp.lt.s32.totalorder %s210_s7, %s210_s7 }
  0x27   : > { %p9861_p7 = scmp.ne.s32.totalorder %s210_s7, %s9860_s16  ;;  %p9869_p6 = scmp.lt.s32.totalorder %s9860_s16, %s9860_s16 }
  0x29   : > { %p9863_p9 = pnand %p9861_p7, %p9849_p12  ;;  %p9870_p4 = por %p9869_p6, %p9868_p2 }
  0x2b   : > { %p9864_p1 = pneg %p9863_p9 }
  0x2d   : > { %p9871_p8 = pnand %p9870_p4, %p9864_p1 }
  0x2f   : > { %9874 = shalt.err (!%p9871_p8)
}
  0x30   : > { %s9986_s17 = smov 384   ;;  %s9987_s6 = smov 24  }
  0x31   : > { %9590 = dma.hbm_to_vmem [thread:$0]  (!%p10116_p10), %s12568_s1, 12288, %s210_s7, [#allocation6], %s9986_s17, %s9986_s17, %s9987_s6  }
  0x32   : > { %s35_s11 = sadd.s32 1, %s9975_s23  ;;  %s38_s12 = sadd.s32 1, %s9979_s24 }
  0x33   : > { %p36_p1 = scmp.ge.s32.totalorder %s35_s11, 4  ;;  %s47_s13 = sadd.s32 1, %s9963_s20 }
  0x34   : > { %p54_p2 = scmp.ne.s32.totalorder %s9963_s20, %s9959_s19  ;;  %p55_p4 = scmp.eq.s32.totalorder %s9983_s25, 0 }
  0x35   : > { %s12651_s11 = smov (%p36_p1, %s35_s11), 0  ;;  %s12653_s12 = smov (!%p36_p1, %s38_s12), %s9979_s24 }
  0x36   : > { %12569 = sst [smem:[#allocation24_spill]] %s12651_s11  ;;  %s43_s14 = ssub.s32 %s9975_s23, %s12651_s11 }
  0x37   : > { %p40_p6 = scmp.ge.s32.totalorder %s12653_s12, 2  ;;  %p12570_p8 = scmp.eq.s32.totalorder %s10087_s26, 7 }
  0x38   : > { %p10153_p10 = por %p55_p4, %p54_p2  ;;  %p9606_p12 = scmp.lt.s32.totalorder %s9983_s25, 8 }
  0x39   : > { %p10149_p11 = por %p12570_p8, %p54_p2  ;;  %s12655_s12 = smov (%p40_p6, %s12653_s12), 0 }
  0x3a   : > { %12573 = sst [smem:[#allocation25_spill]] %s12655_s12  ;;  %s226_s15 = sand.u32 1, %s9963_s20  }
  0x3b   : > { %s9524_s16 = sshll.u32 %s9975_s23, 5  ;;  %s42_s17 = ssub.s32 %s9979_s24, %s12655_s12 }
  0x3c   : > { %s44_s6 = sor.u32 %s43_s14, %s42_s17  ;;  %s9115_s9 = sshll.u32 %s226_s15, 8 }
  0x3d   : > { %p45_p13 = scmp.eq.s32.totalorder %s44_s6, 0  ;;  %s9118_s10 = sshll.u32 %s9979_s24, 7 }
  0x3e   : > { %s230_s27 = scalar_lea.vmem [#allocation2], %s9115_s9  ;;  %s237_s29 = sadd.s32 %s9524_s16, %s9118_s10 }
  0x3f   : > { %s240_s1 = sshll.u32 %s230_s27, 4  ;;  %s9119_s18 = sshll.u32 %s237_s29, 7  ;;  %s10168_s1 = int_to_ptr.vmem [resolvable:$true] %s240_s1 }
  0x40   : > { %s10166_s11 = scalar_select %p45_p13, %s9963_s20, %s47_s13  }
  0x41   : > { %p10174_p0 = pnand %p9606_p12, %p10153_p10  ;;  %s10181_s14 = scalar_lea.hbm %s12506_s0, %s9119_s18 }
  0x42   : > { %s10183_s27 = scalar_lea.sflag [#allocation3], %s226_s15  ;;  %s9875_s29 = scalar_lea.hbm %s10181_s14, 4096 }
  0x43   : > { %p9876_p3 = scmp.ne.s32.totalorder %s10181_s14, %s9875_s29  ;;  %p9877_p5 = pneg %p10174_p0 }
  0x44   : > { %s9880_s12 = scalar_lea.hbm %s12506_s0, 32768  ;;  %p9881_p1 = scmp.lt.u32.totalorder %s10181_s14, %s12506_s0 }
  0x45   : > { %p9878_p7 = pnand %p9877_p5, %p9876_p3  ;;  %p9882_p2 = scmp.lt.u32.totalorder %s9880_s12, %s9875_s29 }
  0x46   : > { %p9884_p6 = scmp.lt.u32.totalorder %s9875_s29, %s10181_s14 }
  0x47   : > { %p9879_p9 = pneg %p9878_p7  ;;  %p9883_p4 = por %p9882_p2, %p9881_p1 }
  0x49   : > { %p9885_p8 = por %p9884_p6, %p9883_p4 }
  0x4b   : > { %p9886_p10 = pnand %p9885_p8, %p9879_p9 }
  0x4d   : > { %9889 = shalt.err (!%p9886_p10)
}
  0x4e   : > { %s9890_s15 = scalar_lea.vmem %s10168_s1, 4096  ;;  %s9988_s16 = smov [#allocation2]  }
  0x4f   : > { %p9891_p12 = scmp.ne.s32.totalorder %s10168_s1, %s9890_s15  ;;  %s9895_s17 = sshll.u32 %s9988_s16, 4  ;;  %s9896_s17 = int_to_ptr.vmem [resolvable:$false] %s9895_s17 }
  0x50   : > { %s9897_s6 = scalar_lea.vmem %s9896_s17, 8192  ;;  %p9898_p7 = scmp.lt.s32.totalorder %s10168_s1, %s9896_s17 }
  0x51   : > { %p9893_p13 = pnand %p9891_p12, %p9877_p5  ;;  %p9899_p1 = scmp.lt.s32.totalorder %s9897_s6, %s9890_s15 }
  0x53   : > { %p9894_p3 = pneg %p9893_p13  ;;  %p9900_p2 = por %p9899_p1, %p9898_p7 }
  0x55   : > { %p9901_p4 = pnand %p9900_p2, %p9894_p3 }
  0x57   : > { %9904 = shalt.err (!%p9901_p4)
}
  0x58   : > { %s9989_s9 = smov 256   ;;  %s9990_s10 = smov 16  }
  0x59   : > { %9594 = dma.hbm_to_vmem [thread:$0]  (!%p10174_p0), %s10181_s14, 4096, %s10168_s1, %s10183_s27, %s9989_s9, %s9989_s9, %s9990_s10  }
  0x5a   : > { %p12575_p5 = scmp.ne.s32.totalorder %s12566_s30, 0 }
  0x5c   : > { %252 = sbr.rel (%p12575_p5) target bundleno = 1058 (0x422), region = 32 }
  0x63   : > { %s10214_s29 = sand.u32 1, %s9959_s19   ;;  %p12576_p9 = scmp.ne.s32.totalorder %s12563_s28, 0 }
  0x64   : > { %s10217_s13 = sshll.u32 %s10214_s29, 8  ;;  %s255_s23 = scalar_lea.sflag [#allocation3], %s10214_s29 }
  0x65   : > { %s10221_s12 = scalar_lea.vmem [#allocation2], %s10217_s13 }
  0x66   : > { %9938 = dma.done.wait (%p12576_p9), %s255_s23, 4096  }
  0x67   : > { %9940 = vsyncadd (%p12576_p9), %s255_s23, 4294963200  ;;  %p12577_p0 = scmp.eq.s32.totalorder %s10087_s26, 0 }
  0x69   : > { %9942 = dma.done.wait (%p12577_p0), [#allocation6], 12288   ;;  %p12578_p6 = pmov %p12577_p0 }
  0x6a   : > { %v9703_v0 = vld [vmem:[#allocation5 + $0x4] ss:$24 sps:$4 sm:$0xff]   ;;  %v9707_v2 = vld [vmem:[#allocation5] ss:$24 sps:$4 sm:$0xff]   ;;  %v9709_v4 = vld [vmem:[#allocation5 + $0x34] ss:$24 sps:$4 sm:$0xff]  }
  0x6b   : > { %9944 = vsyncadd (%p12578_p6), [#allocation6], 4294955008  ;;  %v9705_v1 = vld [vmem:[#allocation5 + $0xc] ss:$24 sps:$4 sm:$0xff]   ;;  %960 = vmatprep.subr.bf16.mxu0 %v9703_v0  ;;  %v9708_v3 = vld [vmem:[#allocation5 + $0x8] ss:$24 sps:$4 sm:$0xff]  }
  0x6c   : > { %1073 = vmatprep.subr.bf16.mxu1 %v9705_v1  ;;  %961 = vmatpush1.bf16.msra.mxu0 %v9707_v2  ;;  %v9711_v5 = vld [vmem:[#allocation5 + $0x3c] ss:$24 sps:$4 sm:$0xff]   ;;  %v9713_v6 = vld [vmem:[#allocation5 + $0x30] ss:$24 sps:$4 sm:$0xff]   ;;  %v9717_v9 = vld [vmem:[#allocation5 + $0x6c] ss:$24 sps:$4 sm:$0xff]  }
  0x6d   : > { %1074 = vmatpush1.bf16.msra.mxu1 %v9708_v3  ;;  %962 = vmatprep.subr.bf16.mxu0 %v9709_v4  ;;  %v9714_v7 = vld [vmem:[#allocation5 + $0x38] ss:$24 sps:$4 sm:$0xff]   ;;  %v9715_v8 = vld [vmem:[#allocation5 + $0x64] ss:$24 sps:$4 sm:$0xff]   ;;  %v9720_v11 = vld [vmem:[#allocation5 + $0x68] ss:$24 sps:$4 sm:$0xff]  }
  0x6e   : > { %1075 = vmatprep.subr.bf16.mxu1 %v9711_v5  ;;  %v9719_v10 = vld [vmem:[#allocation5 + $0x60] ss:$24 sps:$4 sm:$0xff]   ;;  %v9721_v12 = vld [vmem:[#allocation5 + $0x94] ss:$24 sps:$4 sm:$0xff]   ;;  %v9725_v14 = vld [vmem:[#allocation5 + $0x90] ss:$24 sps:$4 sm:$0xff]  }
  0x6f   : > { %v9723_v13 = vld [vmem:[#allocation5 + $0x9c] ss:$24 sps:$4 sm:$0xff]   ;;  %v9726_v15 = vld [vmem:[#allocation5 + $0x98] ss:$24 sps:$4 sm:$0xff]   ;;  %v9729_v17 = vld [vmem:[#allocation5 + $0xcc] ss:$24 sps:$4 sm:$0xff]  }
  0x70   : > { %963 = vmatpush1.bf16.msra.mxu0 %v9713_v6  ;;  %v9727_v16 = vld [vmem:[#allocation5 + $0xc4] ss:$24 sps:$4 sm:$0xff]   ;;  %v9731_v18 = vld [vmem:[#allocation5 + $0xc0] ss:$24 sps:$4 sm:$0xff]   ;;  %v9733_v20 = vld [vmem:[#allocation5 + $0xf4] ss:$24 sps:$4 sm:$0xff]  }
  0x71   : > { %1076 = vmatpush1.bf16.msra.mxu1 %v9714_v7  ;;  %964 = vmatprep.subr.bf16.mxu0 %v9715_v8  ;;  %v9732_v19 = vld [vmem:[#allocation5 + $0xc8] ss:$24 sps:$4 sm:$0xff]   ;;  %v9735_v21 = vld [vmem:[#allocation5 + $0xfc] ss:$24 sps:$4 sm:$0xff]   ;;  %v9738_v23 = vld [vmem:[#allocation5 + $0xf8] ss:$24 sps:$4 sm:$0xff]  }
  0x72   : > { %1077 = vmatprep.subr.bf16.mxu1 %v9717_v9  ;;  %v9737_v22 = vld [vmem:[#allocation5 + $0xf0] ss:$24 sps:$4 sm:$0xff]   ;;  %v9739_v24 = vld [vmem:[#allocation5 + $0x124] ss:$24 sps:$4 sm:$0xff]   ;;  %v9743_v26 = vld [vmem:[#allocation5 + $0x120] ss:$24 sps:$4 sm:$0xff]  }
  0x73   : > { %v9741_v25 = vld [vmem:[#allocation5 + $0x12c] ss:$24 sps:$4 sm:$0xff]   ;;  %v9744_v27 = vld [vmem:[#allocation5 + $0x128] ss:$24 sps:$4 sm:$0xff]   ;;  %v9747_v29 = vld [vmem:[#allocation5 + $0x15c] ss:$24 sps:$4 sm:$0xff]  }
  0x74   : > { %965 = vmatpush1.bf16.msra.mxu0 %v9719_v10  ;;  %v9745_v28 = vld [vmem:[#allocation5 + $0x154] ss:$24 sps:$4 sm:$0xff]   ;;  %v9749_v30 = vld [vmem:[#allocation5 + $0x150] ss:$24 sps:$4 sm:$0xff]   ;;  %v9751_v32 = vld [vmem:[#allocation5 + $0x184] ss:$24 sps:$4 sm:$0xff]  }
  0x75   : > { %1078 = vmatpush1.bf16.msra.mxu1 %v9720_v11  ;;  %966 = vmatprep.subr.bf16.mxu0 %v9721_v12  ;;  %v9750_v31 = vld [vmem:[#allocation5 + $0x158] ss:$24 sps:$4 sm:$0xff]   ;;  %v9753_v33 = vld [vmem:[#allocation5 + $0x18c] ss:$24 sps:$4 sm:$0xff]   ;;  %v9756_v35 = vld [vmem:[#allocation5 + $0x188] ss:$24 sps:$4 sm:$0xff]  }
  0x76   : > { %1079 = vmatprep.subr.bf16.mxu1 %v9723_v13  ;;  %v9755_v34 = vld [vmem:[#allocation5 + $0x180] ss:$24 sps:$4 sm:$0xff]   ;;  %v9757_v36 = vld [vmem:[#allocation5 + $0x1b4] ss:$24 sps:$4 sm:$0xff]   ;;  %v9761_v38 = vld [vmem:[#allocation5 + $0x1b0] ss:$24 sps:$4 sm:$0xff]  }
  0x77   : > { %v9759_v37 = vld [vmem:[#allocation5 + $0x1bc] ss:$24 sps:$4 sm:$0xff]   ;;  %v9762_v39 = vld [vmem:[#allocation5 + $0x1b8] ss:$24 sps:$4 sm:$0xff]   ;;  %v9765_v41 = vld [vmem:[#allocation5 + $0x1ec] ss:$24 sps:$4 sm:$0xff]  }
  0x78   : > { %967 = vmatpush1.bf16.msra.mxu0 %v9725_v14  ;;  %v9763_v40 = vld [vmem:[#allocation5 + $0x1e4] ss:$24 sps:$4 sm:$0xff]   ;;  %v9767_v42 = vld [vmem:[#allocation5 + $0x1e0] ss:$24 sps:$4 sm:$0xff]   ;;  %v9769_v44 = vld [vmem:[#allocation5 + $0x214] ss:$24 sps:$4 sm:$0xff]  }
  0x79   : > { %1080 = vmatpush1.bf16.msra.mxu1 %v9726_v15  ;;  %968 = vmatprep.subr.bf16.mxu0 %v9727_v16  ;;  %v9768_v43 = vld [vmem:[#allocation5 + $0x1e8] ss:$24 sps:$4 sm:$0xff]   ;;  %v9771_v45 = vld [vmem:[#allocation5 + $0x21c] ss:$24 sps:$4 sm:$0xff]   ;;  %v9774_v48 = vld [vmem:[#allocation5 + $0x218] ss:$24 sps:$4 sm:$0xff]  }
  0x7a   : > { %1081 = vmatprep.subr.bf16.mxu1 %v9729_v17  ;;  %v305_v46 = vld [vmem:[%s10221_s12 + $0x8] sm:$0xff]  ;;  %v307_v49 = vld [vmem:[%s10221_s12 + $0x18] sm:$0xff]  ;;  %v304_v3 = vld [vmem:[%s10221_s12] sm:$0xff]  ;;  %s9991_s28 = smov 64   ;;  %vm3449_vm0 = vcmask 523264   ;;  %s10783_s30 = scalar_lea.vmem [#allocation7], %s10217_s13 }
  0x7b   : > { %v9773_v47 = vld [vmem:[#allocation5 + $0x210] ss:$24 sps:$4 sm:$0xff]   ;;  %v9775_v50 = vld [vmem:[#allocation5 + $0x244] ss:$24 sps:$4 sm:$0xff]   ;;  %v10233_v51 = vpack.c.bf16 %v307_v49, %v305_v46  ;;  %v9779_v53 = vld [vmem:[#allocation5 + $0x240] ss:$24 sps:$4 sm:$0xff]  }
  0x7c   : > { %969 = vmatpush1.bf16.msra.mxu0 %v9731_v18  ;;  %v9777_v52 = vld [vmem:[#allocation5 + $0x24c] ss:$24 sps:$4 sm:$0xff]   ;;  %v9780_v54 = vld [vmem:[#allocation5 + $0x248] ss:$24 sps:$4 sm:$0xff]   ;;  %v9783_v56 = vld [vmem:[#allocation5 + $0x27c] ss:$24 sps:$4 sm:$0xff]  }
  0x7d   : > { %1082 = vmatpush1.bf16.msra.mxu1 %v9732_v19  ;;  %970 = vmatprep.subr.bf16.mxu0 %v9733_v20  ;;  %v9781_v55 = vld [vmem:[#allocation5 + $0x274] ss:$24 sps:$4 sm:$0xff]   ;;  %v9785_v57 = vld [vmem:[#allocation5 + $0x270] ss:$24 sps:$4 sm:$0xff]   ;;  %v9787_v59 = vld [vmem:[#allocation5 + $0x2a4] ss:$24 sps:$4 sm:$0xff]  }
  0x7e   : > { %1083 = vmatprep.subr.bf16.mxu1 %v9735_v21  ;;  %992 = vmatprep.mubr.bf16.mxu0 %v10233_v51  ;;  %v9786_v58 = vld [vmem:[#allocation5 + $0x278] ss:$24 sps:$4 sm:$0xff]   ;;  %v9789_v60 = vld [vmem:[#allocation5 + $0x2ac] ss:$24 sps:$4 sm:$0xff]   ;;  %v9792_v62 = vld [vmem:[#allocation5 + $0x2a8] ss:$24 sps:$4 sm:$0xff]  }
  0x7f   : > { %1105 = vmatprep.mubr.bf16.mxu1 %v10233_v51  ;;  %v9791_v61 = vld [vmem:[#allocation5 + $0x2a0] ss:$24 sps:$4 sm:$0xff]   ;;  %v9793_v63 = vld [vmem:[#allocation5 + $0x2d4] ss:$24 sps:$4 sm:$0xff]   ;;  %v9797_v1 = vld [vmem:[#allocation5 + $0x2d0] ss:$24 sps:$4 sm:$0xff]  }
  0x80   : > { %971 = vmatpush1.bf16.msra.mxu0 %v9737_v22  ;;  %v9795_v0 = vld [vmem:[#allocation5 + $0x2dc] ss:$24 sps:$4 sm:$0xff]   ;;  %v9798_v2 = vld [vmem:[#allocation5 + $0x2d8] ss:$24 sps:$4 sm:$0xff]   ;;  %v309_v7 = vld [vmem:[%s10221_s12 + $0x28] sm:$0xff]  ;;  %s10853_s14 = scalar_lea.vmem [#allocation8], %s10217_s13 }
  0x81   : > { %1084 = vmatpush1.bf16.msra.mxu1 %v9738_v23  ;;  %972 = vmatprep.subr.bf16.mxu0 %v9739_v24  ;;  %v306_v4 = vld [vmem:[%s10221_s12 + $0x10] sm:$0xff]  ;;  %v311_v8 = vld [vmem:[%s10221_s12 + $0x38] sm:$0xff]  ;;  %v308_v13 = vld [vmem:[%s10221_s12 + $0x20] sm:$0xff]  ;;  %s11973_s27 = scalar_lea.vmem [#allocation10], %s10217_s13  ;;  %s8799_s18 = sand.u32 1, %s10087_s26  }
  0x82   : > { %1085 = vmatprep.subr.bf16.mxu1 %v9741_v25  ;;  %v9801_v5 = vld [vmem:[#allocation5 + $0x14] ss:$24 sps:$4 sm:$0xff]   ;;  %v10239_v6 = vpack.c.bf16 %v306_v4, %v304_v3  ;;  %v9799_v9 = vld [vmem:[#allocation5 + $0x10] ss:$24 sps:$4 sm:$0xff]   ;;  %v9804_v10 = vld [vmem:[#allocation5 + $0x44] ss:$24 sps:$4 sm:$0xff]   ;;  %v10243_v11 = vpack.c.bf16 %v311_v8, %v309_v7 }
  0x83   : > { %v9802_v12 = vld [vmem:[#allocation5 + $0x40] ss:$24 sps:$4 sm:$0xff]   ;;  %v310_v14 = vld [vmem:[%s10221_s12 + $0x30] sm:$0xff]  ;;  %v313_v17 = vld [vmem:[%s10221_s12 + $0x48] sm:$0xff]  ;;  %s8795_s7 = scalar_lea.sflag [#allocation4], %s10214_s29  ;;  %s12411_s15 = scalar_lea.sflag [#allocation9], %s8799_s18 }
  0x84   : > { %973 = vmatpush1.bf16.msra.mxu0 %v9743_v26  ;;  %v9807_v15 = vld [vmem:[#allocation5 + $0x74] ss:$24 sps:$4 sm:$0xff]   ;;  %v10251_v16 = vpack.c.bf16 %v310_v14, %v308_v13  ;;  %v315_v18 = vld [vmem:[%s10221_s12 + $0x58] sm:$0xff]  ;;  %v9805_v19 = vld [vmem:[#allocation5 + $0x70] ss:$24 sps:$4 sm:$0xff]  }
  0x85   : > { %1086 = vmatpush1.bf16.msra.mxu1 %v9744_v27  ;;  %974 = vmatprep.subr.bf16.mxu0 %v9745_v28  ;;  %v9810_v20 = vld [vmem:[#allocation5 + $0xa4] ss:$24 sps:$4 sm:$0xff]   ;;  %v10255_v21 = vpack.c.bf16 %v315_v18, %v313_v17  ;;  %v9808_v22 = vld [vmem:[#allocation5 + $0xa0] ss:$24 sps:$4 sm:$0xff]   ;;  %v314_v24 = vld [vmem:[%s10221_s12 + $0x50] sm:$0xff] }
  0x86   : > { %1087 = vmatprep.subr.bf16.mxu1 %v9747_v29  ;;  %v312_v23 = vld [vmem:[%s10221_s12 + $0x40] sm:$0xff]  ;;  %v9813_v25 = vld [vmem:[#allocation5 + $0xd4] ss:$24 sps:$4 sm:$0xff]   ;;  %v319_v28 = vld [vmem:[%s10221_s12 + $0x78] sm:$0xff] }
  0x87   : > { %v10263_v26 = vpack.c.bf16 %v314_v24, %v312_v23  ;;  %v317_v27 = vld [vmem:[%s10221_s12 + $0x68] sm:$0xff]  ;;  %v9840_v8 = vld [vmem:[#allocation5 + $0x284] ss:$24 sps:$4 sm:$0xff]   ;;  %v334_v13 = vld [vmem:[%s10221_s12 + $0xf0] sm:$0xff] }
  0x88   : > { %975 = vmatpush1.bf16.msra.mxu0 %v9749_v30  ;;  %v9811_v29 = vld [vmem:[#allocation5 + $0xd0] ss:$24 sps:$4 sm:$0xff]   ;;  %v9816_v30 = vld [vmem:[#allocation5 + $0x104] ss:$24 sps:$4 sm:$0xff]   ;;  %v9843_v14 = vld [vmem:[#allocation5 + $0x2b4] ss:$24 sps:$4 sm:$0xff]  }
  0x89   : > { %1088 = vmatpush1.bf16.msra.mxu1 %v9750_v31  ;;  %976 = vmatprep.subr.bf16.mxu0 %v9751_v32  ;;  %v10267_v31 = vpack.c.bf16 %v319_v28, %v317_v27  ;;  %v9814_v32 = vld [vmem:[#allocation5 + $0x100] ss:$24 sps:$4 sm:$0xff]   ;;  %v9823_v49 = vld [vmem:[#allocation5 + $0x190] ss:$24 sps:$4 sm:$0xff]   ;;  %v9846_v18 = vld [vmem:[#allocation5 + $0x2e4] ss:$24 sps:$4 sm:$0xff]  }
  0x8a   : > { %1089 = vmatprep.subr.bf16.mxu1 %v9753_v33  ;;  %v316_v33 = vld [vmem:[%s10221_s12 + $0x60] sm:$0xff]  ;;  %v333_v4 = vld [vmem:[%s10221_s12 + $0xe8] sm:$0xff] }
  0x8b   : > { %v9835_v7 = vld [vmem:[#allocation5 + $0x250] ss:$24 sps:$4 sm:$0xff]  }
  0x8c   : > { %977 = vmatpush1.bf16.msra.mxu0 %v9755_v34  ;;  %v318_v34 = vld [vmem:[%s10221_s12 + $0x70] sm:$0xff] }
  0x8d   : > { %1090 = vmatpush1.bf16.msra.mxu1 %v9756_v35  ;;  %978 = vmatprep.subr.bf16.mxu0 %v9757_v36  ;;  %v9819_v35 = vld [vmem:[#allocation5 + $0x134] ss:$24 sps:$4 sm:$0xff]   ;;  %v10275_v36 = vpack.c.bf16 %v318_v34, %v316_v33  ;;  %v9841_v17 = vld [vmem:[#allocation5 + $0x2b0] ss:$24 sps:$4 sm:$0xff]  }
  0x8e   : > { %1091 = vmatprep.subr.bf16.mxu1 %v9759_v37  ;;  %v321_v37 = vld [vmem:[%s10221_s12 + $0x88] sm:$0xff] }
  0x90   : > { %979 = vmatpush1.bf16.msra.mxu0 %v9761_v38  ;;  %v323_v38 = vld [vmem:[%s10221_s12 + $0x98] sm:$0xff] }
  0x91   : > { %1092 = vmatpush1.bf16.msra.mxu1 %v9762_v39  ;;  %980 = vmatprep.subr.bf16.mxu0 %v9763_v40  ;;  %v9817_v39 = vld [vmem:[#allocation5 + $0x130] ss:$24 sps:$4 sm:$0xff]   ;;  %v9822_v40 = vld [vmem:[#allocation5 + $0x164] ss:$24 sps:$4 sm:$0xff]  }
  0x92   : > { %1093 = vmatprep.subr.bf16.mxu1 %v9765_v41  ;;  %v10279_v41 = vpack.c.bf16 %v323_v38, %v321_v37 }
  0x94   : > { %981 = vmatpush1.bf16.msra.mxu0 %v9767_v42  ;;  %v9820_v42 = vld [vmem:[#allocation5 + $0x160] ss:$24 sps:$4 sm:$0xff]  }
  0x95   : > { %1094 = vmatpush1.bf16.msra.mxu1 %v9768_v43  ;;  %982 = vmatprep.subr.bf16.mxu0 %v9769_v44  ;;  %v320_v43 = vld [vmem:[%s10221_s12 + $0x80] sm:$0xff]  ;;  %v322_v44 = vld [vmem:[%s10221_s12 + $0x90] sm:$0xff] }
  0x96   : > { %1095 = vmatprep.subr.bf16.mxu1 %v9771_v45  ;;  %v9825_v45 = vld [vmem:[#allocation5 + $0x194] ss:$24 sps:$4 sm:$0xff]   ;;  %v10287_v46 = vpack.c.bf16 %v322_v44, %v320_v43 }
  0x98   : > { %983 = vmatpush1.bf16.msra.mxu0 %v9773_v47  ;;  %v325_v47 = vld [vmem:[%s10221_s12 + $0xa8] sm:$0xff] }
  0x99   : > { %1096 = vmatpush1.bf16.msra.mxu1 %v9774_v48  ;;  %984 = vmatprep.subr.bf16.mxu0 %v9775_v50  ;;  %v327_v48 = vld [vmem:[%s10221_s12 + $0xb8] sm:$0xff] }
  0x9a   : > { %1097 = vmatprep.subr.bf16.mxu1 %v9777_v52  ;;  %v9828_v50 = vld [vmem:[#allocation5 + $0x1c4] ss:$24 sps:$4 sm:$0xff]   ;;  %v10291_v52 = vpack.c.bf16 %v327_v48, %v325_v47 }
  0x9c   : > { %985 = vmatpush1.bf16.msra.mxu0 %v9779_v53  ;;  %v9826_v53 = vld [vmem:[#allocation5 + $0x1c0] ss:$24 sps:$4 sm:$0xff]  }
  0x9d   : > { %1098 = vmatpush1.bf16.msra.mxu1 %v9780_v54  ;;  %986 = vmatprep.subr.bf16.mxu0 %v9781_v55  ;;  %v324_v54 = vld [vmem:[%s10221_s12 + $0xa0] sm:$0xff]  ;;  %v326_v55 = vld [vmem:[%s10221_s12 + $0xb0] sm:$0xff] }
  0x9e   : > { %1099 = vmatprep.subr.bf16.mxu1 %v9783_v56  ;;  %v9831_v56 = vld [vmem:[#allocation5 + $0x1f4] ss:$24 sps:$4 sm:$0xff]  }
  0xa0   : > { %987 = vmatpush1.bf16.msra.mxu0 %v9785_v57  ;;  %v10299_v57 = vpack.c.bf16 %v326_v55, %v324_v54 }
  0xa1   : > { %1100 = vmatpush1.bf16.msra.mxu1 %v9786_v58  ;;  %988 = vmatprep.subr.bf16.mxu0 %v9787_v59  ;;  %v329_v58 = vld [vmem:[%s10221_s12 + $0xc8] sm:$0xff]  ;;  %v331_v59 = vld [vmem:[%s10221_s12 + $0xd8] sm:$0xff] }
  0xa2   : > { %1101 = vmatprep.subr.bf16.mxu1 %v9789_v60  ;;  %v9829_v60 = vld [vmem:[#allocation5 + $0x1f0] ss:$24 sps:$4 sm:$0xff]  }
  0xa4   : > { %989 = vmatpush1.bf16.msra.mxu0 %v9791_v61  ;;  %v9834_v61 = vld [vmem:[#allocation5 + $0x224] ss:$24 sps:$4 sm:$0xff]  }
  0xa5   : > { %1102 = vmatpush1.bf16.msra.mxu1 %v9792_v62  ;;  %990 = vmatprep.subr.bf16.mxu0 %v9793_v63  ;;  %v349_v62 = vpack.c.bf16 %v331_v59, %v329_v58  ;;  %v9832_v63 = vld [vmem:[#allocation5 + $0x220] ss:$24 sps:$4 sm:$0xff]  }
  0xa6   : > { %1103 = vmatprep.subr.bf16.mxu1 %v9795_v0  ;;  %v328_v0 = vld [vmem:[%s10221_s12 + $0xc0] sm:$0xff] }
  0xa8   : > { %991 = vmatpush1.bf16.msra.mxu0 %v9797_v1  ;;  %v330_v1 = vld [vmem:[%s10221_s12 + $0xd0] sm:$0xff] }
  0xa9   : > { %1104 = vmatpush1.bf16.msra.mxu1 %v9798_v2  ;;  %1186 = vmatprep.subr.bf16.mxu0 %v9801_v5  ;;  %v9837_v2 = vld [vmem:[#allocation5 + $0x254] ss:$24 sps:$4 sm:$0xff]   ;;  %v348_v3 = vpack.c.bf16 %v330_v1, %v328_v0 }
  0xaa   : > { %9525 = vmatprep.subr.bf16.mxu1 %v9801_v5  ;;  %v335_v5 = vld [vmem:[%s10221_s12 + $0xf8] sm:$0xff] }
  0xab   : > { %993 = vmatmul.mubr.bf16.vlgmr.msra.gmra.mrb[0].mxu0 %v10239_v6 }
  0xac   : > { %1106 = vmatmul.mubr.bf16.vlgmr.msra.gmra.mrb[0].mxu1 %v10239_v6  ;;  %1187 = vmatpush1.bf16.msra.mxu0 %v9799_v9 }
  0xad   : > { %9541 = vmatpush1.bf16.msra.mxu1 %v9799_v9  ;;  %1188 = vmatprep.subr.bf16.mxu0 %v9804_v10  ;;  %v351_v9 = vpack.c.bf16 %v335_v5, %v333_v4 }
  0xae   : > { %9526 = vmatprep.subr.bf16.mxu1 %v9804_v10  ;;  %1002 = vmatprep.mubr.bf16.mxu0 %v10243_v11  ;;  %v9838_v10 = vld [vmem:[#allocation5 + $0x280] ss:$24 sps:$4 sm:$0xff]  }
  0xaf   : > { %1115 = vmatprep.mubr.bf16.mxu1 %v10243_v11 }
  0xb0   : > { %1189 = vmatpush1.bf16.msra.mxu0 %v9802_v12 }
  0xb1   : > { %9542 = vmatpush1.bf16.msra.mxu1 %v9802_v12  ;;  %1190 = vmatprep.subr.bf16.mxu0 %v9807_v15  ;;  %v332_v12 = vld [vmem:[%s10221_s12 + $0xe0] sm:$0xff] }
  0xb2   : > { %9527 = vmatprep.subr.bf16.mxu1 %v9807_v15  ;;  %v350_v15 = vpack.c.bf16 %v334_v13, %v332_v12 }
  0xb3   : > { %1003 = vmatmul.mubr.bf16.gmra.mrb[4].mxu0 %v10251_v16 }
  0xb4   : > { %1116 = vmatmul.mubr.bf16.gmra.mrb[4].mxu1 %v10251_v16  ;;  %1191 = vmatpush1.bf16.msra.mxu0 %v9805_v19 }
  0xb5   : > { %9543 = vmatpush1.bf16.msra.mxu1 %v9805_v19  ;;  %1192 = vmatprep.subr.bf16.mxu0 %v9810_v20  ;;  %v9844_v19 = vld [vmem:[#allocation5 + $0x2e0] ss:$24 sps:$4 sm:$0xff]  }
  0xb6   : > { %9528 = vmatprep.subr.bf16.mxu1 %v9810_v20  ;;  %1012 = vmatprep.mubr.bf16.mxu0 %v10255_v21  ;;  %v10330_v20 = vld [vmem:[%s12508_s2] sm:$0x3f] }
  0xb7   : > { %1125 = vmatprep.mubr.bf16.mxu1 %v10255_v21 }
  0xb8   : > { %1193 = vmatpush1.bf16.msra.mxu0 %v9808_v22 }
  0xb9   : > { %9544 = vmatpush1.bf16.msra.mxu1 %v9808_v22  ;;  %1194 = vmatprep.subr.bf16.mxu0 %v9813_v25 }
  0xba   : > { %9529 = vmatprep.subr.bf16.mxu1 %v9813_v25 }
  0xbb   : > { %1013 = vmatmul.mubr.bf16.gmra.mrb[8].mxu0 %v10263_v26 }
  0xbc   : > { %1126 = vmatmul.mubr.bf16.gmra.mrb[8].mxu1 %v10263_v26  ;;  %1195 = vmatpush1.bf16.msra.mxu0 %v9811_v29 }
  0xbd   : > { %9545 = vmatpush1.bf16.msra.mxu1 %v9811_v29  ;;  %1196 = vmatprep.subr.bf16.mxu0 %v9816_v30 }
  0xbe   : > { %9530 = vmatprep.subr.bf16.mxu1 %v9816_v30  ;;  %1022 = vmatprep.mubr.bf16.mxu0 %v10267_v31 }
  0xbf   : > { %1135 = vmatprep.mubr.bf16.mxu1 %v10267_v31 }
  0xc0   : > { %1197 = vmatpush1.bf16.msra.mxu0 %v9814_v32 }
  0xc1   : > { %9546 = vmatpush1.bf16.msra.mxu1 %v9814_v32  ;;  %1198 = vmatprep.subr.bf16.mxu0 %v9819_v35 }
  0xc2   : > { %9531 = vmatprep.subr.bf16.mxu1 %v9819_v35 }
  0xc3   : > { %1023 = vmatmul.mubr.bf16.gmra.mrb[12].mxu0 %v10275_v36 }
  0xc4   : > { %1136 = vmatmul.mubr.bf16.gmra.mrb[12].mxu1 %v10275_v36  ;;  %1199 = vmatpush1.bf16.msra.mxu0 %v9817_v39 }
  0xc5   : > { %9547 = vmatpush1.bf16.msra.mxu1 %v9817_v39  ;;  %1200 = vmatprep.subr.bf16.mxu0 %v9822_v40 }
  0xc6   : > { %9532 = vmatprep.subr.bf16.mxu1 %v9822_v40  ;;  %1032 = vmatprep.mubr.bf16.mxu0 %v10279_v41 }
  0xc7   : > { %1145 = vmatprep.mubr.bf16.mxu1 %v10279_v41 }
  0xc8   : > { %1201 = vmatpush1.bf16.msra.mxu0 %v9820_v42 }
  0xc9   : > { %9548 = vmatpush1.bf16.msra.mxu1 %v9820_v42  ;;  %1202 = vmatprep.subr.bf16.mxu0 %v9825_v45 }
  0xca   : > { %9533 = vmatprep.subr.bf16.mxu1 %v9825_v45 }
  0xcb   : > { %1033 = vmatmul.mubr.bf16.gmra.mrb[16].mxu0 %v10287_v46 }
  0xcc   : > { %1146 = vmatmul.mubr.bf16.gmra.mrb[16].mxu1 %v10287_v46  ;;  %1203 = vmatpush1.bf16.msra.mxu0 %v9823_v49 }
  0xcd   : > { %9549 = vmatpush1.bf16.msra.mxu1 %v9823_v49  ;;  %1204 = vmatprep.subr.bf16.mxu0 %v9828_v50 }
  0xce   : > { %9534 = vmatprep.subr.bf16.mxu1 %v9828_v50  ;;  %1042 = vmatprep.mubr.bf16.mxu0 %v10291_v52 }
  0xcf   : > { %1155 = vmatprep.mubr.bf16.mxu1 %v10291_v52 }
  0xd0   : > { %1205 = vmatpush1.bf16.msra.mxu0 %v9826_v53 }
  0xd1   : > { %9550 = vmatpush1.bf16.msra.mxu1 %v9826_v53  ;;  %1206 = vmatprep.subr.bf16.mxu0 %v9831_v56 }
  0xd2   : > { %9535 = vmatprep.subr.bf16.mxu1 %v9831_v56 }
  0xd3   : > { %1043 = vmatmul.mubr.bf16.gmra.mrb[20].mxu0 %v10299_v57 }
  0xd4   : > { %1156 = vmatmul.mubr.bf16.gmra.mrb[20].mxu1 %v10299_v57  ;;  %1207 = vmatpush1.bf16.msra.mxu0 %v9829_v60 }
  0xd5   : > { %9551 = vmatpush1.bf16.msra.mxu1 %v9829_v60  ;;  %1208 = vmatprep.subr.bf16.mxu0 %v9834_v61 }
  0xd6   : > { %9536 = vmatprep.subr.bf16.mxu1 %v9834_v61  ;;  %1052 = vmatprep.mubr.bf16.mxu0 %v349_v62 }
  0xd7   : > { %1165 = vmatprep.mubr.bf16.mxu1 %v349_v62 }
  0xd8   : > { %1209 = vmatpush1.bf16.msra.mxu0 %v9832_v63 }
  0xd9   : > { %9552 = vmatpush1.bf16.msra.mxu1 %v9832_v63  ;;  %1210 = vmatprep.subr.bf16.mxu0 %v9837_v2 }
  0xda   : > { %9537 = vmatprep.subr.bf16.mxu1 %v9837_v2 }
  0xdb   : > { %1053 = vmatmul.mubr.bf16.gmra.mrb[24].mxu0 %v348_v3 }
  0xdc   : > { %1166 = vmatmul.mubr.bf16.gmra.mrb[24].mxu1 %v348_v3  ;;  %1211 = vmatpush1.bf16.msra.mxu0 %v9835_v7 }
  0xdd   : > { %9553 = vmatpush1.bf16.msra.mxu1 %v9835_v7  ;;  %1212 = vmatprep.subr.bf16.mxu0 %v9840_v8 }
  0xde   : > { %9538 = vmatprep.subr.bf16.mxu1 %v9840_v8  ;;  %1062 = vmatprep.mubr.bf16.mxu0 %v351_v9 }
  0xdf   : > { %1175 = vmatprep.mubr.bf16.mxu1 %v351_v9 }
  0xe0   : > { %1213 = vmatpush1.bf16.msra.mxu0 %v9838_v10 }
  0xe1   : > { %9554 = vmatpush1.bf16.msra.mxu1 %v9838_v10  ;;  %1214 = vmatprep.subr.bf16.mxu0 %v9843_v14 }
  0xe2   : > { %9539 = vmatprep.subr.bf16.mxu1 %v9843_v14 }
  0xe3   : > { %1063 = vmatmul.mubr.bf16.gmra.mrb[28].mxu0 %v350_v15 }
  0xe4   : > { %1176 = vmatmul.mubr.bf16.gmra.mrb[28].mxu1 %v350_v15  ;;  %1215 = vmatpush1.bf16.msra.mxu0 %v9841_v17 }
  0xe5   : > { %9555 = vmatpush1.bf16.msra.mxu1 %v9841_v17  ;;  %1216 = vmatprep.subr.bf16.mxu0 %v9846_v18 }
  0xe6   : > { %9540 = vmatprep.subr.bf16.mxu1 %v9846_v18  ;;  %1218 = vmatprep.mubr.bf16.mxu0 %v10233_v51  ;;  %v450_v51 = vlaneseq }
  0xe7   : > { %1258 = vmatprep.mubr.bf16.mxu1 %v10279_v41 }
  0xe8   : > { %1217 = vmatpush1.bf16.msra.mxu0 %v9844_v19 }
  0xe9   : > { %9556 = vmatpush1.bf16.msra.mxu1 %v9844_v19 }
  0xeb   : > { %1219 = vmatmul.mubr.bf16.vlgmr.msra.gmra.mrb[32].mxu0 %v10239_v6  ;;  %v10323_v6 = vshrl.u32 %v450_v51, 7 }
  0xec   : > { %1259 = vmatmul.mubr.bf16.vlgmr.msra.gmra.mrb[32].mxu1 %v10287_v46  ;;  %1228 = vmatprep.mubr.bf16.mxu0 %v10243_v11 }
  0xed   : > { %1268 = vmatprep.mubr.bf16.mxu1 %v10291_v52  ;;  %v452_v11 = vsub.s32 0, %v10323_v6  ;;  %v464_v22 = vsub.s32 3, %v10323_v6 }
  0xef   : > { %v10335_v23 = vrot.slane %v10330_v20, %v452_v11  ;;  %v10344_v28 = vrot.slane %v10330_v20, %v464_v22 }
  0xf3   : > { %1229 = vmatmul.mubr.bf16.gmra.mrb[36].mxu0 %v10251_v16  ;;  %v460_v16 = vsub.s32 2, %v10323_v6 }
  0xf4   : > { %1269 = vmatmul.mubr.bf16.gmra.mrb[36].mxu1 %v10299_v57  ;;  %1238 = vmatprep.mubr.bf16.mxu0 %v10255_v21  ;;  %v456_v21 = vsub.s32 1, %v10323_v6 }
  0xf5   : > { %1278 = vmatprep.mubr.bf16.mxu1 %v349_v62  ;;  %v10338_v24 = vrot.slane %v10330_v20, %v460_v16 }
  0xf6   : > { %v10341_v27 = vrot.slane %v10330_v20, %v456_v21 }
  0xfb   : > { %1239 = vmatmul.mubr.bf16.gmra.mrb[40].mxu0 %v10263_v26 }
  0xfc   : > { %1279 = vmatmul.mubr.bf16.gmra.mrb[40].mxu1 %v348_v3  ;;  %1248 = vmatprep.mubr.bf16.mxu0 %v10267_v31 }
  0xfd   : > { %1288 = vmatprep.mubr.bf16.mxu1 %v351_v9 }
 0x103   : > { %1249 = vmatmul.mubr.bf16.gmra.mrb[44].mxu0 %v10275_v36 }
 0x104   : > { %1289 = vmatmul.mubr.bf16.gmra.mrb[44].mxu1 %v350_v15 }
 0x17e   : > { %v994_v25 = vpop.f32.mrb[0].mxu0 }
 0x17f   : > { %v1107_v26 = vpop.f32.mrb[0].mxu1  ;;  %v996_v29 = vpop.f32.mrb[1].mxu0  ;;  %v995_v33 = vadd.f32 %v994_v25, %v10335_v23 }
 0x180   : > { %v1109_v30 = vpop.f32.mrb[1].mxu1  ;;  %v998_v31 = vpop.f32.mrb[2].mxu0  ;;  %v1108_v34 = vadd.f32 %v1107_v26, %v10338_v24  ;;  %v997_v39 = vadd.f32 %v996_v29, %v10341_v27 }
 0x181   : > { %v1111_v32 = vpop.f32.mrb[2].mxu1  ;;  %v999_v35 = vadd.f32 %v998_v31, %v10335_v23  ;;  %v1000_v37 = vpop.f32.mrb[3].mxu0  ;;  %v1110_v40 = vadd.f32 %v1109_v30, %v10344_v28 }
 0x182   : > { %v1112_v36 = vadd.f32 %v1111_v32, %v10338_v24  ;;  %v1113_v38 = vpop.f32.mrb[3].mxu1  ;;  %v1001_v41 = vadd.f32 %v1000_v37, %v10341_v27 }
 0x183   : > { %v1114_v42 = vadd.f32 %v1113_v38, %v10344_v28  ;;  %v10354_v43 = vpack.c.bf16 %v999_v35, %v995_v33 }
 0x184   : > { %v10356_v44 = vpack.c.bf16 %v1112_v36, %v1108_v34  ;;  %v10358_v45 = vpack.c.bf16 %v1001_v41, %v997_v39 }
 0x185   : > { %v10360_v46 = vpack.c.bf16 %v1114_v42, %v1110_v40  ;;  %1323 = vrot.lane.b32.xlu0 %v10354_v43, %s9991_s28 }
 0x186   : > { %v1004_v47 = vpop.f32.mrb[4].mxu0 }
 0x187   : > { %v1117_v48 = vpop.f32.mrb[4].mxu1  ;;  %v1006_v49 = vpop.f32.mrb[5].mxu0  ;;  %v1005_v54 = vadd.f32 %v1004_v47, %v10335_v23 }
 0x188   : > { %v1119_v50 = vpop.f32.mrb[5].mxu1  ;;  %v1008_v52 = vpop.f32.mrb[6].mxu0  ;;  %v1118_v55 = vadd.f32 %v1117_v48, %v10338_v24  ;;  %v1007_v60 = vadd.f32 %v1006_v49, %v10341_v27 }
 0x189   : > { %v1121_v53 = vpop.f32.mrb[6].mxu1  ;;  %v1009_v56 = vadd.f32 %v1008_v52, %v10335_v23  ;;  %v1010_v58 = vpop.f32.mrb[7].mxu0  ;;  %3826 = vrot.lane.b32.xlu0 %v10356_v44, %s9991_s28  ;;  %v1120_v61 = vadd.f32 %v1119_v50, %v10344_v28 }
 0x18a   : > { %v1122_v57 = vadd.f32 %v1121_v53, %v10338_v24  ;;  %v1123_v59 = vpop.f32.mrb[7].mxu1  ;;  %v1011_v62 = vadd.f32 %v1010_v58, %v10341_v27 }
 0x18b   : > { %v1124_v63 = vadd.f32 %v1123_v59, %v10344_v28  ;;  %v10374_v0 = vpack.c.bf16 %v1009_v56, %v1005_v54 }
 0x18c   : > { %v10376_v1 = vpack.c.bf16 %v1122_v57, %v1118_v55  ;;  %v10378_v2 = vpack.c.bf16 %v1011_v62, %v1007_v60 }
 0x18d   : > { %v10380_v3 = vpack.c.bf16 %v1124_v63, %v1120_v61  ;;  %1347 = vrot.lane.b32.xlu0 %v10358_v45, %s9991_s28 }
 0x18e   : > { %3828 = vrot.lane.b32.xlu1 %v10376_v1, %s9991_s28  ;;  %v1014_v4 = vpop.f32.mrb[8].mxu0 }
 0x18f   : > { %v1127_v5 = vpop.f32.mrb[8].mxu1  ;;  %v1016_v7 = vpop.f32.mrb[9].mxu0  ;;  %v1015_v14 = vadd.f32 %v1014_v4, %v10335_v23 }
 0x190   : > { %v1128_v8 = vadd.f32 %v1127_v5, %v10338_v24  ;;  %v1129_v9 = vpop.f32.mrb[9].mxu1  ;;  %v1018_v10 = vpop.f32.mrb[10].mxu0  ;;  %v1017_v51 = vadd.f32 %v1016_v7, %v10341_v27 }
 0x191   : > { %v1130_v12 = vadd.f32 %v1129_v9, %v10344_v28  ;;  %v1131_v13 = vpop.f32.mrb[10].mxu1  ;;  %v1019_v15 = vadd.f32 %v1018_v10, %v10335_v23  ;;  %v1020_v17 = vpop.f32.mrb[11].mxu0  ;;  %3850 = vrot.lane.b32.xlu0 %v10360_v46, %s9991_s28 }
 0x192   : > { %1349 = vrot.lane.b32.xlu1 %v10378_v2, %s9991_s28  ;;  %v1132_v18 = vadd.f32 %v1131_v13, %v10338_v24  ;;  %v1133_v19 = vpop.f32.mrb[11].mxu1  ;;  %v1021_v11 = vadd.f32 %v1020_v17, %v10341_v27 }
 0x193   : > { %v1134_v16 = vadd.f32 %v1133_v19, %v10344_v28  ;;  %v10398_v21 = vpack.c.bf16 %v1019_v15, %v1015_v14 }
 0x194   : > { %v10400_v22 = vpack.c.bf16 %v1132_v18, %v1128_v8  ;;  %v10402_v25 = vpack.c.bf16 %v1021_v11, %v1017_v51 }
 0x195   : > { %v10404_v26 = vpack.c.bf16 %v1134_v16, %v1130_v12  ;;  %1325 = vrot.lane.b32.xlu0 %v10374_v0, %s9991_s28 }
 0x196   : > { %3852 = vrot.lane.b32.xlu1 %v10380_v3, %s9991_s28  ;;  %v1024_v29 = vpop.f32.mrb[12].mxu0 }
 0x197   : > { %v1137_v30 = vpop.f32.mrb[12].mxu1  ;;  %v1026_v31 = vpop.f32.mrb[13].mxu0  ;;  %v1025_v37 = vadd.f32 %v1024_v29, %v10335_v23 }
 0x198   : > { %v1138_v32 = vadd.f32 %v1137_v30, %v10338_v24  ;;  %v1139_v33 = vpop.f32.mrb[13].mxu1  ;;  %v1028_v34 = vpop.f32.mrb[14].mxu0  ;;  %v1027_v42 = vadd.f32 %v1026_v31, %v10341_v27 }
 0x199   : > { %v1140_v35 = vadd.f32 %v1139_v33, %v10344_v28  ;;  %v1141_v36 = vpop.f32.mrb[14].mxu1  ;;  %v1029_v38 = vadd.f32 %v1028_v34, %v10335_v23  ;;  %v1030_v39 = vpop.f32.mrb[15].mxu0  ;;  %3830 = vrot.lane.b32.xlu0 %v10400_v22, %s9991_s28 }
 0x19a   : > { %1327 = vrot.lane.b32.xlu1 %v10398_v21, %s9991_s28  ;;  %v1142_v40 = vadd.f32 %v1141_v36, %v10338_v24  ;;  %v1143_v41 = vpop.f32.mrb[15].mxu1  ;;  %v1031_v47 = vadd.f32 %v1030_v39, %v10341_v27 }
 0x19b   : > { %v1144_v48 = vadd.f32 %v1143_v41, %v10344_v28  ;;  %v10422_v49 = vpack.c.bf16 %v1029_v38, %v1025_v37 }
 0x19c   : > { %v10424_v50 = vpack.c.bf16 %v1142_v40, %v1138_v32  ;;  %v10426_v52 = vpack.c.bf16 %v1031_v47, %v1027_v42 }
 0x19d   : > { %v10428_v53 = vpack.c.bf16 %v1144_v48, %v1140_v35  ;;  %1351 = vrot.lane.b32.xlu0 %v10402_v25, %s9991_s28 }
 0x19e   : > { %1329 = vrot.lane.b32.xlu1 %v10422_v49, %s9991_s28  ;;  %v1034_v54 = vpop.f32.mrb[16].mxu0 }
 0x19f   : > { %v1147_v55 = vpop.f32.mrb[16].mxu1  ;;  %v1036_v56 = vpop.f32.mrb[17].mxu0  ;;  %v1035_v62 = vadd.f32 %v1034_v54, %v10335_v23 }
 0x1a0   : > { %v1148_v57 = vadd.f32 %v1147_v55, %v10338_v24  ;;  %v1149_v58 = vpop.f32.mrb[17].mxu1  ;;  %v1038_v59 = vpop.f32.mrb[18].mxu0  ;;  %v1037_v8 = vadd.f32 %v1036_v56, %v10341_v27 }
 0x1a1   : > { %v1150_v60 = vadd.f32 %v1149_v58, %v10344_v28  ;;  %v1151_v61 = vpop.f32.mrb[18].mxu1  ;;  %v1039_v63 = vadd.f32 %v1038_v59, %v10335_v23  ;;  %v1040_v4 = vpop.f32.mrb[19].mxu0  ;;  %3854 = vrot.lane.b32.xlu0 %v10404_v26, %s9991_s28 }
 0x1a2   : > { %3832 = vrot.lane.b32.xlu1 %v10424_v50, %s9991_s28  ;;  %v1152_v5 = vadd.f32 %v1151_v61, %v10338_v24  ;;  %v1153_v7 = vpop.f32.mrb[19].mxu1  ;;  %v1041_v9 = vadd.f32 %v1040_v4, %v10341_v27 }
 0x1a3   : > { %v1154_v10 = vadd.f32 %v1153_v7, %v10344_v28  ;;  %v10446_v12 = vpack.c.bf16 %v1039_v63, %v1035_v62 }
 0x1a4   : > { %v10448_v13 = vpack.c.bf16 %v1152_v5, %v1148_v57  ;;  %v10450_v14 = vpack.c.bf16 %v1041_v9, %v1037_v8 }
 0x1a5   : > { %v10452_v15 = vpack.c.bf16 %v1154_v10, %v1150_v60  ;;  %1331 = vrot.lane.b32.xlu0 %v10446_v12, %s9991_s28 }
 0x1a6   : > { %1353 = vrot.lane.b32.xlu1 %v10426_v52, %s9991_s28  ;;  %v1044_v17 = vpop.f32.mrb[20].mxu0 }
 0x1a7   : > { %v1157_v18 = vpop.f32.mrb[20].mxu1  ;;  %v1046_v19 = vpop.f32.mrb[21].mxu0  ;;  %v1045_v31 = vadd.f32 %v1044_v17, %v10335_v23 }
 0x1a8   : > { %v1158_v51 = vadd.f32 %v1157_v18, %v10338_v24  ;;  %v1159_v11 = vpop.f32.mrb[21].mxu1  ;;  %v1048_v16 = vpop.f32.mrb[22].mxu0  ;;  %v1047_v36 = vadd.f32 %v1046_v19, %v10341_v27 }
 0x1a9   : > { %v1160_v29 = vadd.f32 %v1159_v11, %v10344_v28  ;;  %v1161_v30 = vpop.f32.mrb[22].mxu1  ;;  %v1049_v32 = vadd.f32 %v1048_v16, %v10335_v23  ;;  %v1050_v33 = vpop.f32.mrb[23].mxu0  ;;  %3834 = vrot.lane.b32.xlu0 %v10448_v13, %s9991_s28 }
 0x1aa   : > { %3856 = vrot.lane.b32.xlu1 %v10428_v53, %s9991_s28  ;;  %v1162_v34 = vadd.f32 %v1161_v30, %v10338_v24  ;;  %v1163_v35 = vpop.f32.mrb[23].mxu1  ;;  %v1051_v37 = vadd.f32 %v1050_v33, %v10341_v27 }
 0x1ab   : > { %v1164_v38 = vadd.f32 %v1163_v35, %v10344_v28  ;;  %v10470_v39 = vpack.c.bf16 %v1049_v32, %v1045_v31 }
 0x1ac   : > { %v10472_v40 = vpack.c.bf16 %v1162_v34, %v1158_v51  ;;  %v10474_v41 = vpack.c.bf16 %v1051_v37, %v1047_v36 }
 0x1ad   : > { %v10476_v42 = vpack.c.bf16 %v1164_v38, %v1160_v29  ;;  %1355 = vrot.lane.b32.xlu0 %v10450_v14, %s9991_s28  ;;  %v468_v38 = vsub.s32 4, %v10323_v6 }
 0x1ae   : > { %1333 = vrot.lane.b32.xlu1 %v10470_v39, %s9991_s28  ;;  %v1054_v47 = vpop.f32.mrb[24].mxu0 }
 0x1af   : > { %v1167_v48 = vpop.f32.mrb[24].mxu1  ;;  %v1056_v54 = vpop.f32.mrb[25].mxu0  ;;  %v1055_v60 = vadd.f32 %v1054_v47, %v10335_v23 }
 0x1b0   : > { %v1168_v55 = vadd.f32 %v1167_v48, %v10338_v24  ;;  %v1169_v56 = vpop.f32.mrb[25].mxu1  ;;  %v1058_v57 = vpop.f32.mrb[26].mxu0  ;;  %v1057_v5 = vadd.f32 %v1056_v54, %v10341_v27 }
 0x1b1   : > { %v1170_v58 = vadd.f32 %v1169_v56, %v10344_v28  ;;  %v1171_v59 = vpop.f32.mrb[26].mxu1  ;;  %v1059_v61 = vadd.f32 %v1058_v57, %v10335_v23  ;;  %v1060_v62 = vpop.f32.mrb[27].mxu0  ;;  %3858 = vrot.lane.b32.xlu0 %v10452_v15, %s9991_s28 }
 0x1b2   : > { %3836 = vrot.lane.b32.xlu1 %v10472_v40, %s9991_s28  ;;  %v1172_v63 = vadd.f32 %v1171_v59, %v10338_v24  ;;  %v1173_v4 = vpop.f32.mrb[27].mxu1  ;;  %v1061_v7 = vadd.f32 %v1060_v62, %v10341_v27 }
 0x1b3   : > { %v1174_v8 = vadd.f32 %v1173_v4, %v10344_v28  ;;  %v10494_v9 = vpack.c.bf16 %v1059_v61, %v1055_v60 }
 0x1b4   : > { %v10496_v10 = vpack.c.bf16 %v1172_v63, %v1168_v55  ;;  %v10498_v17 = vpack.c.bf16 %v1061_v7, %v1057_v5 }
 0x1b5   : > { %v10500_v18 = vpack.c.bf16 %v1174_v8, %v1170_v58  ;;  %1335 = vrot.lane.b32.xlu0 %v10494_v9, %s9991_s28 }
 0x1b6   : > { %1357 = vrot.lane.b32.xlu1 %v10474_v41, %s9991_s28  ;;  %v1064_v19 = vpop.f32.mrb[28].mxu0 }
 0x1b7   : > { %12579 = vst [vmem:[#allocation26_spill] sm:$0xff] %v10500_v18  ;;  %v1177_v51 = vpop.f32.mrb[28].mxu1  ;;  %v1066_v11 = vpop.f32.mrb[29].mxu0  ;;  %v1065_v33 = vadd.f32 %v1064_v19, %v10335_v23 }
 0x1b8   : > { %v1178_v16 = vadd.f32 %v1177_v51, %v10338_v24  ;;  %v1179_v29 = vpop.f32.mrb[29].mxu1  ;;  %v1068_v30 = vpop.f32.mrb[30].mxu0  ;;  %v1067_v47 = vadd.f32 %v1066_v11, %v10341_v27 }
 0x1b9   : > { %v1180_v31 = vadd.f32 %v1179_v29, %v10344_v28  ;;  %v1181_v32 = vpop.f32.mrb[30].mxu1  ;;  %v1069_v34 = vadd.f32 %v1068_v30, %v10335_v23  ;;  %v1070_v35 = vpop.f32.mrb[31].mxu0  ;;  %3838 = vrot.lane.b32.xlu0 %v10496_v10, %s9991_s28  ;;  %v472_v23 = vsub.s32 5, %v10323_v6 }
 0x1ba   : > { %3860 = vrot.lane.b32.xlu1 %v10476_v42, %s9991_s28  ;;  %v1182_v36 = vadd.f32 %v1181_v32, %v10338_v24  ;;  %v1183_v37 = vpop.f32.mrb[31].mxu1  ;;  %v1071_v48 = vadd.f32 %v1070_v35, %v10341_v27  ;;  %v10533_v24 = vrot.slane %v10330_v20, %v468_v38 }
 0x1bb   : > { %v1184_v54 = vadd.f32 %v1183_v37, %v10344_v28  ;;  %v10520_v55 = vpack.c.bf16 %v1069_v34, %v1065_v33  ;;  %v10536_v28 = vrot.slane %v10330_v20, %v472_v23 }
 0x1bc   : > { %v10522_v56 = vpack.c.bf16 %v1182_v36, %v1178_v16  ;;  %v10524_v57 = vpack.c.bf16 %v1071_v48, %v1067_v47 }
 0x1bd   : > { %v10526_v58 = vpack.c.bf16 %v1184_v54, %v1180_v31  ;;  %1359 = vrot.lane.b32.xlu0 %v10498_v17, %s9991_s28 }
 0x1be   : > { %12580 = vst [vmem:[#allocation27_spill] sm:$0xff] %v10524_v57  ;;  %1337 = vrot.lane.b32.xlu1 %v10520_v55, %s9991_s28  ;;  %v1220_v27 = vpop.f32.mrb[32].mxu0 }
 0x1bf   : > { %12581 = vst [vmem:[#allocation28_spill] sm:$0xff] %v10526_v58  ;;  %v1260_v59 = vpop.f32.mrb[32].mxu1  ;;  %v1222_v60 = vpop.f32.mrb[33].mxu0  ;;  %v1221_v7 = vadd.f32 %v1220_v27, %v10533_v24 }
 0x1c0   : > { %v1261_v61 = vadd.f32 %v1260_v59, %v10533_v24  ;;  %v1262_v62 = vpop.f32.mrb[33].mxu1  ;;  %v1224_v63 = vpop.f32.mrb[34].mxu0  ;;  %v1223_v11 = vadd.f32 %v1222_v60, %v10536_v28 }
 0x1c1   : > { %v1263_v4 = vadd.f32 %v1262_v62, %v10536_v28  ;;  %v1264_v5 = vpop.f32.mrb[34].mxu1  ;;  %v1225_v8 = vadd.f32 %v1224_v63, %v10533_v24  ;;  %v1226_v19 = vpop.f32.mrb[35].mxu0  ;;  %3862 = vrot.lane.b32.xlu0 %v10500_v18, %s9991_s28 }
 0x1c2   : > { %3840 = vrot.lane.b32.xlu1 %v10522_v56, %s9991_s28  ;;  %v1265_v20 = vadd.f32 %v1264_v5, %v10533_v24  ;;  %v1266_v51 = vpop.f32.mrb[35].mxu1  ;;  %v1227_v16 = vadd.f32 %v1226_v19, %v10536_v28 }
 0x1c3   : > { %v1267_v29 = vadd.f32 %v1266_v51, %v10536_v28  ;;  %v10550_v30 = vpack.c.bf16 %v1225_v8, %v1221_v7 }
 0x1c4   : > { %v10552_v31 = vpack.c.bf16 %v1265_v20, %v1261_v61  ;;  %v10554_v32 = vpack.c.bf16 %v1227_v16, %v1223_v11 }
 0x1c5   : > { %12582 = vst [vmem:[#allocation29_spill] sm:$0xff] %v10550_v30  ;;  %v10556_v33 = vpack.c.bf16 %v1267_v29, %v1263_v4  ;;  %6322 = vrot.lane.b32.xlu0 %v10550_v30, %s9991_s28 }
 0x1c6   : > { %12583 = vst [vmem:[#allocation30_spill] sm:$0xff] %v10552_v31  ;;  %12584 = vst [vmem:[#allocation31_spill] sm:$0xff] %v10554_v32  ;;  %1361 = vrot.lane.b32.xlu1 %v10524_v57, %s9991_s28  ;;  %v1230_v34 = vpop.f32.mrb[36].mxu0 }
 0x1c7   : > { %12585 = vst [vmem:[#allocation32_spill] sm:$0xff] %v10556_v33  ;;  %v1270_v35 = vpop.f32.mrb[36].mxu1  ;;  %v1232_v36 = vpop.f32.mrb[37].mxu0  ;;  %v1231_v23 = vadd.f32 %v1230_v34, %v10533_v24 }
 0x1c8   : > { %v1271_v37 = vadd.f32 %v1270_v35, %v10533_v24  ;;  %v1272_v38 = vpop.f32.mrb[37].mxu1  ;;  %v1234_v47 = vpop.f32.mrb[38].mxu0  ;;  %v1233_v62 = vadd.f32 %v1232_v36, %v10536_v28 }
 0x1c9   : > { %v1273_v48 = vadd.f32 %v1272_v38, %v10536_v28  ;;  %v1274_v54 = vpop.f32.mrb[38].mxu1  ;;  %v1235_v27 = vadd.f32 %v1234_v47, %v10533_v24  ;;  %v1236_v59 = vpop.f32.mrb[39].mxu0  ;;  %6330 = vrot.lane.b32.xlu0 %v10552_v31, %s9991_s28 }
 0x1ca   : > { %3864 = vrot.lane.b32.xlu1 %v10526_v58, %s9991_s28  ;;  %v1275_v60 = vadd.f32 %v1274_v54, %v10533_v24  ;;  %v1276_v61 = vpop.f32.mrb[39].mxu1  ;;  %v1237_v63 = vadd.f32 %v1236_v59, %v10536_v28 }
 0x1cb   : > { %v1277_v4 = vadd.f32 %v1276_v61, %v10536_v28  ;;  %v10574_v5 = vpack.c.bf16 %v1235_v27, %v1231_v23 }
 0x1cc   : > { %v10576_v7 = vpack.c.bf16 %v1275_v60, %v1271_v37  ;;  %v10578_v8 = vpack.c.bf16 %v1237_v63, %v1233_v62 }
 0x1cd   : > { %12586 = vst [vmem:[#allocation33_spill] sm:$0xff] %v10574_v5  ;;  %v10580_v19 = vpack.c.bf16 %v1277_v4, %v1273_v48  ;;  %6346 = vrot.lane.b32.xlu0 %v10554_v32, %s9991_s28 }
 0x1ce   : > { %12587 = vst [vmem:[#allocation34_spill] sm:$0xff] %v10576_v7  ;;  %12588 = vst [vmem:[#allocation35_spill] sm:$0xff] %v10578_v8  ;;  %6324 = vrot.lane.b32.xlu1 %v10574_v5, %s9991_s28  ;;  %v1240_v20 = vpop.f32.mrb[40].mxu0 }
 0x1cf   : > { %12589 = vst [vmem:[#allocation36_spill] sm:$0xff] %v10580_v19  ;;  %v1280_v51 = vpop.f32.mrb[40].mxu1  ;;  %v1242_v11 = vpop.f32.mrb[41].mxu0  ;;  %v1241_v37 = vadd.f32 %v1240_v20, %v10533_v24 }
 0x1d0   : > { %v1281_v16 = vadd.f32 %v1280_v51, %v10533_v24  ;;  %v1282_v29 = vpop.f32.mrb[41].mxu1  ;;  %v1244_v34 = vpop.f32.mrb[42].mxu0  ;;  %v1243_v23 = vadd.f32 %v1242_v11, %v10536_v28 }
 0x1d1   : > { %v1283_v35 = vadd.f32 %v1282_v29, %v10536_v28  ;;  %v1284_v36 = vpop.f32.mrb[42].mxu1  ;;  %v1245_v38 = vadd.f32 %v1244_v34, %v10533_v24  ;;  %v1246_v47 = vpop.f32.mrb[43].mxu0  ;;  %6354 = vrot.lane.b32.xlu0 %v10556_v33, %s9991_s28 }
 0x1d2   : > { %6332 = vrot.lane.b32.xlu1 %v10576_v7, %s9991_s28  ;;  %v1285_v48 = vadd.f32 %v1284_v36, %v10533_v24  ;;  %v1286_v54 = vpop.f32.mrb[43].mxu1  ;;  %v1247_v27 = vadd.f32 %v1246_v47, %v10536_v28 }
 0x1d3   : > { %v1287_v59 = vadd.f32 %v1286_v54, %v10536_v28  ;;  %v10598_v60 = vpack.c.bf16 %v1245_v38, %v1241_v37 }
 0x1d4   : > { %v10600_v61 = vpack.c.bf16 %v1285_v48, %v1281_v16  ;;  %v10602_v62 = vpack.c.bf16 %v1247_v27, %v1243_v23 }
 0x1d5   : > { %12590 = vst [vmem:[#allocation37_spill] sm:$0xff] %v10598_v60  ;;  %v10604_v63 = vpack.c.bf16 %v1287_v59, %v1283_v35  ;;  %6326 = vrot.lane.b32.xlu0 %v10598_v60, %s9991_s28 }
 0x1d6   : > { %12591 = vst [vmem:[#allocation38_spill] sm:$0xff] %v10600_v61  ;;  %12592 = vst [vmem:[#allocation39_spill] sm:$0xff] %v10602_v62  ;;  %6348 = vrot.lane.b32.xlu1 %v10578_v8, %s9991_s28  ;;  %v1250_v4 = vpop.f32.mrb[44].mxu0 }
 0x1d7   : > { %12593 = vst [vmem:[#allocation40_spill] sm:$0xff] %v10604_v63  ;;  %v1290_v20 = vpop.f32.mrb[44].mxu1  ;;  %v1252_v51 = vpop.f32.mrb[45].mxu0  ;;  %v1251_v37 = vadd.f32 %v1250_v4, %v10533_v24 }
 0x1d8   : > { %v1291_v11 = vadd.f32 %v1290_v20, %v10533_v24  ;;  %v1292_v29 = vpop.f32.mrb[45].mxu1  ;;  %v1254_v34 = vpop.f32.mrb[46].mxu0  ;;  %v1253_v54 = vadd.f32 %v1252_v51, %v10536_v28  ;;  %v9993_v51 = vmov 1934713408  }
 0x1d9   : > { %v1293_v16 = vadd.f32 %v1292_v29, %v10536_v28  ;;  %v1294_v36 = vpop.f32.mrb[46].mxu1  ;;  %v1255_v35 = vadd.f32 %v1254_v34, %v10533_v24  ;;  %v1256_v38 = vpop.f32.mrb[47].mxu0  ;;  %6334 = vrot.lane.b32.xlu0 %v10600_v61, %s9991_s28 }
 0x1da   : > { %6356 = vrot.lane.b32.xlu1 %v10580_v19, %s9991_s28  ;;  %v1295_v47 = vadd.f32 %v1294_v36, %v10533_v24  ;;  %v1296_v48 = vpop.f32.mrb[47].mxu1  ;;  %v1257_v23 = vadd.f32 %v1256_v38, %v10536_v28  ;;  %v9992_v24 = vmov 1983009808   ;;  %v9994_v36 = vmov 0  }
 0x1db   : > { %v1297_v27 = vadd.f32 %v1296_v48, %v10536_v28  ;;  %v10622_v59 = vpack.c.bf16 %v1255_v35, %v1251_v37  ;;  %v1499_v28 = vunpack.c.l.s4 %v9992_v24  ;;  %v10642_v37 = vpack.i.b16 %v9994_v36, %v9994_v36 }
 0x1dc   : > { %v10624_v4 = vpack.c.bf16 %v1295_v47, %v1291_v11  ;;  %v10626_v20 = vpack.c.bf16 %v1257_v23, %v1253_v54  ;;  %v1530_v11 = vunpack.c.l.s4 %v9993_v51  ;;  %v1367_v38 = vshrl.u32 %v10354_v43, 16 }
 0x1dd   : > { %12594 = vst [vmem:[#allocation41_spill] sm:$0xff] %v10622_v59  ;;  %v10628_v29 = vpack.c.bf16 %v1297_v27, %v1293_v16  ;;  %6350 = vrot.lane.b32.xlu0 %v10602_v62, %s9991_s28  ;;  %v1500_v34 = vunpack.c.0.s8 %v1499_v28  ;;  %v3870_v48 = vshrl.u32 %v10356_v44, 16  ;;  %v1375_v54 = vshrl.u32 %v10358_v45, 16 }
 0x1de   : > { %12595 = vst [vmem:[#allocation42_spill] sm:$0xff] %v10624_v4  ;;  %12596 = vst [vmem:[#allocation43_spill] sm:$0xff] %v10626_v20  ;;  %6328 = vrot.lane.b32.xlu1 %v10622_v59, %s9991_s28  ;;  %v1531_v16 = vunpack.c.0.s8 %v1530_v11  ;;  %v3886_v51 = vshrl.u32 %v10376_v1, 16 }
 0x1df   : > { %12597 = vst [vmem:[#allocation44_spill] sm:$0xff] %v10628_v29  ;;  %v10645_v35 = vsub.s32 %v1500_v34, %v10323_v6 }
 0x1e0   : > { %v10651_v23 = vsub.s32 %v1531_v16, %v10323_v6 }
 0x1e1   : > { %6358 = vrot.lane.b32.xlu0 %v10604_v63, %s9991_s28 }
 0x1e2   : > { %6336 = vrot.lane.b32.xlu1 %v10624_v4, %s9991_s28 }
 0x1e6   : > { %6352 = vrot.lane.b32.xlu1 %v10626_v20, %s9991_s28 }
 0x1ea   : > { %6360 = vrot.lane.b32.xlu1 %v10628_v29, %s9991_s28 }
 0x1f7   : > { %v1324_v47 = vpop.permute.xlu0 %1323 }
 0x1f8   : > { %v1365_v24 = vpack.i.b16 %v1324_v47, %v10354_v43  ;;  %v1368_v28 = vshrl.u32 %v1324_v47, 16 }
 0x1fa   : > { %v1369_v63 = vpack.i.b16 %v1368_v28, %v1367_v38  ;;  %v1497_v47 = vcombine.high %v1365_v24, %v10642_v37 }
 0x1fb   : > { %v3827_v27 = vpop.permute.xlu0 %3826 }
 0x1fc   : > { %v1563_v29 = vcombine.high %v1369_v63, %v10642_v37  ;;  %v3868_v20 = vpack.i.b16 %v3827_v27, %v10356_v44  ;;  %v3871_v16 = vshrl.u32 %v3827_v27, 16  ;;  %v1504_v44 = vrot.slane %v1365_v24, %v10645_v35 }
 0x1fd   : > { %v1511_v38 = vrot.slane %v1497_v47, %v10645_v35  ;;  %v1570_v27 = vrot.slane %v1369_v63, %v10645_v35 }
 0x1fe   : > { %v3994_v11 = vcombine.high %v3868_v20, %v10642_v37  ;;  %v3872_v28 = vpack.i.b16 %v3871_v16, %v3870_v48  ;;  %v1577_v6 = vrot.slane %v1563_v29, %v10645_v35  ;;  %v10686_v36 = vrot.slane %v3868_v20, %v10645_v35 }
 0x1ff   : > { %v1348_v59 = vpop.permute.xlu0 %1347 }
 0x200   : > { %v3829_v43 = vpop.permute.xlu1 %3828  ;;  %v1373_v34 = vpack.i.b16 %v1348_v59, %v10358_v45  ;;  %v10689_v62 = vrot.slane %v3994_v11, %v10645_v35  ;;  %v4060_v24 = vcombine.high %v3872_v28, %v10642_v37  ;;  %v1376_v47 = vshrl.u32 %v1348_v59, 16 }
 0x201   : > { %v3884_v4 = vpack.i.b16 %v3829_v43, %v10376_v1  ;;  %v3887_v61 = vshrl.u32 %v3829_v43, 16  ;;  %v10693_v63 = vrot.slane %v3872_v28, %v10645_v35 }
 0x202   : > { %v1512_v1 = vcombine.high %v1373_v34, %v10642_v37  ;;  %v10698_v16 = vrot.slane %v4060_v24, %v10645_v35  ;;  %v1377_v20 = vpack.i.b16 %v1376_v47, %v1375_v54  ;;  %v1519_v11 = vrot.slane %v1373_v34, %v10645_v35 }
 0x203   : > { %v3888_v48 = vpack.i.b16 %v3887_v61, %v3886_v51  ;;  %v4126_v29 = vcombine.high %v3884_v4, %v10642_v37  ;;  %v10701_v45 = vrot.slane %v3884_v4, %v10645_v35 }
 0x204   : > { %v1350_v43 = vpop.permute.xlu1 %1349  ;;  %v1526_v51 = vrot.slane %v1512_v1, %v10645_v35  ;;  %v1527_v19 = vcombine.low %v1504_v44, %v1519_v11  ;;  %v1528_v24 = vcombine.high %v1504_v44, %v1519_v11  ;;  %v1578_v60 = vcombine.high %v1377_v20, %v10642_v37 }
 0x205   : > { %v10705_v59 = vrot.slane %v4126_v29, %v10645_v35  ;;  %v4192_v28 = vcombine.high %v3888_v48, %v10642_v37  ;;  %v10709_v61 = vrot.slane %v3888_v48, %v10645_v35  ;;  %v1585_v4 = vrot.slane %v1377_v20, %v10645_v35 }
 0x206   : > { %v1543_v34 = vcombine.low %v1511_v38, %v1526_v51  ;;  %v1544_v47 = vcombine.high %v1511_v38, %v1526_v51  ;;  %v1395_v29 = vpack.i.b16 %v1350_v43, %v10378_v2  ;;  %v1535_v8 = vrot.slane %v1527_v19, %v10651_v23 }
 0x207   : > { %v10715_v54 = vrot.slane %v4192_v28, %v10645_v35  ;;  %v1542_v48 = vrot.slane %v1528_v24, %v10651_v23  ;;  %v1592_v33 = vrot.slane %v1578_v60, %v10645_v35  ;;  %v1593_v1 = vcombine.low %v1570_v27, %v1585_v4 }
 0x208   : > { %v1551_v44 = vrot.slane %v1543_v34, %v10651_v23  ;;  %v1558_v11 = vrot.slane %v1544_v47, %v10651_v23  ;;  %v1594_v7 = vcombine.high %v1570_v27, %v1585_v4  ;;  %v1398_v20 = vshrl.u32 %v1350_v43, 16 }
 0x209   : > { %v1601_v28 = vrot.slane %v1593_v1, %v10651_v23  ;;  %v1609_v32 = vcombine.low %v1577_v6, %v1592_v33  ;;  %v1610_v5 = vcombine.high %v1577_v6, %v1592_v33  ;;  %v2553_v38 = vcombine.low %v1535_v8, %v1542_v48 }
 0x20a   : > { %v1608_v51 = vrot.slane %v1594_v7, %v10651_v23  ;;  %v9222_v31 = vcombine.high %v1535_v8, %v1542_v48  ;;  %v2569_v19 = vcombine.low %v1551_v44, %v1558_v11  ;;  %v9223_v58 = vcombine.high %v1551_v44, %v1558_v11  ;;  %v3851_v11 = vpop.permute.xlu0 %3850 }
 0x20b   : > { %v1617_v24 = vrot.slane %v1609_v32, %v10651_v23  ;;  %v1624_v60 = vrot.slane %v1610_v5, %v10651_v23  ;;  %v2560_v34 = vrot.slane %v2553_v38, %v10645_v35  ;;  %v12598_v47 = vshrl.u32 %v10378_v2, 16  ;;  %v3853_v38 = vpop.permute.xlu1 %3852 }
 0x20c   : > { %v2568_v43 = vrot.slane %v9222_v31, %v10645_v35  ;;  %v2576_v4 = vrot.slane %v2569_v19, %v10645_v35  ;;  %v2584_v33 = vrot.slane %v9223_v58, %v10645_v35  ;;  %v2603_v6 = vcombine.low %v1601_v28, %v1608_v51 }
 0x20d   : > { %v1399_v27 = vpack.i.b16 %v1398_v20, %v12598_v47  ;;  %v9224_v7 = vcombine.high %v1601_v28, %v1608_v51  ;;  %v2619_v8 = vcombine.low %v1617_v24, %v1624_v60  ;;  %v9225_v48 = vcombine.high %v1617_v24, %v1624_v60 }
 0x20e   : > { %v1644_v1 = vcombine.high %v1395_v29, %v10642_v37  ;;  %v2585_v32 = vcombine.low %v2560_v34, %v2568_v43  ;;  %v2593_v5 = vcombine.low %v2576_v4, %v2584_v33  ;;  %v2610_v44 = vrot.slane %v2603_v6, %v10645_v35 }
 0x20f   : > { %v10736_v2 = vrot.slane %v1395_v29, %v10645_v35  ;;  %v2618_v31 = vrot.slane %v9224_v7, %v10645_v35  ;;  %v2626_v20 = vrot.slane %v2619_v8, %v10645_v35  ;;  %v2634_v58 = vrot.slane %v9225_v48, %v10645_v35 }
 0x210   : > { %v10742_v28 = vrot.slane %v1644_v1, %v10645_v35  ;;  %v2592_v51 = vrot.slane %v2585_v32, %v10651_v23  ;;  %v2600_v19 = vrot.slane %v2593_v5, %v10651_v23  ;;  %v1710_v24 = vcombine.high %v1399_v27, %v10642_v37 }
 0x211   : > { %v10748_v29 = vrot.slane %v1399_v27, %v10645_v35  ;;  %v2635_v60 = vcombine.low %v2610_v44, %v2618_v31  ;;  %v2643_v34 = vcombine.low %v2626_v20, %v2634_v58  ;;  %v3876_v47 = vpack.i.b16 %v3851_v11, %v10360_v46 }
 0x212   : > { %v3879_v43 = vshrl.u32 %v3851_v11, 16  ;;  %v2601_v4 = vcombine.low %v2592_v51, %v2600_v19  ;;  %v2602_v33 = vcombine.high %v2592_v51, %v2600_v19  ;;  %v10752_v6 = vrot.slane %v1710_v24, %v10645_v35 }
 0x213   : > { %v10755_v7 = vpack.i.b16 %v3853_v38, %v10380_v3  ;;  %v2642_v8 = vrot.slane %v2635_v60, %v10651_v23  ;;  %v2650_v48 = vrot.slane %v2643_v34, %v10651_v23  ;;  %v12599_v27 = vshrl.u32 %v10360_v46, 16 }
 0x214   : > { %v4009_v32 = vcombine.high %v3876_v47, %v10642_v37  ;;  %v3356_v5 = vshrl.u32 %v2601_v4, 16  ;;  %v3362_v44 = vshrl.u32 %v2602_v33, 16  ;;  %v4016_v11 = vrot.slane %v3876_v47, %v10645_v35 }
 0x215   : > { %v3880_v1 = vpack.i.b16 %v3879_v43, %v12599_v27  ;;  %v3895_v31 = vshrl.u32 %v3853_v38, 16  ;;  %v2651_v20 = vcombine.low %v2642_v8, %v2650_v48  ;;  %v2652_v58 = vcombine.high %v2642_v8, %v2650_v48 }
 0x216   : > { %v4023_v51 = vrot.slane %v4009_v32, %v10645_v35  ;;  %v4024_v24 = vcombine.low %v10686_v36, %v4016_v11  ;;  %v4025_v60 = vcombine.high %v10686_v36, %v4016_v11  ;;  %v12600_v34 = vshrl.u32 %v10380_v3, 16 }
 0x217   : > { %v4075_v19 = vcombine.high %v3880_v1, %v10642_v37  ;;  %v4082_v46 = vrot.slane %v3880_v1, %v10645_v35  ;;  %v3355_v27 = vpack.i.b16 %v2651_v20, %v2601_v4  ;;  %v3357_v30 = vshrl.u32 %v2651_v20, 16 }
 0x218   : > { %v10770_v43 = vpack.i.b16 %v3895_v31, %v12600_v34  ;;  %v3361_v47 = vpack.i.b16 %v2652_v58, %v2602_v33  ;;  %v3363_v38 = vshrl.u32 %v2652_v58, 16  ;;  %v4032_v8 = vrot.slane %v4024_v24, %v10651_v23 }
 0x219   : > { %v4039_v48 = vrot.slane %v4025_v60, %v10651_v23  ;;  %v4040_v32 = vcombine.low %v10689_v62, %v4023_v51  ;;  %v4041_v57 = vcombine.high %v10689_v62, %v4023_v51  ;;  %v3358_v18 = vpack.i.b16 %v3357_v30, %v3356_v5 }
 0x21a   : > { %v3364_v36 = vpack.i.b16 %v3363_v38, %v3362_v44  ;;  %v3451_v1 = vsel %vm3449_vm0, %v3355_v27, 0  ;;  %v3483_v3 = vsel %vm3449_vm0, %v3361_v47, 0  ;;  %v4091_v51 = vcombine.high %v10693_v63, %v4082_v46 }
 0x21b   : > { %v9254_v11 = vcombine.low %v3451_v1, %v3451_v1  ;;  %v9255_v4 = vcombine.high %v3451_v1, %v3451_v1  ;;  %v9286_v31 = vcombine.low %v3483_v3, %v3483_v3  ;;  %v9287_v33 = vcombine.high %v3483_v3, %v3483_v3 }
 0x21c   : > { %v3467_v20 = vsel %vm3449_vm0, %v3358_v18, 0  ;;  %v3499_v58 = vsel %vm3449_vm0, %v3364_v36, 0  ;;  %v4048_v24 = vrot.slane %v4040_v32, %v10651_v23  ;;  %v4055_v60 = vrot.slane %v4041_v57, %v10651_v23 }
 0x21d   : > { %v9270_v62 = vcombine.low %v3467_v20, %v3467_v20  ;;  %v9271_v30 = vcombine.high %v3467_v20, %v3467_v20  ;;  %v9302_v5 = vcombine.low %v3499_v58, %v3499_v58  ;;  %v9303_v44 = vcombine.high %v3499_v58, %v3499_v58  ;;  %3738 = vst [vmem:[%s10783_s30] sm:$0xf] %v9254_v11 }
 0x21e   : > { %3739 = vst [vmem:[%s10783_s30 + $0x4] sm:$0xf] %v9255_v4  ;;  %3770 = vst [vmem:[%s10783_s30 + $0x80] sm:$0xf] %v9286_v31  ;;  %v4089_v18 = vrot.slane %v4075_v19, %v10645_v35  ;;  %v4090_v57 = vcombine.low %v10693_v63, %v4082_v46  ;;  %v5050_v34 = vcombine.low %v4032_v8, %v4039_v48 }
 0x21f   : > { %3771 = vst [vmem:[%s10783_s30 + $0x84] sm:$0xf] %v9287_v33  ;;  %3754 = vst [vmem:[%s10783_s30 + $0x40] sm:$0xf] %v9270_v62  ;;  %v9318_v27 = vcombine.high %v4032_v8, %v4039_v48  ;;  %v5066_v47 = vcombine.low %v4048_v24, %v4055_v60  ;;  %v9319_v38 = vcombine.high %v4048_v24, %v4055_v60 }
 0x220   : > { %3755 = vst [vmem:[%s10783_s30 + $0x44] sm:$0xf] %v9271_v30  ;;  %3786 = vst [vmem:[%s10783_s30 + $0xc0] sm:$0xf] %v9302_v5  ;;  %v4141_v32 = vcombine.high %v10755_v7, %v10642_v37  ;;  %v4098_v36 = vrot.slane %v4090_v57, %v10651_v23  ;;  %v4105_v1 = vrot.slane %v4091_v51, %v10651_v23 }
 0x221   : > { %3787 = vst [vmem:[%s10783_s30 + $0xc4] sm:$0xf] %v9303_v44  ;;  %v4106_v19 = vcombine.low %v10698_v16, %v4089_v18  ;;  %v4107_v3 = vcombine.high %v10698_v16, %v4089_v18  ;;  %v5057_v63 = vrot.slane %v5050_v34, %v10645_v35  ;;  %v5065_v46 = vrot.slane %v9318_v27, %v10645_v35 }
 0x222   : > { %v5073_v11 = vrot.slane %v5066_v47, %v10645_v35  ;;  %v5081_v8 = vrot.slane %v9319_v38, %v10645_v35  ;;  %v5100_v31 = vcombine.low %v4098_v36, %v4105_v1  ;;  %v9320_v33 = vcombine.high %v4098_v36, %v4105_v1 }
 0x223   : > { %v4114_v48 = vrot.slane %v4106_v19, %v10651_v23  ;;  %v4121_v4 = vrot.slane %v4107_v3, %v10651_v23  ;;  %v5082_v20 = vcombine.low %v5057_v63, %v5065_v46  ;;  %v4148_v24 = vrot.slane %v10755_v7, %v10645_v35  ;;  %v10825_v46 = vpop.permute.xlu0 %1325 }
 0x224   : > { %v5090_v58 = vcombine.low %v5073_v11, %v5081_v8  ;;  %v4155_v16 = vrot.slane %v4141_v32, %v10645_v35  ;;  %v5107_v60 = vrot.slane %v5100_v31, %v10645_v35  ;;  %v5115_v62 = vrot.slane %v9320_v33, %v10645_v35 }
 0x225   : > { %v5116_v30 = vcombine.low %v4114_v48, %v4121_v4  ;;  %v9321_v5 = vcombine.high %v4114_v48, %v4121_v4  ;;  %v5089_v44 = vrot.slane %v5082_v20, %v10651_v23  ;;  %v4156_v57 = vcombine.low %v10701_v45, %v4148_v24 }
 0x226   : > { %v5097_v18 = vrot.slane %v5090_v58, %v10651_v23  ;;  %v4157_v51 = vcombine.high %v10701_v45, %v4148_v24  ;;  %v5132_v27 = vcombine.low %v5107_v60, %v5115_v62  ;;  %v4172_v47 = vcombine.low %v10705_v59, %v4155_v16 }
 0x227   : > { %v5123_v34 = vrot.slane %v5116_v30, %v10645_v35  ;;  %v5131_v7 = vrot.slane %v9321_v5, %v10645_v35  ;;  %v4164_v36 = vrot.slane %v4156_v57, %v10651_v23  ;;  %v4173_v63 = vcombine.high %v10705_v59, %v4155_v16 }
 0x228   : > { %v5098_v38 = vcombine.low %v5089_v44, %v5097_v18  ;;  %v5099_v32 = vcombine.high %v5089_v44, %v5097_v18  ;;  %v4171_v1 = vrot.slane %v4157_v51, %v10651_v23  ;;  %v5139_v19 = vrot.slane %v5132_v27, %v10651_v23 }
 0x229   : > { %v5140_v3 = vcombine.low %v5123_v34, %v5131_v7  ;;  %v4180_v45 = vrot.slane %v4172_v47, %v10651_v23  ;;  %v4207_v48 = vcombine.high %v10770_v43, %v10642_v37  ;;  %v4214_v4 = vrot.slane %v10770_v43, %v10645_v35 }
 0x22a   : > { %v5853_v11 = vshrl.u32 %v5098_v38, 16  ;;  %v5859_v8 = vshrl.u32 %v5099_v32, 16  ;;  %v4187_v33 = vrot.slane %v4173_v63, %v10651_v23  ;;  %v5150_v20 = vcombine.low %v4164_v36, %v4171_v1 }
 0x22b   : > { %v5147_v31 = vrot.slane %v5140_v3, %v10651_v23  ;;  %v9322_v58 = vcombine.high %v4164_v36, %v4171_v1  ;;  %v4221_v59 = vrot.slane %v4207_v48, %v10645_v35  ;;  %v4222_v24 = vcombine.low %v10709_v61, %v4214_v4 }
 0x22c   : > { %v4223_v16 = vcombine.high %v10709_v61, %v4214_v4  ;;  %v1387_v60 = vpack.i.b16 %v10825_v46, %v10374_v0  ;;  %v5157_v5 = vrot.slane %v5150_v20, %v10645_v35  ;;  %v5166_v1 = vcombine.low %v4180_v45, %v4187_v33 }
 0x22d   : > { %v5148_v62 = vcombine.low %v5139_v19, %v5147_v31  ;;  %v5149_v30 = vcombine.high %v5139_v19, %v5147_v31  ;;  %v5165_v43 = vrot.slane %v9322_v58, %v10645_v35  ;;  %v4230_v44 = vrot.slane %v4222_v24, %v10651_v23 }
 0x22e   : > { %v4237_v18 = vrot.slane %v4223_v16, %v10651_v23  ;;  %v4238_v57 = vcombine.low %v10715_v54, %v4221_v59  ;;  %v4239_v51 = vcombine.high %v10715_v54, %v4221_v59  ;;  %v9323_v19 = vcombine.high %v4180_v45, %v4187_v33 }
 0x22f   : > { %v5852_v34 = vpack.i.b16 %v5148_v62, %v5098_v38  ;;  %v5854_v7 = vshrl.u32 %v5148_v62, 16  ;;  %v5858_v61 = vpack.i.b16 %v5149_v30, %v5099_v32  ;;  %v5860_v27 = vshrl.u32 %v5149_v30, 16 }
 0x230   : > { %v4246_v47 = vrot.slane %v4238_v57, %v10651_v23  ;;  %v4253_v36 = vrot.slane %v4239_v51, %v10651_v23  ;;  %v5173_v59 = vrot.slane %v5166_v1, %v10645_v35  ;;  %v5181_v24 = vrot.slane %v9323_v19, %v10645_v35 }
 0x231   : > { %v5855_v3 = vpack.i.b16 %v5854_v7, %v5853_v11  ;;  %v5861_v63 = vpack.i.b16 %v5860_v27, %v5859_v8  ;;  %v5947_v48 = vsel %vm3449_vm0, %v5852_v34, 0  ;;  %v5979_v4 = vsel %vm3449_vm0, %v5858_v61, 0 }
 0x232   : > { %v9350_v31 = vcombine.low %v5947_v48, %v5947_v48  ;;  %v9351_v20 = vcombine.high %v5947_v48, %v5947_v48  ;;  %v9382_v54 = vcombine.low %v5979_v4, %v5979_v4  ;;  %v9383_v38 = vcombine.high %v5979_v4, %v5979_v4 }
 0x233   : > { %v5963_v32 = vsel %vm3449_vm0, %v5855_v3, 0  ;;  %v5995_v58 = vsel %vm3449_vm0, %v5861_v63, 0  ;;  %v5182_v16 = vcombine.low %v5157_v5, %v5165_v43  ;;  %v5190_v62 = vcombine.low %v5173_v59, %v5181_v24 }
 0x234   : > { %v9366_v45 = vcombine.low %v5963_v32, %v5963_v32  ;;  %v9367_v11 = vcombine.high %v5963_v32, %v5963_v32  ;;  %v9398_v33 = vcombine.low %v5995_v58, %v5995_v58  ;;  %v9399_v8 = vcombine.high %v5995_v58, %v5995_v58  ;;  %6234 = vst [vmem:[%s10853_s14] sm:$0xf] %v9350_v31 }
 0x235   : > { %6235 = vst [vmem:[%s10853_s14 + $0x4] sm:$0xf] %v9351_v20  ;;  %6266 = vst [vmem:[%s10853_s14 + $0x80] sm:$0xf] %v9382_v54  ;;  %v5200_v30 = vcombine.low %v4230_v44, %v4237_v18  ;;  %v9324_v57 = vcombine.high %v4230_v44, %v4237_v18  ;;  %v5216_v51 = vcombine.low %v4246_v47, %v4253_v36  ;;  %v1390_v7 = vshrl.u32 %v10825_v46, 16 }
 0x236   : > { %6267 = vst [vmem:[%s10853_s14 + $0x84] sm:$0xf] %v9383_v38  ;;  %6250 = vst [vmem:[%s10853_s14 + $0x40] sm:$0xf] %v9366_v45  ;;  %v9325_v34 = vcombine.high %v4246_v47, %v4253_v36  ;;  %v1629_v61 = vcombine.high %v1387_v60, %v10642_v37  ;;  %v5189_v27 = vrot.slane %v5182_v16, %v10651_v23  ;;  %v12601_v18 = vshrl.u32 %v10374_v0, 16  ;;  %v10878_v38 = vpop.permute.xlu1 %1327 }
 0x237   : > { %6251 = vst [vmem:[%s10853_s14 + $0x44] sm:$0xf] %v9367_v11  ;;  %6282 = vst [vmem:[%s10853_s14 + $0xc0] sm:$0xf] %v9398_v33  ;;  %v5197_v1 = vrot.slane %v5190_v62, %v10651_v23  ;;  %v5207_v19 = vrot.slane %v5200_v30, %v10645_v35  ;;  %v5215_v5 = vrot.slane %v9324_v57, %v10645_v35 }
 0x238   : > { %6283 = vst [vmem:[%s10853_s14 + $0xc4] sm:$0xf] %v9399_v8  ;;  %v5223_v43 = vrot.slane %v5216_v51, %v10645_v35  ;;  %v5231_v44 = vrot.slane %v9325_v34, %v10645_v35  ;;  %v1391_v3 = vpack.i.b16 %v1390_v7, %v12601_v18  ;;  %v1636_v47 = vrot.slane %v1387_v60, %v10645_v35 }
 0x239   : > { %v5198_v46 = vcombine.low %v5189_v27, %v5197_v1  ;;  %v5199_v36 = vcombine.high %v5189_v27, %v5197_v1  ;;  %v5232_v63 = vcombine.low %v5207_v19, %v5215_v5  ;;  %v1643_v48 = vrot.slane %v1629_v61, %v10645_v35 }
 0x23a   : > { %v5240_v4 = vcombine.low %v5223_v43, %v5231_v44  ;;  %v1659_v31 = vcombine.low %v1636_v47, %v10736_v2  ;;  %v1660_v20 = vcombine.high %v1636_v47, %v10736_v2  ;;  %v1695_v54 = vcombine.high %v1391_v3, %v10642_v37 }
 0x23b   : > { %v5239_v32 = vrot.slane %v5232_v63, %v10651_v23  ;;  %v5865_v0 = vshrl.u32 %v5198_v46, 16  ;;  %v5871_v58 = vshrl.u32 %v5199_v36, 16  ;;  %v1675_v60 = vcombine.low %v1643_v48, %v10742_v28 }
 0x23c   : > { %v5247_v59 = vrot.slane %v5240_v4, %v10651_v23  ;;  %v1667_v24 = vrot.slane %v1659_v31, %v10651_v23  ;;  %v1674_v45 = vrot.slane %v1660_v20, %v10651_v23  ;;  %v1676_v11 = vcombine.high %v1643_v48, %v10742_v28 }
 0x23d   : > { %v1683_v2 = vrot.slane %v1675_v60, %v10651_v23  ;;  %v1702_v33 = vrot.slane %v1391_v3, %v10645_v35  ;;  %v1709_v8 = vrot.slane %v1695_v54, %v10645_v35  ;;  %v10891_v16 = vpack.i.b16 %v10878_v38, %v10398_v21 }
 0x23e   : > { %v5248_v62 = vcombine.low %v5239_v32, %v5247_v59  ;;  %v5249_v30 = vcombine.high %v5239_v32, %v5247_v59  ;;  %v1690_v57 = vrot.slane %v1676_v11, %v10651_v23  ;;  %v2653_v51 = vcombine.low %v1667_v24, %v1674_v45 }
 0x23f   : > { %v1725_v34 = vcombine.low %v1702_v33, %v10748_v29  ;;  %v1726_v7 = vcombine.high %v1702_v33, %v10748_v29  ;;  %v1741_v28 = vcombine.low %v1709_v8, %v10752_v6  ;;  %v1742_v61 = vcombine.high %v1709_v8, %v10752_v6 }
 0x240   : > { %v5864_v27 = vpack.i.b16 %v5248_v62, %v5198_v46  ;;  %v5866_v1 = vshrl.u32 %v5248_v62, 16  ;;  %v5870_v19 = vpack.i.b16 %v5249_v30, %v5199_v36  ;;  %v5872_v5 = vshrl.u32 %v5249_v30, 16 }
 0x241   : > { %v1733_v43 = vrot.slane %v1725_v34, %v10651_v23  ;;  %v1740_v44 = vrot.slane %v1726_v7, %v10651_v23  ;;  %v1749_v18 = vrot.slane %v1741_v28, %v10651_v23  ;;  %v1756_v3 = vrot.slane %v1742_v61, %v10651_v23 }
 0x242   : > { %v5867_v47 = vpack.i.b16 %v5866_v1, %v5865_v0  ;;  %v5873_v63 = vpack.i.b16 %v5872_v5, %v5871_v58  ;;  %v5949_v29 = vsel %vm3449_vm0, %v5864_v27, 0  ;;  %v5981_v6 = vsel %vm3449_vm0, %v5870_v19, 0  ;;  %v3831_v5 = vpop.permute.xlu0 %3830 }
 0x243   : > { %v9352_v46 = vcombine.low %v5949_v29, %v5949_v29  ;;  %v9353_v36 = vcombine.high %v5949_v29, %v5949_v29  ;;  %v9384_v48 = vcombine.low %v5981_v6, %v5981_v6  ;;  %v9385_v4 = vcombine.high %v5981_v6, %v5981_v6 }
 0x244   : > { %v5965_v31 = vsel %vm3449_vm0, %v5867_v47, 0  ;;  %v5997_v20 = vsel %vm3449_vm0, %v5873_v63, 0  ;;  %v2660_v54 = vrot.slane %v2653_v51, %v10645_v35  ;;  %v9226_v32 = vcombine.high %v1667_v24, %v1674_v45 }
 0x245   : > { %v9368_v0 = vcombine.low %v5965_v31, %v5965_v31  ;;  %v9369_v58 = vcombine.high %v5965_v31, %v5965_v31  ;;  %v9400_v60 = vcombine.low %v5997_v20, %v5997_v20  ;;  %v9401_v59 = vcombine.high %v5997_v20, %v5997_v20  ;;  %6236 = vst [vmem:[%s10853_s14 + $0x8] sm:$0xf] %v9352_v46 }
 0x246   : > { %6237 = vst [vmem:[%s10853_s14 + $0xc] sm:$0xf] %v9353_v36  ;;  %6268 = vst [vmem:[%s10853_s14 + $0x88] sm:$0xf] %v9384_v48  ;;  %v2668_v11 = vrot.slane %v9226_v32, %v10645_v35  ;;  %v2669_v33 = vcombine.low %v1683_v2, %v1690_v57  ;;  %v9227_v8 = vcombine.high %v1683_v2, %v1690_v57  ;;  %v1406_v51 = vshrl.u32 %v10878_v38, 16  ;;  %v1330_v48 = vpop.permute.xlu1 %1329 }
 0x247   : > { %6269 = vst [vmem:[%s10853_s14 + $0x8c] sm:$0xf] %v9385_v4  ;;  %v2703_v62 = vcombine.low %v1733_v43, %v1740_v44  ;;  %6252 = vst [vmem:[%s10853_s14 + $0x48] sm:$0xf] %v9368_v0  ;;  %v9228_v30 = vcombine.high %v1733_v43, %v1740_v44  ;;  %v2719_v24 = vcombine.low %v1749_v18, %v1756_v3  ;;  %v12602_v1 = vshrl.u32 %v10398_v21, 16 }
 0x248   : > { %6253 = vst [vmem:[%s10853_s14 + $0x4c] sm:$0xf] %v9369_v58  ;;  %6284 = vst [vmem:[%s10853_s14 + $0xc8] sm:$0xf] %v9400_v60  ;;  %v9229_v45 = vcombine.high %v1749_v18, %v1756_v3  ;;  %v2676_v34 = vrot.slane %v2669_v33, %v10645_v35  ;;  %v2684_v7 = vrot.slane %v9227_v8, %v10645_v35  ;;  %v3958_v38 = vshrl.u32 %v10476_v42, 16 }
 0x249   : > { %6285 = vst [vmem:[%s10853_s14 + $0xcc] sm:$0xf] %v9401_v59  ;;  %v2685_v28 = vcombine.low %v2660_v54, %v2668_v11  ;;  %v2710_v61 = vrot.slane %v2703_v62, %v10645_v35  ;;  %v2718_v27 = vrot.slane %v9228_v30, %v10645_v35  ;;  %v2726_v2 = vrot.slane %v2719_v24, %v10645_v35 }
 0x24a   : > { %v2734_v57 = vrot.slane %v9229_v45, %v10645_v35  ;;  %v1407_v19 = vpack.i.b16 %v1406_v51, %v12602_v1  ;;  %v2693_v43 = vcombine.low %v2676_v34, %v2684_v7  ;;  %v3966_v44 = vshrl.u32 %v10496_v10, 16 }
 0x24b   : > { %v1477_v18 = vshrl.u32 %v10498_v17, 16  ;;  %v2735_v3 = vcombine.low %v2710_v61, %v2718_v27  ;;  %v1761_v63 = vcombine.high %v10891_v16, %v10642_v37  ;;  %v1485_v29 = vshrl.u32 %v10520_v55, 16  ;;  %v1352_v61 = vpop.permute.xlu0 %1351 }
 0x24c   : > { %v2743_v47 = vcombine.low %v2726_v2, %v2734_v57  ;;  %v2692_v6 = vrot.slane %v2685_v28, %v10651_v23  ;;  %v2700_v21 = vrot.slane %v2693_v43, %v10651_v23  ;;  %v3900_v46 = vpack.i.b16 %v3831_v5, %v10400_v22 }
 0x24d   : > { %v3903_v36 = vshrl.u32 %v3831_v5, 16  ;;  %v2742_v4 = vrot.slane %v2735_v3, %v10651_v23  ;;  %v10938_v20 = vrot.slane %v10891_v16, %v10645_v35  ;;  %v1827_v54 = vcombine.high %v1407_v19, %v10642_v37 }
 0x24e   : > { %v2750_v31 = vrot.slane %v2743_v47, %v10651_v23  ;;  %v2701_v32 = vcombine.low %v2692_v6, %v2700_v21  ;;  %v2702_v0 = vcombine.high %v2692_v6, %v2700_v21  ;;  %v10942_v58 = vrot.slane %v1407_v19, %v10645_v35 }
 0x24f   : > { %v12603_v60 = vshrl.u32 %v10400_v22, 16  ;;  %v10947_v8 = vrot.slane %v1761_v63, %v10645_v35  ;;  %v1422_v62 = vshrl.u32 %v1330_v48, 16  ;;  %v4258_v16 = vcombine.high %v3900_v46, %v10642_v37 }
 0x250   : > { %v2751_v11 = vcombine.low %v2742_v4, %v2750_v31  ;;  %v2752_v33 = vcombine.high %v2742_v4, %v2750_v31  ;;  %v3368_v30 = vshrl.u32 %v2701_v32, 16  ;;  %v3374_v24 = vshrl.u32 %v2702_v0, 16  ;;  %v3833_v4 = vpop.permute.xlu1 %3832 }
 0x251   : > { %v3904_v59 = vpack.i.b16 %v3903_v36, %v12603_v60  ;;  %v1419_v45 = vpack.i.b16 %v1330_v48, %v10422_v49  ;;  %v10952_v22 = vrot.slane %v1827_v54, %v10645_v35  ;;  %v10955_v27 = vrot.slane %v3900_v46, %v10645_v35 }
 0x252   : > { %v3367_v51 = vpack.i.b16 %v2751_v11, %v2701_v32  ;;  %v3369_v34 = vshrl.u32 %v2751_v11, 16  ;;  %v3373_v7 = vpack.i.b16 %v2752_v33, %v2702_v0  ;;  %v3375_v28 = vshrl.u32 %v2752_v33, 16 }
 0x253   : > { %v4324_v2 = vcombine.high %v3904_v59, %v10642_v37  ;;  %v12604_v57 = vshrl.u32 %v10422_v49, 16  ;;  %v10965_v49 = vrot.slane %v4258_v16, %v10645_v35  ;;  %v1893_v48 = vcombine.high %v1419_v45, %v10642_v37 }
 0x254   : > { %v3370_v19 = vpack.i.b16 %v3369_v34, %v3368_v30  ;;  %v3376_v5 = vpack.i.b16 %v3375_v28, %v3374_v24  ;;  %v3453_v43 = vsel %vm3449_vm0, %v3367_v51, 0  ;;  %v3485_v3 = vsel %vm3449_vm0, %v3373_v7, 0  ;;  %v3855_v30 = vpop.permute.xlu0 %3854 }
 0x255   : > { %v1423_v1 = vpack.i.b16 %v1422_v62, %v12604_v57  ;;  %v9256_v47 = vcombine.low %v3453_v43, %v3453_v43  ;;  %v9257_v63 = vcombine.high %v3453_v43, %v3453_v43  ;;  %v9288_v6 = vcombine.low %v3485_v3, %v3485_v3 }
 0x256   : > { %v9289_v21 = vcombine.high %v3485_v3, %v3485_v3  ;;  %v3469_v46 = vsel %vm3449_vm0, %v3370_v19, 0  ;;  %v3501_v36 = vsel %vm3449_vm0, %v3376_v5, 0  ;;  %v10973_v60 = vrot.slane %v3904_v59, %v10645_v35 }
 0x257   : > { %v9272_v31 = vcombine.low %v3469_v46, %v3469_v46  ;;  %v9273_v54 = vcombine.high %v3469_v46, %v3469_v46  ;;  %v9304_v32 = vcombine.low %v3501_v36, %v3501_v36  ;;  %v9305_v0 = vcombine.high %v3501_v36, %v3501_v36  ;;  %3740 = vst [vmem:[%s10783_s30 + $0x8] sm:$0xf] %v9256_v47 }
 0x258   : > { %3741 = vst [vmem:[%s10783_s30 + $0xc] sm:$0xf] %v9257_v63  ;;  %3772 = vst [vmem:[%s10783_s30 + $0x88] sm:$0xf] %v9288_v6  ;;  %v1959_v11 = vcombine.high %v1423_v1, %v10642_v37  ;;  %v1411_v33 = vpack.i.b16 %v1352_v61, %v10402_v25  ;;  %v1414_v62 = vshrl.u32 %v1352_v61, 16  ;;  %v10982_v24 = vrot.slane %v4324_v2, %v10645_v35 }
 0x259   : > { %3773 = vst [vmem:[%s10783_s30 + $0x8c] sm:$0xf] %v9289_v21  ;;  %3756 = vst [vmem:[%s10783_s30 + $0x48] sm:$0xf] %v9272_v31  ;;  %v10985_v16 = vrot.slane %v1419_v45, %v10645_v35  ;;  %v10988_v51 = vpack.i.b16 %v3833_v4, %v10424_v50  ;;  %v3919_v59 = vshrl.u32 %v3833_v4, 16  ;;  %v10991_v34 = vrot.slane %v1893_v48, %v10645_v35 }
 0x25a   : > { %3757 = vst [vmem:[%s10783_s30 + $0x4c] sm:$0xf] %v9273_v54  ;;  %3788 = vst [vmem:[%s10783_s30 + $0xc8] sm:$0xf] %v9304_v32  ;;  %v12605_v7 = vshrl.u32 %v10402_v25, 16  ;;  %v1776_v61 = vcombine.high %v1411_v33, %v10642_v37  ;;  %v1783_v57 = vrot.slane %v1411_v33, %v10645_v35  ;;  %v10998_v2 = vrot.slane %v1423_v1, %v10645_v35 }
 0x25b   : > { %3789 = vst [vmem:[%s10783_s30 + $0xcc] sm:$0xf] %v9305_v0  ;;  %v11001_v45 = vrot.slane %v1959_v11, %v10645_v35  ;;  %v3908_v19 = vpack.i.b16 %v3855_v30, %v10404_v26  ;;  %v3911_v5 = vshrl.u32 %v3855_v30, 16  ;;  %v12606_v6 = vshrl.u32 %v10424_v50, 16 }
 0x25c   : > { %v1415_v28 = vpack.i.b16 %v1414_v62, %v12605_v7  ;;  %v1790_v43 = vrot.slane %v1776_v61, %v10645_v35  ;;  %v1791_v3 = vcombine.low %v10938_v20, %v1783_v57  ;;  %v1792_v25 = vcombine.high %v10938_v20, %v1783_v57 }
 0x25d   : > { %v11011_v1 = vpack.i.b16 %v3919_v59, %v12606_v6  ;;  %v4390_v21 = vcombine.high %v10988_v51, %v10642_v37  ;;  %v11017_v46 = vrot.slane %v10988_v51, %v10645_v35  ;;  %v12607_v32 = vshrl.u32 %v10404_v26, 16 }
 0x25e   : > { %v1842_v47 = vcombine.high %v1415_v28, %v10642_v37  ;;  %v1849_v63 = vrot.slane %v1415_v28, %v10645_v35  ;;  %v1799_v36 = vrot.slane %v1791_v3, %v10651_v23  ;;  %v1806_v48 = vrot.slane %v1792_v25, %v10651_v23 }
 0x25f   : > { %v1807_v20 = vcombine.low %v10947_v8, %v1790_v43  ;;  %v1808_v4 = vcombine.high %v10947_v8, %v1790_v43  ;;  %v3912_v0 = vpack.i.b16 %v3911_v5, %v12607_v32 }
 0x260   : > { %v1856_v31 = vrot.slane %v1842_v47, %v10645_v35  ;;  %v1857_v50 = vcombine.low %v10942_v58, %v1849_v63  ;;  %v1858_v54 = vcombine.high %v10942_v58, %v1849_v63  ;;  %v2753_v62 = vcombine.low %v1799_v36, %v1806_v48 }
 0x261   : > { %v1815_v11 = vrot.slane %v1807_v20, %v10651_v23  ;;  %v1822_v33 = vrot.slane %v1808_v4, %v10651_v23  ;;  %v9230_v30 = vcombine.high %v1799_v36, %v1806_v48  ;;  %v4273_v36 = vcombine.high %v3908_v19, %v10642_v37 }
 0x262   : > { %v1865_v59 = vrot.slane %v1857_v50, %v10651_v23  ;;  %v1872_v7 = vrot.slane %v1858_v54, %v10651_v23  ;;  %v1873_v8 = vcombine.low %v10952_v22, %v1856_v31  ;;  %v1874_v28 = vcombine.high %v10952_v22, %v1856_v31 }
 0x263   : > { %v2760_v61 = vrot.slane %v2753_v62, %v10645_v35  ;;  %v2768_v58 = vrot.slane %v9230_v30, %v10645_v35  ;;  %v2769_v26 = vcombine.low %v1815_v11, %v1822_v33  ;;  %v9231_v57 = vcombine.high %v1815_v11, %v1822_v33 }
 0x264   : > { %v1881_v5 = vrot.slane %v1873_v8, %v10651_v23  ;;  %v1888_v43 = vrot.slane %v1874_v28, %v10651_v23  ;;  %v2803_v3 = vcombine.low %v1865_v59, %v1872_v7  ;;  %v9232_v25 = vcombine.high %v1865_v59, %v1872_v7 }
 0x265   : > { %v2776_v47 = vrot.slane %v2769_v26, %v10645_v35  ;;  %v2784_v63 = vrot.slane %v9231_v57, %v10645_v35  ;;  %v2785_v6 = vcombine.low %v2760_v61, %v2768_v58  ;;  %v4280_v54 = vrot.slane %v3908_v19, %v10645_v35 }
 0x266   : > { %v2810_v22 = vrot.slane %v2803_v3, %v10645_v35  ;;  %v2818_v48 = vrot.slane %v9232_v25, %v10645_v35  ;;  %v2819_v20 = vcombine.low %v1881_v5, %v1888_v43  ;;  %v9233_v4 = vcombine.high %v1881_v5, %v1888_v43 }
 0x267   : > { %v2792_v31 = vrot.slane %v2785_v6, %v10651_v23  ;;  %v2793_v50 = vcombine.low %v2776_v47, %v2784_v63  ;;  %v4287_v32 = vrot.slane %v4273_v36, %v10645_v35  ;;  %v4339_v30 = vcombine.high %v3912_v0, %v10642_v37 }
 0x268   : > { %v2826_v11 = vrot.slane %v2819_v20, %v10645_v35  ;;  %v2834_v33 = vrot.slane %v9233_v4, %v10645_v35  ;;  %v2835_v62 = vcombine.low %v2810_v22, %v2818_v48  ;;  %v4288_v7 = vcombine.low %v10955_v27, %v4280_v54 }
 0x269   : > { %v2800_v59 = vrot.slane %v2793_v50, %v10651_v23  ;;  %v4289_v8 = vcombine.high %v10955_v27, %v4280_v54  ;;  %v4304_v28 = vcombine.low %v10965_v49, %v4287_v32  ;;  %v4305_v58 = vcombine.high %v10965_v49, %v4287_v32 }
 0x26a   : > { %v2842_v61 = vrot.slane %v2835_v62, %v10651_v23  ;;  %v2843_v19 = vcombine.low %v2826_v11, %v2834_v33  ;;  %v4346_v26 = vrot.slane %v3912_v0, %v10645_v35  ;;  %v4296_v43 = vrot.slane %v4288_v7, %v10651_v23 }
 0x26b   : > { %v2801_v57 = vcombine.low %v2792_v31, %v2800_v59  ;;  %v2802_v5 = vcombine.high %v2792_v31, %v2800_v59  ;;  %v4303_v3 = vrot.slane %v4289_v8, %v10651_v23  ;;  %v4312_v47 = vrot.slane %v4304_v28, %v10651_v23 }
 0x26c   : > { %v2850_v25 = vrot.slane %v2843_v19, %v10651_v23  ;;  %v4319_v27 = vrot.slane %v4305_v58, %v10651_v23  ;;  %v4353_v63 = vrot.slane %v4339_v30, %v10645_v35  ;;  %v4354_v49 = vcombine.low %v10973_v60, %v4346_v26 }
 0x26d   : > { %v3380_v6 = vshrl.u32 %v2801_v57, 16  ;;  %v3386_v36 = vshrl.u32 %v2802_v5, 16  ;;  %v4355_v0 = vcombine.high %v10973_v60, %v4346_v26  ;;  %v5250_v54 = vcombine.low %v4296_v43, %v4303_v3 }
 0x26e   : > { %v2851_v22 = vcombine.low %v2842_v61, %v2850_v25  ;;  %v2852_v48 = vcombine.high %v2842_v61, %v2850_v25  ;;  %v4370_v20 = vcombine.low %v10982_v24, %v4353_v63  ;;  %v4371_v4 = vcombine.high %v10982_v24, %v4353_v63 }
 0x26f   : > { %v4362_v31 = vrot.slane %v4354_v49, %v10651_v23  ;;  %v4369_v50 = vrot.slane %v4355_v0, %v10651_v23  ;;  %v9326_v32 = vcombine.high %v4296_v43, %v4303_v3  ;;  %v5257_v7 = vrot.slane %v5250_v54, %v10645_v35 }
 0x270   : > { %v3379_v11 = vpack.i.b16 %v2851_v22, %v2801_v57  ;;  %v3381_v33 = vshrl.u32 %v2851_v22, 16  ;;  %v3385_v62 = vpack.i.b16 %v2852_v48, %v2802_v5  ;;  %v3387_v30 = vshrl.u32 %v2852_v48, 16 }
 0x271   : > { %v4378_v59 = vrot.slane %v4370_v20, %v10651_v23  ;;  %v4385_v60 = vrot.slane %v4371_v4, %v10651_v23  ;;  %v5265_v8 = vrot.slane %v9326_v32, %v10645_v35  ;;  %v5266_v25 = vcombine.low %v4312_v47, %v4319_v27 }
 0x272   : > { %v3382_v28 = vpack.i.b16 %v3381_v33, %v3380_v6  ;;  %v3388_v24 = vpack.i.b16 %v3387_v30, %v3386_v36  ;;  %v3455_v61 = vsel %vm3449_vm0, %v3379_v11, 0  ;;  %v3487_v19 = vsel %vm3449_vm0, %v3385_v62, 0  ;;  %v1354_v6 = vpop.permute.xlu1 %1353 }
 0x273   : > { %v9258_v58 = vcombine.low %v3455_v61, %v3455_v61  ;;  %v9259_v26 = vcombine.high %v3455_v61, %v3455_v61  ;;  %v9290_v57 = vcombine.low %v3487_v19, %v3487_v19  ;;  %v9291_v5 = vcombine.high %v3487_v19, %v3487_v19 }
 0x274   : > { %v3471_v43 = vsel %vm3449_vm0, %v3382_v28, 0  ;;  %v3503_v3 = vsel %vm3449_vm0, %v3388_v24, 0  ;;  %v9327_v63 = vcombine.high %v4312_v47, %v4319_v27  ;;  %v5273_v48 = vrot.slane %v5266_v25, %v10645_v35  ;;  %v11090_v24 = vpop.permute.xlu0 %1331 }
 0x275   : > { %v9274_v36 = vcombine.low %v3471_v43, %v3471_v43  ;;  %v9275_v49 = vcombine.high %v3471_v43, %v3471_v43  ;;  %v9306_v0 = vcombine.low %v3503_v3, %v3503_v3  ;;  %v9307_v22 = vcombine.high %v3503_v3, %v3503_v3  ;;  %3742 = vst [vmem:[%s10783_s30 + $0x10] sm:$0xf] %v9258_v58 }
 0x276   : > { %3743 = vst [vmem:[%s10783_s30 + $0x14] sm:$0xf] %v9259_v26  ;;  %3774 = vst [vmem:[%s10783_s30 + $0x90] sm:$0xf] %v9290_v57  ;;  %v5281_v20 = vrot.slane %v9327_v63, %v10645_v35  ;;  %v5282_v4 = vcombine.low %v5257_v7, %v5265_v8  ;;  %v5300_v54 = vcombine.low %v4362_v31, %v4369_v50  ;;  %v1430_v28 = vshrl.u32 %v1354_v6, 16 }
 0x277   : > { %3775 = vst [vmem:[%s10783_s30 + $0x94] sm:$0xf] %v9291_v5  ;;  %3758 = vst [vmem:[%s10783_s30 + $0x50] sm:$0xf] %v9274_v36  ;;  %v9328_v47 = vcombine.high %v4362_v31, %v4369_v50  ;;  %v5316_v27 = vcombine.low %v4378_v59, %v4385_v60  ;;  %v9329_v32 = vcombine.high %v4378_v59, %v4385_v60  ;;  %v12608_v60 = vshrl.u32 %v10426_v52, 16 }
 0x278   : > { %3759 = vst [vmem:[%s10783_s30 + $0x54] sm:$0xf] %v9275_v49  ;;  %3790 = vst [vmem:[%s10783_s30 + $0xd0] sm:$0xf] %v9306_v0  ;;  %v1427_v11 = vpack.i.b16 %v1354_v6, %v10426_v52  ;;  %v4456_v33 = vcombine.high %v11011_v1, %v10642_v37  ;;  %v5290_v62 = vcombine.low %v5273_v48, %v5281_v20  ;;  %v1438_v43 = vshrl.u32 %v11090_v24, 16 }
 0x279   : > { %3791 = vst [vmem:[%s10783_s30 + $0xd4] sm:$0xf] %v9307_v22  ;;  %v5307_v30 = vrot.slane %v5300_v54, %v10645_v35  ;;  %v5315_v7 = vrot.slane %v9328_v47, %v10645_v35  ;;  %v5323_v8 = vrot.slane %v5316_v27, %v10645_v35  ;;  %v5331_v61 = vrot.slane %v9329_v32, %v10645_v35 }
 0x27a   : > { %v1908_v31 = vcombine.high %v1427_v11, %v10642_v37  ;;  %v5289_v50 = vrot.slane %v5282_v4, %v10651_v23  ;;  %v5297_v59 = vrot.slane %v5290_v62, %v10651_v23  ;;  %v1431_v19 = vpack.i.b16 %v1430_v28, %v12608_v60 }
 0x27b   : > { %v1915_v58 = vrot.slane %v1427_v11, %v10645_v35  ;;  %v5332_v26 = vcombine.low %v5307_v30, %v5315_v7  ;;  %v5340_v57 = vcombine.low %v5323_v8, %v5331_v61 }
 0x27c   : > { %v1922_v5 = vrot.slane %v1908_v31, %v10645_v35  ;;  %v5298_v3 = vcombine.low %v5289_v50, %v5297_v59  ;;  %v5299_v25 = vcombine.high %v5289_v50, %v5297_v59  ;;  %v1974_v32 = vcombine.high %v1431_v19, %v10642_v37 }
 0x27d   : > { %v1923_v63 = vcombine.low %v10985_v16, %v1915_v58  ;;  %v1924_v6 = vcombine.high %v10985_v16, %v1915_v58  ;;  %v5339_v36 = vrot.slane %v5332_v26, %v10651_v23  ;;  %v5347_v49 = vrot.slane %v5340_v57, %v10651_v23 }
 0x27e   : > { %v1939_v52 = vcombine.low %v10991_v34, %v1922_v5  ;;  %v1940_v0 = vcombine.high %v10991_v34, %v1922_v5  ;;  %v5877_v22 = vshrl.u32 %v5298_v3, 16  ;;  %v5883_v48 = vshrl.u32 %v5299_v25, 16 }
 0x27f   : > { %v1931_v20 = vrot.slane %v1923_v63, %v10651_v23  ;;  %v1938_v4 = vrot.slane %v1924_v6, %v10651_v23  ;;  %v5348_v54 = vcombine.low %v5339_v36, %v5347_v49  ;;  %v5349_v47 = vcombine.high %v5339_v36, %v5347_v49 }
 0x280   : > { %v1947_v27 = vrot.slane %v1939_v52, %v10651_v23  ;;  %v1954_v16 = vrot.slane %v1940_v0, %v10651_v23  ;;  %v1981_v11 = vrot.slane %v1431_v19, %v10645_v35  ;;  %v1988_v61 = vrot.slane %v1974_v32, %v10645_v35 }
 0x281   : > { %v2853_v62 = vcombine.low %v1931_v20, %v1938_v4  ;;  %v9234_v30 = vcombine.high %v1931_v20, %v1938_v4  ;;  %v5876_v28 = vpack.i.b16 %v5348_v54, %v5298_v3  ;;  %v5878_v34 = vshrl.u32 %v5348_v54, 16 }
 0x282   : > { %v5882_v7 = vpack.i.b16 %v5349_v47, %v5299_v25  ;;  %v5884_v8 = vshrl.u32 %v5349_v47, 16  ;;  %v1989_v31 = vcombine.low %v10998_v2, %v1981_v11  ;;  %v1990_v50 = vcombine.high %v10998_v2, %v1981_v11 }
 0x283   : > { %v2860_v59 = vrot.slane %v2853_v62, %v10645_v35  ;;  %v5879_v60 = vpack.i.b16 %v5878_v34, %v5877_v22  ;;  %v5951_v19 = vsel %vm3449_vm0, %v5876_v28, 0  ;;  %v2006_v20 = vcombine.high %v11001_v45, %v1988_v61 }
 0x284   : > { %v5885_v58 = vpack.i.b16 %v5884_v8, %v5883_v48  ;;  %v5983_v26 = vsel %vm3449_vm0, %v5882_v7, 0  ;;  %v9354_v57 = vcombine.low %v5951_v19, %v5951_v19  ;;  %v9355_v5 = vcombine.high %v5951_v19, %v5951_v19 }
 0x285   : > { %v9386_v3 = vcombine.low %v5983_v26, %v5983_v26  ;;  %v9387_v25 = vcombine.high %v5983_v26, %v5983_v26  ;;  %v5967_v63 = vsel %vm3449_vm0, %v5879_v60, 0  ;;  %v1997_v6 = vrot.slane %v1989_v31, %v10651_v23  ;;  %v3857_v31 = vpop.permute.xlu1 %3856  ;;  %v11166_v26 = vpop.permute.xlu0 %3834 }
 0x286   : > { %v5999_v2 = vsel %vm3449_vm0, %v5885_v58, 0  ;;  %v2004_v36 = vrot.slane %v1990_v50, %v10651_v23  ;;  %v9370_v49 = vcombine.low %v5967_v63, %v5967_v63  ;;  %v9371_v52 = vcombine.high %v5967_v63, %v5967_v63  ;;  %6238 = vst [vmem:[%s10853_s14 + $0x10] sm:$0xf] %v9354_v57  ;;  %6239 = vst [vmem:[%s10853_s14 + $0x14] sm:$0xf] %v9355_v5 }
 0x287   : > { %v9402_v0 = vcombine.low %v5999_v2, %v5999_v2  ;;  %v9403_v22 = vcombine.high %v5999_v2, %v5999_v2  ;;  %6270 = vst [vmem:[%s10853_s14 + $0x90] sm:$0xf] %v9386_v3  ;;  %6271 = vst [vmem:[%s10853_s14 + $0x94] sm:$0xf] %v9387_v25  ;;  %v2005_v48 = vcombine.low %v11001_v45, %v1988_v61  ;;  %v3927_v25 = vshrl.u32 %v3857_v31, 16 }
 0x288   : > { %v2868_v4 = vrot.slane %v9234_v30, %v10645_v35  ;;  %v2869_v54 = vcombine.low %v1947_v27, %v1954_v16  ;;  %6254 = vst [vmem:[%s10853_s14 + $0x50] sm:$0xf] %v9370_v49  ;;  %6255 = vst [vmem:[%s10853_s14 + $0x54] sm:$0xf] %v9371_v52  ;;  %v9235_v47 = vcombine.high %v1947_v27, %v1954_v16  ;;  %v12609_v27 = vshrl.u32 %v10446_v12, 16 }
 0x289   : > { %6286 = vst [vmem:[%s10853_s14 + $0xd0] sm:$0xf] %v9402_v0  ;;  %6287 = vst [vmem:[%s10853_s14 + $0xd4] sm:$0xf] %v9403_v22  ;;  %v2903_v32 = vcombine.low %v1997_v6, %v2004_v36  ;;  %v9236_v11 = vcombine.high %v1997_v6, %v2004_v36  ;;  %v11138_v62 = vpack.i.b16 %v11090_v24, %v10446_v12  ;;  %v12610_v0 = vshrl.u32 %v10428_v53, 16 }
 0x28a   : > { %v2013_v28 = vrot.slane %v2005_v48, %v10651_v23  ;;  %v2020_v34 = vrot.slane %v2006_v20, %v10651_v23  ;;  %v2876_v45 = vrot.slane %v2869_v54, %v10645_v35  ;;  %v2885_v7 = vcombine.low %v2860_v59, %v2868_v4 }
 0x28b   : > { %v2884_v30 = vrot.slane %v9235_v47, %v10645_v35  ;;  %v2910_v8 = vrot.slane %v2903_v32, %v10645_v35  ;;  %v2918_v61 = vrot.slane %v9236_v11, %v10645_v35  ;;  %v11150_v16 = vpack.i.b16 %v1438_v43, %v12609_v27 }
 0x28c   : > { %v4404_v50 = vrot.slane %v4390_v21, %v10645_v35  ;;  %v4463_v59 = vrot.slane %v11011_v1, %v10645_v35  ;;  %v2919_v60 = vcombine.low %v2013_v28, %v2020_v34  ;;  %v9237_v58 = vcombine.high %v2013_v28, %v2020_v34 }
 0x28d   : > { %v11162_v12 = vrot.slane %v4456_v33, %v10645_v35  ;;  %v2893_v24 = vcombine.low %v2876_v45, %v2884_v30  ;;  %v2935_v43 = vcombine.low %v2910_v8, %v2918_v61  ;;  %v2025_v19 = vcombine.high %v11138_v62, %v10642_v37 }
 0x28e   : > { %v2892_v51 = vrot.slane %v2885_v7, %v10651_v23  ;;  %v2926_v21 = vrot.slane %v2919_v60, %v10645_v35  ;;  %v2934_v57 = vrot.slane %v9237_v58, %v10645_v35  ;;  %v3924_v5 = vpack.i.b16 %v3857_v31, %v10428_v53 }
 0x28f   : > { %v2900_v3 = vrot.slane %v2893_v24, %v10651_v23  ;;  %v2942_v1 = vrot.slane %v2935_v43, %v10651_v23  ;;  %v2091_v33 = vcombine.high %v11150_v16, %v10642_v37  ;;  %v11180_v36 = vpack.i.b16 %v11166_v26, %v10448_v13 }
 0x290   : > { %v2943_v63 = vcombine.low %v2926_v21, %v2934_v57  ;;  %v4405_v2 = vcombine.high %v3924_v5, %v10642_v37  ;;  %v4412_v6 = vrot.slane %v3924_v5, %v10645_v35  ;;  %v3928_v22 = vpack.i.b16 %v3927_v25, %v12610_v0 }
 0x291   : > { %v2901_v49 = vcombine.low %v2892_v51, %v2900_v3  ;;  %v2902_v52 = vcombine.high %v2892_v51, %v2900_v3  ;;  %v3935_v48 = vshrl.u32 %v11166_v26, 16 }
 0x292   : > { %v2950_v20 = vrot.slane %v2943_v63, %v10651_v23  ;;  %v4419_v4 = vrot.slane %v4405_v2, %v10645_v35  ;;  %v4420_v54 = vcombine.low %v11017_v46, %v4412_v6  ;;  %v4421_v47 = vcombine.high %v11017_v46, %v4412_v6 }
 0x293   : > { %v3392_v32 = vshrl.u32 %v2901_v49, 16  ;;  %v3398_v11 = vshrl.u32 %v2902_v52, 16  ;;  %v4471_v28 = vcombine.high %v3928_v22, %v10642_v37  ;;  %v4478_v34 = vrot.slane %v3928_v22, %v10645_v35 }
 0x294   : > { %v2951_v45 = vcombine.low %v2942_v1, %v2950_v20  ;;  %v2952_v7 = vcombine.high %v2942_v1, %v2950_v20  ;;  %v4428_v53 = vrot.slane %v4420_v54, %v10651_v23  ;;  %v4435_v30 = vrot.slane %v4421_v47, %v10651_v23 }
 0x295   : > { %v4436_v8 = vcombine.low %v4404_v50, %v4419_v4  ;;  %v4437_v61 = vcombine.high %v4404_v50, %v4419_v4  ;;  %v4485_v27 = vrot.slane %v4471_v28, %v10645_v35  ;;  %v4486_v31 = vcombine.low %v4463_v59, %v4478_v34 }
 0x296   : > { %v3391_v60 = vpack.i.b16 %v2951_v45, %v2901_v49  ;;  %v3393_v58 = vshrl.u32 %v2951_v45, 16  ;;  %v3397_v46 = vpack.i.b16 %v2952_v7, %v2902_v52  ;;  %v3399_v24 = vshrl.u32 %v2952_v7, 16 }
 0x297   : > { %v4444_v43 = vrot.slane %v4436_v8, %v10651_v23  ;;  %v4451_v26 = vrot.slane %v4437_v61, %v10651_v23  ;;  %v4487_v51 = vcombine.high %v4463_v59, %v4478_v34  ;;  %v4494_v21 = vrot.slane %v4486_v31, %v10651_v23 }
 0x298   : > { %v3394_v57 = vpack.i.b16 %v3393_v58, %v3392_v32  ;;  %v3400_v5 = vpack.i.b16 %v3399_v24, %v3398_v11  ;;  %v3457_v50 = vsel %vm3449_vm0, %v3391_v60, 0  ;;  %v3489_v3 = vsel %vm3449_vm0, %v3397_v46, 0  ;;  %v1334_v60 = vpop.permute.xlu1 %1333 }
 0x299   : > { %v9260_v1 = vcombine.low %v3457_v50, %v3457_v50  ;;  %v9261_v25 = vcombine.high %v3457_v50, %v3457_v50  ;;  %v9292_v63 = vcombine.low %v3489_v3, %v3489_v3  ;;  %v9293_v2 = vcombine.high %v3489_v3, %v3489_v3 }
 0x29a   : > { %v3473_v6 = vsel %vm3449_vm0, %v3394_v57, 0  ;;  %v3505_v59 = vsel %vm3449_vm0, %v3400_v5, 0  ;;  %v4501_v49 = vrot.slane %v4487_v51, %v10651_v23  ;;  %v4502_v52 = vcombine.low %v11162_v12, %v4485_v27  ;;  %v1356_v5 = vpop.permute.xlu0 %1355 }
 0x29b   : > { %v9276_v0 = vcombine.low %v3473_v6, %v3473_v6  ;;  %v9277_v22 = vcombine.high %v3473_v6, %v3473_v6  ;;  %v9308_v20 = vcombine.low %v3505_v59, %v3505_v59  ;;  %v9309_v4 = vcombine.high %v3505_v59, %v3505_v59  ;;  %3744 = vst [vmem:[%s10783_s30 + $0x18] sm:$0xf] %v9260_v1 }
 0x29c   : > { %3745 = vst [vmem:[%s10783_s30 + $0x1c] sm:$0xf] %v9261_v25  ;;  %3776 = vst [vmem:[%s10783_s30 + $0x98] sm:$0xf] %v9292_v63  ;;  %v4503_v54 = vcombine.high %v11162_v12, %v4485_v27  ;;  %v4510_v47 = vrot.slane %v4502_v52, %v10651_v23  ;;  %v5350_v32 = vcombine.low %v4428_v53, %v4435_v30  ;;  %v12611_v12 = vshrl.u32 %v10448_v13, 16 }
 0x29d   : > { %3777 = vst [vmem:[%s10783_s30 + $0x9c] sm:$0xf] %v9293_v2  ;;  %v9330_v11 = vcombine.high %v4428_v53, %v4435_v30  ;;  %3760 = vst [vmem:[%s10783_s30 + $0x58] sm:$0xf] %v9276_v0  ;;  %v5366_v28 = vcombine.low %v4444_v43, %v4451_v26  ;;  %v9331_v34 = vcombine.high %v4444_v43, %v4451_v26  ;;  %v11253_v0 = vpop.permute.xlu1 %3836 }
 0x29e   : > { %3761 = vst [vmem:[%s10783_s30 + $0x5c] sm:$0xf] %v9277_v22  ;;  %3792 = vst [vmem:[%s10783_s30 + $0xd8] sm:$0xf] %v9308_v20  ;;  %v5400_v45 = vcombine.low %v4494_v21, %v4501_v49  ;;  %v9332_v7 = vcombine.high %v4494_v21, %v4501_v49  ;;  %v4517_v8 = vrot.slane %v4503_v54, %v10651_v23  ;;  %v1454_v49 = vshrl.u32 %v1334_v60, 16 }
 0x29f   : > { %3793 = vst [vmem:[%s10783_s30 + $0xdc] sm:$0xf] %v9309_v4  ;;  %v5357_v61 = vrot.slane %v5350_v32, %v10645_v35  ;;  %v5365_v31 = vrot.slane %v9330_v11, %v10645_v35  ;;  %v3936_v27 = vpack.i.b16 %v3935_v48, %v12611_v12  ;;  %v5373_v53 = vrot.slane %v5366_v28, %v10645_v35 }
 0x2a0   : > { %v5381_v30 = vrot.slane %v9331_v34, %v10645_v35  ;;  %v5407_v58 = vrot.slane %v5400_v45, %v10645_v35  ;;  %v5415_v46 = vrot.slane %v9332_v7, %v10645_v35  ;;  %v2032_v24 = vrot.slane %v11138_v62, %v10645_v35 }
 0x2a1   : > { %v5382_v43 = vcombine.low %v5357_v61, %v5365_v31  ;;  %v5416_v26 = vcombine.low %v4510_v47, %v4517_v8  ;;  %v9333_v51 = vcombine.high %v4510_v47, %v4517_v8  ;;  %v11228_v13 = vrot.slane %v2025_v19, %v10645_v35 }
 0x2a2   : > { %v11232_v48 = vrot.slane %v11150_v16, %v10645_v35  ;;  %v5390_v21 = vcombine.low %v5373_v53, %v5381_v30  ;;  %v4522_v57 = vcombine.high %v11180_v36, %v10642_v37  ;;  %v5432_v1 = vcombine.low %v5407_v58, %v5415_v46 }
 0x2a3   : > { %v5423_v50 = vrot.slane %v5416_v26, %v10645_v35  ;;  %v5431_v3 = vrot.slane %v9333_v51, %v10645_v35  ;;  %v4588_v25 = vcombine.high %v3936_v27, %v10642_v37  ;;  %v11243_v62 = vrot.slane %v2091_v33, %v10645_v35 }
 0x2a4   : > { %v5389_v19 = vrot.slane %v5382_v43, %v10651_v23  ;;  %v5397_v63 = vrot.slane %v5390_v21, %v10651_v23  ;;  %v11249_v2 = vrot.slane %v11180_v36, %v10645_v35  ;;  %v1451_v59 = vpack.i.b16 %v1334_v60, %v10470_v39 }
 0x2a5   : > { %v5440_v6 = vcombine.low %v5423_v50, %v5431_v3  ;;  %v1443_v52 = vpack.i.b16 %v1356_v5, %v10450_v14  ;;  %v11256_v33 = vrot.slane %v4522_v57, %v10645_v35  ;;  %v1446_v20 = vshrl.u32 %v1356_v5, 16 }
 0x2a6   : > { %v5398_v22 = vcombine.low %v5389_v19, %v5397_v63  ;;  %v5399_v16 = vcombine.high %v5389_v19, %v5397_v63  ;;  %v5439_v4 = vrot.slane %v5432_v1, %v10651_v23  ;;  %v11261_v36 = vrot.slane %v3936_v27, %v10645_v35 }
 0x2a7   : > { %v5447_v54 = vrot.slane %v5440_v6, %v10651_v23  ;;  %v11264_v47 = vrot.slane %v4588_v25, %v10645_v35  ;;  %v12612_v32 = vshrl.u32 %v10470_v39, 16  ;;  %v12613_v28 = vshrl.u32 %v10450_v14, 16 }
 0x2a8   : > { %v2040_v45 = vcombine.high %v1443_v52, %v10642_v37  ;;  %v11275_v7 = vpack.i.b16 %v11253_v0, %v10472_v40  ;;  %v2157_v31 = vcombine.high %v1451_v59, %v10642_v37  ;;  %v11279_v12 = vrot.slane %v1451_v59, %v10645_v35 }
 0x2a9   : > { %v11268_v11 = vpack.i.b16 %v1454_v49, %v12612_v32  ;;  %v1447_v34 = vpack.i.b16 %v1446_v20, %v12613_v28  ;;  %v5448_v8 = vcombine.low %v5439_v4, %v5447_v54  ;;  %v5449_v61 = vcombine.high %v5439_v4, %v5447_v54 }
 0x2aa   : > { %v5889_v27 = vshrl.u32 %v5398_v22, 16  ;;  %v5895_v39 = vshrl.u32 %v5399_v16, 16  ;;  %v2047_v60 = vrot.slane %v1443_v52, %v10645_v35  ;;  %v2054_v14 = vrot.slane %v2040_v45, %v10645_v35 }
 0x2ab   : > { %v5888_v53 = vpack.i.b16 %v5448_v8, %v5398_v22  ;;  %v5890_v30 = vshrl.u32 %v5448_v8, 16  ;;  %v5894_v58 = vpack.i.b16 %v5449_v61, %v5399_v16  ;;  %v5896_v46 = vshrl.u32 %v5449_v61, 16 }
 0x2ac   : > { %v2055_v43 = vcombine.low %v2032_v24, %v2047_v60  ;;  %v2056_v26 = vcombine.high %v2032_v24, %v2047_v60  ;;  %v2071_v51 = vcombine.low %v11228_v13, %v2054_v14  ;;  %v2106_v21 = vcombine.high %v1447_v34, %v10642_v37 }
 0x2ad   : > { %v5891_v57 = vpack.i.b16 %v5890_v30, %v5889_v27  ;;  %v5897_v5 = vpack.i.b16 %v5896_v46, %v5895_v39  ;;  %v5953_v50 = vsel %vm3449_vm0, %v5888_v53, 0  ;;  %v5985_v3 = vsel %vm3449_vm0, %v5894_v58, 0 }
 0x2ae   : > { %v9356_v1 = vcombine.low %v5953_v50, %v5953_v50  ;;  %v9357_v25 = vcombine.high %v5953_v50, %v5953_v50  ;;  %v9388_v19 = vcombine.low %v5985_v3, %v5985_v3  ;;  %v9389_v63 = vcombine.high %v5985_v3, %v5985_v3  ;;  %v3859_v3 = vpop.permute.xlu0 %3858 }
 0x2af   : > { %v5969_v24 = vsel %vm3449_vm0, %v5891_v57, 0  ;;  %v6001_v6 = vsel %vm3449_vm0, %v5897_v5, 0  ;;  %v2063_v59 = vrot.slane %v2055_v43, %v10651_v23  ;;  %v2070_v49 = vrot.slane %v2056_v26, %v10651_v23 }
 0x2b0   : > { %v9372_v52 = vcombine.low %v5969_v24, %v5969_v24  ;;  %v9373_v22 = vcombine.high %v5969_v24, %v5969_v24  ;;  %v9404_v16 = vcombine.low %v6001_v6, %v6001_v6  ;;  %v9405_v20 = vcombine.high %v6001_v6, %v6001_v6  ;;  %6240 = vst [vmem:[%s10853_s14 + $0x18] sm:$0xf] %v9356_v1 }
 0x2b1   : > { %6241 = vst [vmem:[%s10853_s14 + $0x1c] sm:$0xf] %v9357_v25  ;;  %6272 = vst [vmem:[%s10853_s14 + $0x98] sm:$0xf] %v9388_v19  ;;  %v2072_v4 = vcombine.high %v11228_v13, %v2054_v14  ;;  %v2079_v54 = vrot.slane %v2071_v51, %v10651_v23  ;;  %v2113_v32 = vrot.slane %v1447_v34, %v10645_v35  ;;  %v3951_v30 = vshrl.u32 %v11253_v0, 16 }
 0x2b2   : > { %6273 = vst [vmem:[%s10853_s14 + $0x9c] sm:$0xf] %v9389_v63  ;;  %v2120_v28 = vrot.slane %v2106_v21, %v10645_v35  ;;  %6256 = vst [vmem:[%s10853_s14 + $0x58] sm:$0xf] %v9372_v52  ;;  %v11304_v45 = vrot.slane %v2157_v31, %v10645_v35  ;;  %v2223_v8 = vcombine.high %v11268_v11, %v10642_v37  ;;  %v11331_v63 = vpop.permute.xlu1 %1357 }
 0x2b3   : > { %6257 = vst [vmem:[%s10853_s14 + $0x5c] sm:$0xf] %v9373_v22  ;;  %6288 = vst [vmem:[%s10853_s14 + $0xd8] sm:$0xf] %v9404_v16  ;;  %v2953_v61 = vcombine.low %v2063_v59, %v2070_v49  ;;  %v9238_v27 = vcombine.high %v2063_v59, %v2070_v49  ;;  %v2086_v13 = vrot.slane %v2072_v4, %v10651_v23  ;;  %v12614_v59 = vshrl.u32 %v10472_v40, 16 }
 0x2b4   : > { %6289 = vst [vmem:[%s10853_s14 + $0xdc] sm:$0xf] %v9405_v20  ;;  %v2121_v39 = vcombine.low %v11232_v48, %v2113_v32  ;;  %v2122_v34 = vcombine.high %v11232_v48, %v2113_v32  ;;  %v2137_v60 = vcombine.low %v11243_v62, %v2120_v28  ;;  %v2138_v14 = vcombine.high %v11243_v62, %v2120_v28 }
 0x2b5   : > { %v2960_v53 = vrot.slane %v2953_v61, %v10645_v35  ;;  %v2968_v31 = vrot.slane %v9238_v27, %v10645_v35  ;;  %v2969_v26 = vcombine.low %v2079_v54, %v2086_v13  ;;  %v11321_v48 = vrot.slane %v11268_v11, %v10645_v35 }
 0x2b6   : > { %v2129_v58 = vrot.slane %v2121_v39, %v10651_v23  ;;  %v2136_v46 = vrot.slane %v2122_v34, %v10651_v23  ;;  %v2145_v43 = vrot.slane %v2137_v60, %v10651_v23  ;;  %v11324_v51 = vrot.slane %v2223_v8, %v10645_v35 }
 0x2b7   : > { %v2152_v62 = vrot.slane %v2138_v14, %v10651_v23  ;;  %v9239_v21 = vcombine.high %v2079_v54, %v2086_v13  ;;  %v2976_v57 = vrot.slane %v2969_v26, %v10645_v35  ;;  %v2985_v0 = vcombine.low %v2960_v53, %v2968_v31 }
 0x2b8   : > { %v3003_v5 = vcombine.low %v2129_v58, %v2136_v46  ;;  %v9240_v50 = vcombine.high %v2129_v58, %v2136_v46  ;;  %v4654_v11 = vcombine.high %v11275_v7, %v10642_v37  ;;  %v11337_v49 = vpack.i.b16 %v3951_v30, %v12614_v59 }
 0x2b9   : > { %v2984_v1 = vrot.slane %v9239_v21, %v10645_v35  ;;  %v3019_v25 = vcombine.low %v2145_v43, %v2152_v62  ;;  %v9241_v19 = vcombine.high %v2145_v43, %v2152_v62  ;;  %v11341_v52 = vrot.slane %v11275_v7, %v10645_v35 }
 0x2ba   : > { %v3010_v24 = vrot.slane %v3003_v5, %v10645_v35  ;;  %v3018_v6 = vrot.slane %v9240_v50, %v10645_v35  ;;  %v3940_v4 = vpack.i.b16 %v3859_v3, %v10452_v15  ;;  %v2992_v54 = vrot.slane %v2985_v0, %v10651_v23 }
 0x2bb   : > { %v2993_v22 = vcombine.low %v2976_v57, %v2984_v1  ;;  %v3026_v16 = vrot.slane %v3019_v25, %v10645_v35  ;;  %v3034_v20 = vrot.slane %v9241_v19, %v10645_v35  ;;  %v3943_v28 = vshrl.u32 %v3859_v3, 16 }
 0x2bc   : > { %v3035_v32 = vcombine.low %v3010_v24, %v3018_v6  ;;  %v11349_v40 = vpack.i.b16 %v11331_v63, %v10474_v41  ;;  %v4537_v27 = vcombine.high %v3940_v4, %v10642_v37  ;;  %v4544_v13 = vrot.slane %v3940_v4, %v10645_v35 }
 0x2bd   : > { %v3000_v8 = vrot.slane %v2993_v22, %v10651_v23  ;;  %v3043_v61 = vcombine.low %v3026_v16, %v3034_v20  ;;  %v12615_v34 = vshrl.u32 %v10452_v15, 16  ;;  %v1462_v14 = vshrl.u32 %v11331_v63, 16 }
 0x2be   : > { %v3042_v39 = vrot.slane %v3035_v32, %v10651_v23  ;;  %v2172_v53 = vcombine.high %v11349_v40, %v10642_v37  ;;  %v4551_v46 = vrot.slane %v4537_v27, %v10645_v35  ;;  %v4552_v43 = vcombine.low %v11249_v2, %v4544_v13 }
 0x2bf   : > { %v3944_v60 = vpack.i.b16 %v3943_v28, %v12615_v34  ;;  %v3001_v31 = vcombine.low %v2992_v54, %v3000_v8  ;;  %v3002_v30 = vcombine.high %v2992_v54, %v3000_v8  ;;  %v3050_v58 = vrot.slane %v3043_v61, %v10651_v23 }
 0x2c0   : > { %v4553_v26 = vcombine.high %v11249_v2, %v4544_v13  ;;  %v4560_v50 = vrot.slane %v4552_v43, %v10651_v23  ;;  %v4568_v1 = vcombine.low %v11256_v33, %v4551_v46  ;;  %v4569_v25 = vcombine.high %v11256_v33, %v4551_v46 }
 0x2c1   : > { %v4603_v62 = vcombine.high %v3944_v60, %v10642_v37  ;;  %v4610_v15 = vrot.slane %v3944_v60, %v10645_v35  ;;  %v3051_v21 = vcombine.low %v3042_v39, %v3050_v58  ;;  %v3052_v57 = vcombine.high %v3042_v39, %v3050_v58 }
 0x2c2   : > { %v3404_v0 = vshrl.u32 %v3001_v31, 16  ;;  %v3410_v5 = vshrl.u32 %v3002_v30, 16  ;;  %v4567_v3 = vrot.slane %v4553_v26, %v10651_v23  ;;  %v4576_v6 = vrot.slane %v4568_v1, %v10651_v23 }
 0x2c3   : > { %v3403_v19 = vpack.i.b16 %v3051_v21, %v3001_v31  ;;  %v3405_v63 = vshrl.u32 %v3051_v21, 16  ;;  %v3409_v24 = vpack.i.b16 %v3052_v57, %v3002_v30  ;;  %v3411_v2 = vshrl.u32 %v3052_v57, 16 }
 0x2c4   : > { %v4583_v59 = vrot.slane %v4569_v25, %v10651_v23  ;;  %v4617_v22 = vrot.slane %v4603_v62, %v10645_v35  ;;  %v4618_v16 = vcombine.low %v11261_v36, %v4610_v15  ;;  %v4619_v39 = vcombine.high %v11261_v36, %v4610_v15 }
 0x2c5   : > { %v3406_v20 = vpack.i.b16 %v3405_v63, %v3404_v0  ;;  %v3412_v4 = vpack.i.b16 %v3411_v2, %v3410_v5  ;;  %v3459_v54 = vsel %vm3449_vm0, %v3403_v19, 0  ;;  %v3491_v33 = vsel %vm3449_vm0, %v3409_v24, 0 }
 0x2c6   : > { %v9262_v32 = vcombine.low %v3459_v54, %v3459_v54  ;;  %v9263_v28 = vcombine.high %v3459_v54, %v3459_v54  ;;  %v9294_v8 = vcombine.low %v3491_v33, %v3491_v33  ;;  %v9295_v61 = vcombine.high %v3491_v33, %v3491_v33 }
 0x2c7   : > { %v3475_v27 = vsel %vm3449_vm0, %v3406_v20, 0  ;;  %v3507_v13 = vsel %vm3449_vm0, %v3412_v4, 0  ;;  %v4626_v34 = vrot.slane %v4618_v16, %v10651_v23  ;;  %v4633_v46 = vrot.slane %v4619_v39, %v10651_v23 }
 0x2c8   : > { %v9278_v60 = vcombine.low %v3475_v27, %v3475_v27  ;;  %v9279_v31 = vcombine.high %v3475_v27, %v3475_v27  ;;  %v9310_v30 = vcombine.low %v3507_v13, %v3507_v13  ;;  %v9311_v58 = vcombine.high %v3507_v13, %v3507_v13  ;;  %3746 = vst [vmem:[%s10783_s30 + $0x20] sm:$0xf] %v9262_v32 }
 0x2c9   : > { %3747 = vst [vmem:[%s10783_s30 + $0x24] sm:$0xf] %v9263_v28  ;;  %3778 = vst [vmem:[%s10783_s30 + $0xa0] sm:$0xf] %v9294_v8  ;;  %v4634_v43 = vcombine.low %v11264_v47, %v4617_v22  ;;  %v4635_v26 = vcombine.high %v11264_v47, %v4617_v22  ;;  %v5450_v62 = vcombine.low %v4560_v50, %v4567_v3  ;;  %v12616_v57 = vshrl.u32 %v10474_v41, 16 }
 0x2ca   : > { %3779 = vst [vmem:[%s10783_s30 + $0xa4] sm:$0xf] %v9295_v61  ;;  %3762 = vst [vmem:[%s10783_s30 + $0x60] sm:$0xf] %v9278_v60  ;;  %v9334_v36 = vcombine.high %v4560_v50, %v4567_v3  ;;  %v5466_v15 = vcombine.low %v4576_v6, %v4583_v59  ;;  %v9335_v21 = vcombine.high %v4576_v6, %v4583_v59 }
 0x2cb   : > { %3763 = vst [vmem:[%s10783_s30 + $0x64] sm:$0xf] %v9279_v31  ;;  %3794 = vst [vmem:[%s10783_s30 + $0xe0] sm:$0xf] %v9310_v30  ;;  %v1463_v0 = vpack.i.b16 %v1462_v14, %v12616_v57  ;;  %v4642_v5 = vrot.slane %v4634_v43, %v10651_v23  ;;  %v4649_v1 = vrot.slane %v4635_v26, %v10651_v23 }
 0x2cc   : > { %3795 = vst [vmem:[%s10783_s30 + $0xe4] sm:$0xf] %v9311_v58  ;;  %v5457_v25 = vrot.slane %v5450_v62, %v10645_v35  ;;  %v5500_v19 = vcombine.low %v4626_v34, %v4633_v46  ;;  %v5465_v47 = vrot.slane %v9334_v36, %v10645_v35  ;;  %v5473_v63 = vrot.slane %v5466_v15, %v10645_v35 }
 0x2cd   : > { %v5481_v24 = vrot.slane %v9335_v21, %v10645_v35  ;;  %v9336_v2 = vcombine.high %v4626_v34, %v4633_v46  ;;  %v5516_v3 = vcombine.low %v4642_v5, %v4649_v1  ;;  %v9337_v6 = vcombine.high %v4642_v5, %v4649_v1 }
 0x2ce   : > { %v5507_v50 = vrot.slane %v5500_v19, %v10645_v35  ;;  %v2179_v41 = vrot.slane %v11349_v40, %v10645_v35  ;;  %v5482_v14 = vcombine.low %v5457_v25, %v5465_v47  ;;  %v2186_v16 = vrot.slane %v2172_v53, %v10645_v35 }
 0x2cf   : > { %v5490_v59 = vcombine.low %v5473_v63, %v5481_v24  ;;  %v5515_v22 = vrot.slane %v9336_v2, %v10645_v35  ;;  %v5523_v20 = vrot.slane %v5516_v3, %v10645_v35  ;;  %v5531_v4 = vrot.slane %v9337_v6, %v10645_v35 }
 0x2d0   : > { %v2187_v54 = vcombine.low %v11279_v12, %v2179_v41  ;;  %v2188_v33 = vcombine.high %v11279_v12, %v2179_v41  ;;  %v5489_v32 = vrot.slane %v5482_v14, %v10651_v23  ;;  %v2203_v61 = vcombine.low %v11304_v45, %v2186_v16 }
 0x2d1   : > { %v5497_v28 = vrot.slane %v5490_v59, %v10651_v23  ;;  %v5532_v8 = vcombine.low %v5507_v50, %v5515_v22  ;;  %v5540_v27 = vcombine.low %v5523_v20, %v5531_v4  ;;  %v2204_v53 = vcombine.high %v11304_v45, %v2186_v16 }
 0x2d2   : > { %v2195_v13 = vrot.slane %v2187_v54, %v10651_v23  ;;  %v2202_v40 = vrot.slane %v2188_v33, %v10651_v23  ;;  %v2211_v12 = vrot.slane %v2203_v61, %v10651_v23  ;;  %v2238_v58 = vcombine.high %v1463_v0, %v10642_v37 }
 0x2d3   : > { %v5498_v39 = vcombine.low %v5489_v32, %v5497_v28  ;;  %v5499_v34 = vcombine.high %v5489_v32, %v5497_v28  ;;  %v5539_v60 = vrot.slane %v5532_v8, %v10651_v23  ;;  %v5547_v31 = vrot.slane %v5540_v27, %v10651_v23 }
 0x2d4   : > { %v2218_v30 = vrot.slane %v2204_v53, %v10651_v23  ;;  %v2245_v46 = vrot.slane %v1463_v0, %v10645_v35  ;;  %v3053_v62 = vcombine.low %v2195_v13, %v2202_v40  ;;  %v9242_v36 = vcombine.high %v2195_v13, %v2202_v40  ;;  %v1336_v13 = vpop.permute.xlu0 %1335 }
 0x2d5   : > { %v5901_v43 = vshrl.u32 %v5498_v39, 16  ;;  %v5907_v26 = vshrl.u32 %v5499_v34, 16  ;;  %v5548_v15 = vcombine.low %v5539_v60, %v5547_v31  ;;  %v5549_v45 = vcombine.high %v5539_v60, %v5547_v31 }
 0x2d6   : > { %v2252_v21 = vrot.slane %v2238_v58, %v10645_v35  ;;  %v2253_v57 = vcombine.low %v11321_v48, %v2245_v46  ;;  %v2254_v5 = vcombine.high %v11321_v48, %v2245_v46  ;;  %v3060_v1 = vrot.slane %v3053_v62, %v10645_v35 }
 0x2d7   : > { %v3068_v25 = vrot.slane %v9242_v36, %v10645_v35  ;;  %v3069_v19 = vcombine.low %v2211_v12, %v2218_v30  ;;  %v5900_v47 = vpack.i.b16 %v5548_v15, %v5498_v39  ;;  %v5902_v63 = vshrl.u32 %v5548_v15, 16 }
 0x2d8   : > { %v5906_v0 = vpack.i.b16 %v5549_v45, %v5499_v34  ;;  %v5908_v24 = vshrl.u32 %v5549_v45, 16  ;;  %v2261_v2 = vrot.slane %v2253_v57, %v10651_v23  ;;  %v2268_v50 = vrot.slane %v2254_v5, %v10651_v23 }
 0x2d9   : > { %v2269_v3 = vcombine.low %v11324_v51, %v2252_v21  ;;  %v2270_v6 = vcombine.high %v11324_v51, %v2252_v21  ;;  %v5903_v41 = vpack.i.b16 %v5902_v63, %v5901_v43  ;;  %v5955_v14 = vsel %vm3449_vm0, %v5900_v47, 0  ;;  %v3861_v43 = vpop.permute.xlu1 %3860 }
 0x2da   : > { %v5909_v48 = vpack.i.b16 %v5908_v24, %v5907_v26  ;;  %v5987_v59 = vsel %vm3449_vm0, %v5906_v0, 0  ;;  %v9358_v22 = vcombine.low %v5955_v14, %v5955_v14  ;;  %v9359_v16 = vcombine.high %v5955_v14, %v5955_v14 }
 0x2db   : > { %v9390_v20 = vcombine.low %v5987_v59, %v5987_v59  ;;  %v9391_v4 = vcombine.high %v5987_v59, %v5987_v59  ;;  %v5971_v54 = vsel %vm3449_vm0, %v5903_v41, 0  ;;  %v2277_v51 = vrot.slane %v2269_v3, %v10651_v23 }
 0x2dc   : > { %v6003_v33 = vsel %vm3449_vm0, %v5909_v48, 0  ;;  %v2284_v32 = vrot.slane %v2270_v6, %v10651_v23  ;;  %v9374_v28 = vcombine.low %v5971_v54, %v5971_v54  ;;  %v9375_v8 = vcombine.high %v5971_v54, %v5971_v54  ;;  %6242 = vst [vmem:[%s10853_s14 + $0x20] sm:$0xf] %v9358_v22  ;;  %6243 = vst [vmem:[%s10853_s14 + $0x24] sm:$0xf] %v9359_v16 }
 0x2dd   : > { %v9406_v61 = vcombine.low %v6003_v33, %v6003_v33  ;;  %v9407_v27 = vcombine.high %v6003_v33, %v6003_v33  ;;  %6274 = vst [vmem:[%s10853_s14 + $0xa0] sm:$0xf] %v9390_v20  ;;  %6275 = vst [vmem:[%s10853_s14 + $0xa4] sm:$0xf] %v9391_v4  ;;  %v4720_v40 = vcombine.high %v11337_v49, %v10642_v37  ;;  %v1470_v15 = vshrl.u32 %v1336_v13, 16 }
 0x2de   : > { %v3076_v53 = vrot.slane %v3069_v19, %v10645_v35  ;;  %v9243_v39 = vcombine.high %v2211_v12, %v2218_v30  ;;  %v3103_v34 = vcombine.low %v2261_v2, %v2268_v50  ;;  %6258 = vst [vmem:[%s10853_s14 + $0x60] sm:$0xf] %v9374_v28  ;;  %6259 = vst [vmem:[%s10853_s14 + $0x64] sm:$0xf] %v9375_v8  ;;  %v3959_v47 = vshrl.u32 %v3861_v43, 16 }
 0x2df   : > { %6290 = vst [vmem:[%s10853_s14 + $0xe0] sm:$0xf] %v9406_v61  ;;  %6291 = vst [vmem:[%s10853_s14 + $0xe4] sm:$0xf] %v9407_v27  ;;  %v3085_v60 = vcombine.low %v3060_v1, %v3068_v25  ;;  %v9244_v31 = vcombine.high %v2261_v2, %v2268_v50  ;;  %v3119_v58 = vcombine.low %v2277_v51, %v2284_v32  ;;  %v12617_v0 = vshrl.u32 %v10494_v9, 16 }
 0x2e0   : > { %v9245_v46 = vcombine.high %v2277_v51, %v2284_v32  ;;  %v3084_v26 = vrot.slane %v9243_v39, %v10645_v35  ;;  %v3110_v62 = vrot.slane %v3103_v34, %v10645_v35  ;;  %v11452_v36 = vpack.i.b16 %v1336_v13, %v10494_v9 }
 0x2e1   : > { %v4668_v12 = vrot.slane %v4654_v11, %v10645_v35  ;;  %v3118_v30 = vrot.slane %v9244_v31, %v10645_v35  ;;  %v3126_v45 = vrot.slane %v3119_v58, %v10645_v35  ;;  %v11463_v57 = vrot.slane %v11337_v49, %v10645_v35 }
 0x2e2   : > { %v3134_v21 = vrot.slane %v9245_v46, %v10645_v35  ;;  %v11466_v5 = vrot.slane %v4720_v40, %v10645_v35  ;;  %v3093_v1 = vcombine.low %v3076_v53, %v3084_v26  ;;  %v3956_v25 = vpack.i.b16 %v3861_v43, %v10476_v42 }
 0x2e3   : > { %v3092_v19 = vrot.slane %v3085_v60, %v10651_v23  ;;  %v3135_v7 = vcombine.low %v3110_v62, %v3118_v30  ;;  %v11473_v24 = vpack.i.b16 %v1470_v15, %v12617_v0  ;;  %v2289_v49 = vcombine.high %v11452_v36, %v10642_v37 }
 0x2e4   : > { %v3143_v11 = vcombine.low %v3126_v45, %v3134_v21  ;;  %v3100_v63 = vrot.slane %v3093_v1, %v10651_v23  ;;  %v4669_v2 = vcombine.high %v3956_v25, %v10642_v37  ;;  %v11482_v6 = vrot.slane %v11452_v36, %v10645_v35 }
 0x2e5   : > { %v3142_v50 = vrot.slane %v3135_v7, %v10651_v23  ;;  %v4676_v41 = vrot.slane %v3956_v25, %v10645_v35  ;;  %v3960_v9 = vpack.i.b16 %v3959_v47, %v3958_v38 }
 0x2e6   : > { %v3150_v3 = vrot.slane %v3143_v11, %v10651_v23  ;;  %v3101_v48 = vcombine.low %v3092_v19, %v3100_v63  ;;  %v3102_v14 = vcombine.high %v3092_v19, %v3100_v63  ;;  %v4683_v59 = vrot.slane %v4669_v2, %v10645_v35 }
 0x2e7   : > { %v4684_v20 = vcombine.low %v11341_v52, %v4676_v41  ;;  %v4685_v4 = vcombine.high %v11341_v52, %v4676_v41  ;;  %v4735_v62 = vcombine.high %v3960_v9, %v10642_v37  ;;  %v4742_v15 = vrot.slane %v3960_v9, %v10645_v35 }
 0x2e8   : > { %v3151_v22 = vcombine.low %v3142_v50, %v3150_v3  ;;  %v3152_v16 = vcombine.high %v3142_v50, %v3150_v3  ;;  %v3416_v54 = vshrl.u32 %v3101_v48, 16  ;;  %v3422_v33 = vshrl.u32 %v3102_v14, 16 }
 0x2e9   : > { %v4700_v51 = vcombine.low %v4668_v12, %v4683_v59  ;;  %v4701_v32 = vcombine.high %v4668_v12, %v4683_v59  ;;  %v4692_v13 = vrot.slane %v4684_v20, %v10651_v23  ;;  %v4699_v42 = vrot.slane %v4685_v4, %v10651_v23  ;;  %v3839_v12 = vpop.permute.xlu0 %3838 }
 0x2ea   : > { %v3415_v28 = vpack.i.b16 %v3151_v22, %v3101_v48  ;;  %v3417_v8 = vshrl.u32 %v3151_v22, 16  ;;  %v3421_v61 = vpack.i.b16 %v3152_v16, %v3102_v14  ;;  %v3423_v27 = vshrl.u32 %v3152_v16, 16 }
 0x2eb   : > { %v4708_v38 = vrot.slane %v4700_v51, %v10651_v23  ;;  %v4715_v40 = vrot.slane %v4701_v32, %v10651_v23  ;;  %v4749_v25 = vrot.slane %v4735_v62, %v10645_v35  ;;  %v4750_v19 = vcombine.low %v11463_v57, %v4742_v15 }
 0x2ec   : > { %v3418_v53 = vpack.i.b16 %v3417_v8, %v3416_v54  ;;  %v3424_v39 = vpack.i.b16 %v3423_v27, %v3422_v33  ;;  %v3461_v52 = vsel %vm3449_vm0, %v3415_v28, 0  ;;  %v3493_v34 = vsel %vm3449_vm0, %v3421_v61, 0 }
 0x2ed   : > { %v9264_v60 = vcombine.low %v3461_v52, %v3461_v52  ;;  %v9265_v31 = vcombine.high %v3461_v52, %v3461_v52  ;;  %v9296_v58 = vcombine.low %v3493_v34, %v3493_v34  ;;  %v9297_v46 = vcombine.high %v3493_v34, %v3493_v34 }
 0x2ee   : > { %v3477_v43 = vsel %vm3449_vm0, %v3418_v53, 0  ;;  %v3509_v26 = vsel %vm3449_vm0, %v3424_v39, 0  ;;  %v4751_v7 = vcombine.high %v11463_v57, %v4742_v15  ;;  %v5550_v11 = vcombine.low %v4692_v13, %v4699_v42 }
 0x2ef   : > { %v9280_v30 = vcombine.low %v3477_v43, %v3477_v43  ;;  %v9281_v45 = vcombine.high %v3477_v43, %v3477_v43  ;;  %v9312_v21 = vcombine.low %v3509_v26, %v3509_v26  ;;  %v9313_v1 = vcombine.high %v3509_v26, %v3509_v26  ;;  %3748 = vst [vmem:[%s10783_s30 + $0x28] sm:$0xf] %v9264_v60  ;;  %v1360_v60 = vpop.permute.xlu0 %1359 }
 0x2f0   : > { %3749 = vst [vmem:[%s10783_s30 + $0x2c] sm:$0xf] %v9265_v31  ;;  %3780 = vst [vmem:[%s10783_s30 + $0xa8] sm:$0xf] %v9296_v58  ;;  %v9338_v47 = vcombine.high %v4692_v13, %v4699_v42  ;;  %v5566_v63 = vcombine.low %v4708_v38, %v4715_v40  ;;  %v9339_v0 = vcombine.high %v4708_v38, %v4715_v40  ;;  %v1338_v40 = vpop.permute.xlu1 %1337 }
 0x2f1   : > { %3781 = vst [vmem:[%s10783_s30 + $0xac] sm:$0xf] %v9297_v46  ;;  %3764 = vst [vmem:[%s10783_s30 + $0x68] sm:$0xf] %v9280_v30  ;;  %v3964_v2 = vpack.i.b16 %v3839_v12, %v10496_v10  ;;  %v4758_v50 = vrot.slane %v4750_v19, %v10651_v23  ;;  %v4765_v3 = vrot.slane %v4751_v7, %v10651_v23  ;;  %v1486_v43 = vshrl.u32 %v1338_v40, 16 }
 0x2f2   : > { %3765 = vst [vmem:[%s10783_s30 + $0x6c] sm:$0xf] %v9281_v45  ;;  %3796 = vst [vmem:[%s10783_s30 + $0xe8] sm:$0xf] %v9312_v21  ;;  %v4766_v41 = vcombine.low %v11466_v5, %v4749_v25  ;;  %v4767_v48 = vcombine.high %v11466_v5, %v4749_v25  ;;  %v5557_v57 = vrot.slane %v5550_v11, %v10645_v35  ;;  %v3967_v5 = vshrl.u32 %v3839_v12, 16 }
 0x2f3   : > { %3797 = vst [vmem:[%s10783_s30 + $0xec] sm:$0xf] %v9313_v1  ;;  %v5565_v14 = vrot.slane %v9338_v47, %v10645_v35  ;;  %v5573_v9 = vrot.slane %v5566_v63, %v10645_v35  ;;  %v5581_v59 = vrot.slane %v9339_v0, %v10645_v35  ;;  %v5600_v20 = vcombine.low %v4758_v50, %v4765_v3 }
 0x2f4   : > { %v4774_v22 = vrot.slane %v4766_v41, %v10651_v23  ;;  %v4781_v16 = vrot.slane %v4767_v48, %v10651_v23  ;;  %v9340_v4 = vcombine.high %v4758_v50, %v4765_v3  ;;  %v2355_v54 = vcombine.high %v11473_v24, %v10642_v37 }
 0x2f5   : > { %v5582_v33 = vcombine.low %v5557_v57, %v5565_v14  ;;  %v5590_v51 = vcombine.low %v5573_v9, %v5581_v59  ;;  %v5607_v32 = vrot.slane %v5600_v20, %v10645_v35  ;;  %v3968_v42 = vpack.i.b16 %v3967_v5, %v3966_v44 }
 0x2f6   : > { %v5615_v28 = vrot.slane %v9340_v4, %v10645_v35  ;;  %v5616_v8 = vcombine.low %v4774_v22, %v4781_v16  ;;  %v9341_v61 = vcombine.high %v4774_v22, %v4781_v16  ;;  %v4786_v38 = vcombine.high %v3964_v2, %v10642_v37 }
 0x2f7   : > { %v5589_v27 = vrot.slane %v5582_v33, %v10651_v23  ;;  %v5597_v13 = vrot.slane %v5590_v51, %v10651_v23  ;;  %v11535_v53 = vrot.slane %v2289_v49, %v10645_v35  ;;  %v11541_v31 = vrot.slane %v11473_v24, %v10645_v35 }
 0x2f8   : > { %v5623_v39 = vrot.slane %v5616_v8, %v10645_v35  ;;  %v5631_v52 = vrot.slane %v9341_v61, %v10645_v35  ;;  %v5632_v34 = vcombine.low %v5607_v32, %v5615_v28  ;;  %v4852_v58 = vcombine.high %v3968_v42, %v10642_v37  ;;  %v3841_v8 = vpop.permute.xlu1 %3840 }
 0x2f9   : > { %v5598_v10 = vcombine.low %v5589_v27, %v5597_v13  ;;  %v5599_v44 = vcombine.high %v5589_v27, %v5597_v13  ;;  %v11545_v46 = vrot.slane %v2355_v54, %v10645_v35  ;;  %v11548_v49 = vpack.i.b16 %v1338_v40, %v10520_v55 }
 0x2fa   : > { %v5640_v36 = vcombine.low %v5623_v39, %v5631_v52  ;;  %v11551_v26 = vrot.slane %v3964_v2, %v10645_v35  ;;  %v11554_v62 = vrot.slane %v4786_v38, %v10645_v35  ;;  %v11557_v24 = vrot.slane %v3968_v42, %v10645_v35 }
 0x2fb   : > { %v1475_v15 = vpack.i.b16 %v1360_v60, %v10498_v17  ;;  %v5639_v12 = vrot.slane %v5632_v34, %v10651_v23  ;;  %v5913_v45 = vshrl.u32 %v5598_v10, 16  ;;  %v5919_v21 = vshrl.u32 %v5599_v44, 16 }
 0x2fc   : > { %v5647_v30 = vrot.slane %v5640_v36, %v10651_v23  ;;  %v11563_v1 = vrot.slane %v4852_v58, %v10645_v35  ;;  %v1478_v25 = vshrl.u32 %v1360_v60, 16  ;;  %v11569_v63 = vpack.i.b16 %v1486_v43, %v1485_v29 }
 0x2fd   : > { %v2304_v19 = vcombine.high %v1475_v15, %v10642_v37  ;;  %v2311_v7 = vrot.slane %v1475_v15, %v10645_v35  ;;  %v2421_v0 = vcombine.high %v11548_v49, %v10642_v37  ;;  %v11575_v2 = vrot.slane %v11548_v49, %v10645_v35 }
 0x2fe   : > { %v5648_v11 = vcombine.low %v5639_v12, %v5647_v30  ;;  %v5649_v47 = vcombine.high %v5639_v12, %v5647_v30  ;;  %v3982_v41 = vshrl.u32 %v10522_v56, 16  ;;  %v1479_v55 = vpack.i.b16 %v1478_v25, %v1477_v18 }
 0x2ff   : > { %v2318_v50 = vrot.slane %v2304_v19, %v10645_v35  ;;  %v2319_v3 = vcombine.low %v11482_v6, %v2311_v7  ;;  %v2320_v29 = vcombine.high %v11482_v6, %v2311_v7 }
 0x300   : > { %v5912_v48 = vpack.i.b16 %v5648_v11, %v5598_v10  ;;  %v5914_v57 = vshrl.u32 %v5648_v11, 16  ;;  %v5918_v14 = vpack.i.b16 %v5649_v47, %v5599_v44  ;;  %v5920_v9 = vshrl.u32 %v5649_v47, 16 }
 0x301   : > { %v2327_v59 = vrot.slane %v2319_v3, %v10651_v23  ;;  %v2335_v22 = vcombine.low %v11535_v53, %v2318_v50  ;;  %v2334_v32 = vrot.slane %v2320_v29, %v10651_v23  ;;  %v2336_v28 = vcombine.high %v11535_v53, %v2318_v50 }
 0x302   : > { %v5915_v16 = vpack.i.b16 %v5914_v57, %v5913_v45  ;;  %v5921_v20 = vpack.i.b16 %v5920_v9, %v5919_v21  ;;  %v5957_v4 = vsel %vm3449_vm0, %v5912_v48, 0  ;;  %v5989_v54 = vsel %vm3449_vm0, %v5918_v14, 0 }
 0x303   : > { %v9360_v33 = vcombine.low %v5957_v4, %v5957_v4  ;;  %v9361_v51 = vcombine.high %v5957_v4, %v5957_v4  ;;  %v9392_v17 = vcombine.low %v5989_v54, %v5989_v54  ;;  %v9393_v18 = vcombine.high %v5989_v54, %v5989_v54 }
 0x304   : > { %v5973_v6 = vsel %vm3449_vm0, %v5915_v16, 0  ;;  %v6005_v5 = vsel %vm3449_vm0, %v5921_v20, 0  ;;  %v2343_v38 = vrot.slane %v2335_v22, %v10651_v23  ;;  %v2350_v40 = vrot.slane %v2336_v28, %v10651_v23 }
 0x305   : > { %v9376_v61 = vcombine.low %v5973_v6, %v5973_v6  ;;  %v9377_v27 = vcombine.high %v5973_v6, %v5973_v6  ;;  %v9408_v13 = vcombine.low %v6005_v5, %v6005_v5  ;;  %v9409_v42 = vcombine.high %v6005_v5, %v6005_v5  ;;  %6244 = vst [vmem:[%s10853_s14 + $0x28] sm:$0xf] %v9360_v33 }
 0x306   : > { %6245 = vst [vmem:[%s10853_s14 + $0x2c] sm:$0xf] %v9361_v51  ;;  %6276 = vst [vmem:[%s10853_s14 + $0xa8] sm:$0xf] %v9392_v17  ;;  %v2370_v39 = vcombine.high %v1479_v55, %v10642_v37  ;;  %v2377_v52 = vrot.slane %v1479_v55, %v10645_v35  ;;  %v2487_v53 = vcombine.high %v11569_v63, %v10642_v37  ;;  %v3983_v10 = vshrl.u32 %v3841_v8, 16  ;;  %v3863_v55 = vpop.permute.xlu0 %3862  ;;  %v12618_v51 = vld [vmem:[#allocation26_spill] sm:$0xff] }
 0x307   : > { %6277 = vst [vmem:[%s10853_s14 + $0xac] sm:$0xf] %v9393_v18  ;;  %6260 = vst [vmem:[%s10853_s14 + $0x68] sm:$0xf] %v9376_v61  ;;  %v3153_v34 = vcombine.low %v2327_v59, %v2334_v32  ;;  %v9246_v60 = vcombine.high %v2327_v59, %v2334_v32  ;;  %v3169_v43 = vcombine.low %v2343_v38, %v2350_v40  ;;  %v3974_v5 = vshrl.u32 %v12618_v51, 16 }
 0x308   : > { %6261 = vst [vmem:[%s10853_s14 + $0x6c] sm:$0xf] %v9377_v27  ;;  %6292 = vst [vmem:[%s10853_s14 + $0xe8] sm:$0xf] %v9408_v13  ;;  %v2384_v44 = vrot.slane %v2370_v39, %v10645_v35  ;;  %v2385_v58 = vcombine.low %v11541_v31, %v2377_v52  ;;  %v2386_v36 = vcombine.high %v11541_v31, %v2377_v52  ;;  %v3975_v32 = vshrl.u32 %v3863_v55, 16  ;;  %v11651_v13 = vpop.permute.xlu1 %1361  ;;  %v12619_v39 = vld [vmem:[#allocation27_spill] sm:$0xff] }
 0x309   : > { %6293 = vst [vmem:[%s10853_s14 + $0xec] sm:$0xf] %v9409_v42  ;;  %v3160_v15 = vrot.slane %v3153_v34, %v10645_v35  ;;  %v3168_v12 = vrot.slane %v9246_v60, %v10645_v35  ;;  %v9247_v30 = vcombine.high %v2343_v38, %v2350_v40  ;;  %v11611_v45 = vpack.i.b16 %v3841_v8, %v10522_v56 }
 0x30a   : > { %v2393_v21 = vrot.slane %v2385_v58, %v10651_v23  ;;  %v2400_v25 = vrot.slane %v2386_v36, %v10651_v23  ;;  %v2401_v19 = vcombine.low %v11545_v46, %v2384_v44  ;;  %v2402_v7 = vcombine.high %v11545_v46, %v2384_v44 }
 0x30b   : > { %v3176_v11 = vrot.slane %v3169_v43, %v10645_v35  ;;  %v3184_v31 = vrot.slane %v9247_v30, %v10645_v35  ;;  %v3185_v47 = vcombine.low %v3160_v15, %v3168_v12  ;;  %v11619_v50 = vpack.i.b16 %v3983_v10, %v3982_v41 }
 0x30c   : > { %v2409_v3 = vrot.slane %v2401_v19, %v10651_v23  ;;  %v2416_v56 = vrot.slane %v2402_v7, %v10651_v23  ;;  %v3203_v48 = vcombine.low %v2393_v21, %v2400_v25  ;;  %v9248_v57 = vcombine.high %v2393_v21, %v2400_v25 }
 0x30d   : > { %v11627_v14 = vrot.slane %v2421_v0, %v10645_v35  ;;  %v11631_v46 = vrot.slane %v11569_v63, %v10645_v35  ;;  %v11634_v9 = vrot.slane %v2487_v53, %v10645_v35  ;;  %v3193_v41 = vcombine.low %v3176_v11, %v3184_v31 }
 0x30e   : > { %v3210_v29 = vrot.slane %v3203_v48, %v10645_v35  ;;  %v3218_v59 = vrot.slane %v9248_v57, %v10645_v35  ;;  %v3219_v22 = vcombine.low %v2409_v3, %v2416_v56  ;;  %v9249_v16 = vcombine.high %v2409_v3, %v2416_v56 }
 0x30f   : > { %v3192_v20 = vrot.slane %v3185_v47, %v10651_v23  ;;  %v3200_v49 = vrot.slane %v3193_v41, %v10651_v23  ;;  %v4918_v0 = vcombine.high %v11611_v45, %v10642_v37  ;;  %v4984_v63 = vcombine.high %v11619_v50, %v10642_v37 }
 0x310   : > { %v3226_v4 = vrot.slane %v3219_v22, %v10645_v35  ;;  %v3234_v54 = vrot.slane %v9249_v16, %v10645_v35  ;;  %v3235_v33 = vcombine.low %v3210_v29, %v3218_v59  ;;  %v3972_v17 = vpack.i.b16 %v3863_v55, %v12618_v51 }
 0x311   : > { %v3201_v18 = vcombine.low %v3192_v20, %v3200_v49  ;;  %v3202_v6 = vcombine.high %v3192_v20, %v3200_v49  ;;  %v3976_v40 = vpack.i.b16 %v3975_v32, %v3974_v5  ;;  %v1493_v52 = vshrl.u32 %v12619_v39, 16 }
 0x312   : > { %v3242_v28 = vrot.slane %v3235_v33, %v10651_v23  ;;  %v3243_v8 = vcombine.low %v3226_v4, %v3234_v54  ;;  %v4801_v61 = vcombine.high %v3972_v17, %v10642_v37  ;;  %v4808_v27 = vrot.slane %v3972_v17, %v10645_v35 }
 0x313   : > { %v3428_v42 = vshrl.u32 %v3201_v18, 16  ;;  %v3434_v38 = vshrl.u32 %v3202_v6, 16  ;;  %v4867_v44 = vcombine.high %v3976_v40, %v10642_v37  ;;  %v4874_v58 = vrot.slane %v3976_v40, %v10645_v35 }
 0x314   : > { %v3250_v53 = vrot.slane %v3243_v8, %v10651_v23  ;;  %v4815_v34 = vrot.slane %v4801_v61, %v10645_v35  ;;  %v4816_v60 = vcombine.low %v11551_v26, %v4808_v27  ;;  %v4817_v10 = vcombine.high %v11551_v26, %v4808_v27 }
 0x315   : > { %v11662_v36 = vpack.i.b16 %v11651_v13, %v12619_v39  ;;  %v1494_v43 = vshrl.u32 %v11651_v13, 16  ;;  %v4881_v19 = vrot.slane %v4867_v44, %v10645_v35  ;;  %v4882_v7 = vcombine.low %v11557_v24, %v4874_v58 }
 0x316   : > { %v3251_v15 = vcombine.low %v3242_v28, %v3250_v53  ;;  %v3252_v12 = vcombine.high %v3242_v28, %v3250_v53  ;;  %v4824_v30 = vrot.slane %v4816_v60, %v10651_v23  ;;  %v4831_v21 = vrot.slane %v4817_v10, %v10651_v23 }
 0x317   : > { %v4832_v25 = vcombine.low %v11554_v62, %v4815_v34  ;;  %v4833_v26 = vcombine.high %v11554_v62, %v4815_v34  ;;  %v4883_v57 = vcombine.high %v11557_v24, %v4874_v58  ;;  %v4890_v41 = vrot.slane %v4882_v7, %v10651_v23 }
 0x318   : > { %v3427_v11 = vpack.i.b16 %v3251_v15, %v3201_v18  ;;  %v3429_v31 = vshrl.u32 %v3251_v15, 16  ;;  %v3433_v47 = vpack.i.b16 %v3252_v12, %v3202_v6  ;;  %v3435_v3 = vshrl.u32 %v3252_v12, 16 }
 0x319   : > { %v4840_v56 = vrot.slane %v4832_v25, %v10651_v23  ;;  %v4847_v48 = vrot.slane %v4833_v26, %v10651_v23  ;;  %v4897_v54 = vrot.slane %v4883_v57, %v10651_v23  ;;  %v4898_v33 = vcombine.low %v11563_v1, %v4881_v19 }
 0x31a   : > { %v3430_v55 = vpack.i.b16 %v3429_v31, %v3428_v42  ;;  %v3436_v29 = vpack.i.b16 %v3435_v3, %v3434_v38  ;;  %v3463_v62 = vsel %vm3449_vm0, %v3427_v11, 0  ;;  %v3495_v59 = vsel %vm3449_vm0, %v3433_v47, 0 }
 0x31b   : > { %v9266_v22 = vcombine.low %v3463_v62, %v3463_v62  ;;  %v9267_v16 = vcombine.high %v3463_v62, %v3463_v62  ;;  %v9298_v20 = vcombine.low %v3495_v59, %v3495_v59  ;;  %v9299_v49 = vcombine.high %v3495_v59, %v3495_v59 }
 0x31c   : > { %v3479_v4 = vsel %vm3449_vm0, %v3430_v55, 0  ;;  %v3511_v24 = vsel %vm3449_vm0, %v3436_v29, 0  ;;  %v4899_v5 = vcombine.high %v11563_v1, %v4881_v19  ;;  %v4906_v32 = vrot.slane %v4898_v33, %v10651_v23 }
 0x31d   : > { %v9282_v51 = vcombine.low %v3479_v4, %v3479_v4  ;;  %v9283_v17 = vcombine.high %v3479_v4, %v3479_v4  ;;  %v9314_v18 = vcombine.low %v3511_v24, %v3511_v24  ;;  %v9315_v6 = vcombine.high %v3511_v24, %v3511_v24  ;;  %3750 = vst [vmem:[%s10783_s30 + $0x30] sm:$0xf] %v9266_v22 }
 0x31e   : > { %3751 = vst [vmem:[%s10783_s30 + $0x34] sm:$0xf] %v9267_v16  ;;  %3782 = vst [vmem:[%s10783_s30 + $0xb0] sm:$0xf] %v9298_v20  ;;  %v5650_v28 = vcombine.low %v4824_v30, %v4831_v21  ;;  %v9342_v8 = vcombine.high %v4824_v30, %v4831_v21  ;;  %v5666_v61 = vcombine.low %v4840_v56, %v4847_v48 }
 0x31f   : > { %3783 = vst [vmem:[%s10783_s30 + $0xb4] sm:$0xf] %v9299_v49  ;;  %3766 = vst [vmem:[%s10783_s30 + $0x70] sm:$0xf] %v9282_v51  ;;  %v9343_v27 = vcombine.high %v4840_v56, %v4847_v48  ;;  %v5700_v13 = vcombine.low %v4890_v41, %v4897_v54  ;;  %v9344_v42 = vcombine.high %v4890_v41, %v4897_v54 }
 0x320   : > { %3767 = vst [vmem:[%s10783_s30 + $0x74] sm:$0xf] %v9283_v17  ;;  %3798 = vst [vmem:[%s10783_s30 + $0xf0] sm:$0xf] %v9314_v18  ;;  %v4913_v38 = vrot.slane %v4899_v5, %v10651_v23  ;;  %v5657_v40 = vrot.slane %v5650_v28, %v10645_v35  ;;  %v5665_v39 = vrot.slane %v9342_v8, %v10645_v35 }
 0x321   : > { %3799 = vst [vmem:[%s10783_s30 + $0xf4] sm:$0xf] %v9315_v6  ;;  %v1495_v53 = vpack.i.b16 %v1494_v43, %v1493_v52  ;;  %v5673_v1 = vrot.slane %v5666_v61, %v10645_v35  ;;  %v5681_v34 = vrot.slane %v9343_v27, %v10645_v35  ;;  %v5707_v60 = vrot.slane %v5700_v13, %v10645_v35 }
 0x322   : > { %v5715_v10 = vrot.slane %v9344_v42, %v10645_v35  ;;  %v5682_v44 = vcombine.low %v5657_v40, %v5665_v39  ;;  %v5716_v58 = vcombine.low %v4906_v32, %v4913_v38  ;;  %v9345_v15 = vcombine.high %v4906_v32, %v4913_v38 }
 0x323   : > { %v2436_v12 = vcombine.high %v11662_v36, %v10642_v37  ;;  %v5690_v30 = vcombine.low %v5673_v1, %v5681_v34  ;;  %v2443_v25 = vrot.slane %v11662_v36, %v10645_v35  ;;  %v2502_v52 = vcombine.high %v1495_v53, %v10642_v37 }
 0x324   : > { %v5732_v21 = vcombine.low %v5707_v60, %v5715_v10  ;;  %v5689_v43 = vrot.slane %v5682_v44, %v10651_v23  ;;  %v5723_v26 = vrot.slane %v5716_v58, %v10645_v35  ;;  %v5731_v19 = vrot.slane %v9345_v15, %v10645_v35 }
 0x325   : > { %v2450_v7 = vrot.slane %v2436_v12, %v10645_v35  ;;  %v5697_v11 = vrot.slane %v5690_v30, %v10651_v23  ;;  %v2451_v47 = vcombine.low %v11575_v2, %v2443_v25  ;;  %v2452_v3 = vcombine.high %v11575_v2, %v2443_v25 }
 0x326   : > { %v5739_v31 = vrot.slane %v5732_v21, %v10651_v23  ;;  %v5740_v56 = vcombine.low %v5723_v26, %v5731_v19  ;;  %v2509_v57 = vrot.slane %v1495_v53, %v10645_v35  ;;  %v2516_v2 = vrot.slane %v2502_v52, %v10645_v35 }
 0x327   : > { %v2467_v36 = vcombine.low %v11627_v14, %v2450_v7  ;;  %v2468_v48 = vcombine.high %v11627_v14, %v2450_v7  ;;  %v5698_v41 = vcombine.low %v5689_v43, %v5697_v11  ;;  %v5699_v55 = vcombine.high %v5689_v43, %v5697_v11  ;;  %v6323_v7 = vpop.permute.xlu0 %6322 }
 0x328   : > { %v2459_v29 = vrot.slane %v2451_v47, %v10651_v23  ;;  %v2466_v62 = vrot.slane %v2452_v3, %v10651_v23  ;;  %v5747_v59 = vrot.slane %v5740_v56, %v10651_v23  ;;  %v2517_v14 = vcombine.low %v11631_v46, %v2509_v57 }
 0x329   : > { %v2475_v22 = vrot.slane %v2467_v36, %v10651_v23  ;;  %v2482_v16 = vrot.slane %v2468_v48, %v10651_v23  ;;  %v5925_v20 = vshrl.u32 %v5698_v41, 16  ;;  %v5931_v49 = vshrl.u32 %v5699_v55, 16 }
 0x32a   : > { %v2518_v4 = vcombine.high %v11631_v46, %v2509_v57  ;;  %v5748_v24 = vcombine.low %v5739_v31, %v5747_v59  ;;  %v5749_v54 = vcombine.high %v5739_v31, %v5747_v59  ;;  %v2533_v33 = vcombine.low %v11634_v9, %v2516_v2  ;;  %v12620_v59 = vld [vmem:[#allocation29_spill] sm:$0xff] }
 0x32b   : > { %v2534_v51 = vcombine.high %v11634_v9, %v2516_v2  ;;  %v2525_v17 = vrot.slane %v2517_v14, %v10651_v23  ;;  %v3253_v6 = vcombine.low %v2459_v29, %v2466_v62  ;;  %v9250_v5 = vcombine.high %v2459_v29, %v2466_v62 }
 0x32c   : > { %v2532_v18 = vrot.slane %v2518_v4, %v10651_v23  ;;  %v5924_v32 = vpack.i.b16 %v5748_v24, %v5698_v41  ;;  %v5926_v28 = vshrl.u32 %v5748_v24, 16  ;;  %v5930_v8 = vpack.i.b16 %v5749_v54, %v5699_v55  ;;  %v3865_v41 = vpop.permute.xlu1 %3864  ;;  %v12621_v4 = vld [vmem:[#allocation28_spill] sm:$0xff] }
 0x32d   : > { %v5932_v61 = vshrl.u32 %v5749_v54, 16  ;;  %v2541_v27 = vrot.slane %v2533_v33, %v10651_v23  ;;  %v2548_v46 = vrot.slane %v2534_v51, %v10651_v23  ;;  %v3260_v13 = vrot.slane %v3253_v6, %v10645_v35 }
 0x32e   : > { %v3268_v42 = vrot.slane %v9250_v5, %v10645_v35  ;;  %v5927_v38 = vpack.i.b16 %v5926_v28, %v5925_v20  ;;  %v5959_v40 = vsel %vm3449_vm0, %v5924_v32, 0  ;;  %v5991_v39 = vsel %vm3449_vm0, %v5930_v8, 0 }
 0x32f   : > { %v5933_v9 = vpack.i.b16 %v5932_v61, %v5931_v49  ;;  %v9362_v53 = vcombine.low %v5959_v40, %v5959_v40  ;;  %v9363_v1 = vcombine.high %v5959_v40, %v5959_v40  ;;  %v9394_v34 = vcombine.low %v5991_v39, %v5991_v39  ;;  %v12622_v40 = vld [vmem:[#allocation30_spill] sm:$0xff] }
 0x330   : > { %v9395_v60 = vcombine.high %v5991_v39, %v5991_v39  ;;  %v5975_v10 = vsel %vm3449_vm0, %v5927_v38, 0  ;;  %v3269_v58 = vcombine.low %v2475_v22, %v2482_v16  ;;  %v9251_v15 = vcombine.high %v2475_v22, %v2482_v16 }
 0x331   : > { %v6007_v44 = vsel %vm3449_vm0, %v5933_v9, 0  ;;  %v9378_v12 = vcombine.low %v5975_v10, %v5975_v10  ;;  %v9379_v30 = vcombine.high %v5975_v10, %v5975_v10  ;;  %6246 = vst [vmem:[%s10853_s14 + $0x30] sm:$0xf] %v9362_v53  ;;  %6247 = vst [vmem:[%s10853_s14 + $0x34] sm:$0xf] %v9363_v1  ;;  %v3285_v26 = vcombine.low %v3260_v13, %v3268_v42 }
 0x332   : > { %v9410_v21 = vcombine.low %v6007_v44, %v6007_v44  ;;  %v9411_v25 = vcombine.high %v6007_v44, %v6007_v44  ;;  %6278 = vst [vmem:[%s10853_s14 + $0xb0] sm:$0xf] %v9394_v34  ;;  %6279 = vst [vmem:[%s10853_s14 + $0xb4] sm:$0xf] %v9395_v60  ;;  %v3276_v52 = vrot.slane %v3269_v58, %v10645_v35  ;;  %v6367_v2 = vshrl.u32 %v6323_v7, 16 }
 0x333   : > { %v3284_v43 = vrot.slane %v9251_v15, %v10645_v35  ;;  %v3303_v19 = vcombine.low %v2525_v17, %v2532_v18  ;;  %v11742_v11 = vrot.slane %v11611_v45, %v10645_v35  ;;  %6262 = vst [vmem:[%s10853_s14 + $0x70] sm:$0xf] %v9378_v12  ;;  %6263 = vst [vmem:[%s10853_s14 + $0x74] sm:$0xf] %v9379_v30  ;;  %v6366_v14 = vshrl.u32 %v12620_v59, 16 }
 0x334   : > { %6294 = vst [vmem:[%s10853_s14 + $0xf0] sm:$0xf] %v9410_v21  ;;  %6295 = vst [vmem:[%s10853_s14 + $0xf4] sm:$0xf] %v9411_v25  ;;  %v9252_v31 = vcombine.high %v2525_v17, %v2532_v18  ;;  %v3319_v47 = vcombine.low %v2541_v27, %v2548_v46  ;;  %v9253_v3 = vcombine.high %v2541_v27, %v2548_v46  ;;  %v3990_v51 = vshrl.u32 %v12621_v4, 16 }
 0x335   : > { %v11752_v56 = vrot.slane %v4918_v0, %v10645_v35  ;;  %v11756_v36 = vrot.slane %v11619_v50, %v10645_v35  ;;  %v3293_v48 = vcombine.low %v3276_v52, %v3284_v43  ;;  %v3310_v57 = vrot.slane %v3303_v19, %v10645_v35 }
 0x336   : > { %v3318_v55 = vrot.slane %v9252_v31, %v10645_v35  ;;  %v3326_v29 = vrot.slane %v3319_v47, %v10645_v35  ;;  %v3334_v62 = vrot.slane %v9253_v3, %v10645_v35  ;;  %v11763_v22 = vpack.i.b16 %v6323_v7, %v12620_v59  ;;  %v6331_v3 = vpop.permute.xlu0 %6330 }
 0x337   : > { %v11769_v45 = vrot.slane %v4984_v63, %v10645_v35  ;;  %v3292_v0 = vrot.slane %v3285_v26, %v10651_v23  ;;  %v3300_v16 = vrot.slane %v3293_v48, %v10651_v23  ;;  %v3988_v24 = vpack.i.b16 %v3865_v41, %v12621_v4 }
 0x338   : > { %v3335_v20 = vcombine.low %v3310_v57, %v3318_v55  ;;  %v3343_v49 = vcombine.low %v3326_v29, %v3334_v62  ;;  %v3991_v17 = vshrl.u32 %v3865_v41, 16  ;;  %v6490_v18 = vcombine.high %v11763_v22, %v10642_v37 }
 0x339   : > { %v3301_v54 = vcombine.low %v3292_v0, %v3300_v16  ;;  %v3302_v33 = vcombine.high %v3292_v0, %v3300_v16  ;;  %v11782_v6 = vrot.slane %v11763_v22, %v10645_v35  ;;  %v11784_v32 = vpack.i.b16 %v6367_v2, %v6366_v14 }
 0x33a   : > { %v3342_v50 = vrot.slane %v3335_v20, %v10651_v23  ;;  %v3350_v63 = vrot.slane %v3343_v49, %v10651_v23  ;;  %v3992_v28 = vpack.i.b16 %v3991_v17, %v3990_v51  ;;  %v4933_v8 = vcombine.high %v3988_v24, %v10642_v37 }
 0x33b   : > { %v3440_v5 = vshrl.u32 %v3301_v54, 16  ;;  %v3446_v46 = vshrl.u32 %v3302_v33, 16  ;;  %v4940_v13 = vrot.slane %v3988_v24, %v10645_v35  ;;  %v6430_v39 = vshrl.u32 %v12622_v40, 16 }
 0x33c   : > { %v3351_v61 = vcombine.low %v3342_v50, %v3350_v63  ;;  %v3352_v27 = vcombine.high %v3342_v50, %v3350_v63  ;;  %v4947_v42 = vrot.slane %v4933_v8, %v10645_v35  ;;  %v4999_v38 = vcombine.high %v3992_v28, %v10642_v37 }
 0x33d   : > { %v5006_v9 = vrot.slane %v3992_v28, %v10645_v35  ;;  %v4948_v10 = vcombine.low %v11742_v11, %v4940_v13  ;;  %v4949_v44 = vcombine.high %v11742_v11, %v4940_v13  ;;  %v6428_v20 = vpack.i.b16 %v6331_v3, %v12622_v40 }
 0x33e   : > { %v3439_v53 = vpack.i.b16 %v3351_v61, %v3301_v54  ;;  %v3441_v1 = vshrl.u32 %v3351_v61, 16  ;;  %v3445_v34 = vpack.i.b16 %v3352_v27, %v3302_v33  ;;  %v3447_v60 = vshrl.u32 %v3352_v27, 16 }
 0x33f   : > { %v4964_v58 = vcombine.low %v11752_v56, %v4947_v42  ;;  %v4965_v15 = vcombine.high %v11752_v56, %v4947_v42  ;;  %v4956_v31 = vrot.slane %v4948_v10, %v10651_v23  ;;  %v4963_v47 = vrot.slane %v4949_v44, %v10651_v23 }
 0x340   : > { %v3442_v12 = vpack.i.b16 %v3441_v1, %v3440_v5  ;;  %v3448_v30 = vpack.i.b16 %v3447_v60, %v3446_v46  ;;  %v3465_v21 = vsel %vm3449_vm0, %v3439_v53, 0  ;;  %v3497_v25 = vsel %vm3449_vm0, %v3445_v34, 0  ;;  %v6325_v1 = vpop.permute.xlu1 %6324 }
 0x341   : > { %v9268_v52 = vcombine.low %v3465_v21, %v3465_v21  ;;  %v9269_v43 = vcombine.high %v3465_v21, %v3465_v21  ;;  %v9300_v26 = vcombine.low %v3497_v25, %v3497_v25  ;;  %v9301_v19 = vcombine.high %v3497_v25, %v3497_v25  ;;  %v6347_v25 = vpop.permute.xlu0 %6346 }
 0x342   : > { %v3481_v7 = vsel %vm3449_vm0, %v3442_v12, 0  ;;  %v3513_v11 = vsel %vm3449_vm0, %v3448_v30, 0  ;;  %v4972_v55 = vrot.slane %v4964_v58, %v10651_v23  ;;  %v4979_v29 = vrot.slane %v4965_v15, %v10651_v23  ;;  %v12623_v30 = vld [vmem:[#allocation33_spill] sm:$0xff] }
 0x343   : > { %v9284_v56 = vcombine.low %v3481_v7, %v3481_v7  ;;  %v9285_v48 = vcombine.high %v3481_v7, %v3481_v7  ;;  %v9316_v57 = vcombine.low %v3513_v11, %v3513_v11  ;;  %v9317_v41 = vcombine.high %v3513_v11, %v3513_v11  ;;  %3752 = vst [vmem:[%s10783_s30 + $0x38] sm:$0xf] %v9268_v52 }
 0x344   : > { %3753 = vst [vmem:[%s10783_s30 + $0x3c] sm:$0xf] %v9269_v43  ;;  %3784 = vst [vmem:[%s10783_s30 + $0xb8] sm:$0xf] %v9300_v26  ;;  %v5013_v62 = vrot.slane %v4999_v38, %v10645_v35  ;;  %v5014_v59 = vcombine.low %v11756_v36, %v5006_v9  ;;  %v5015_v0 = vcombine.high %v11756_v36, %v5006_v9  ;;  %v6431_v5 = vshrl.u32 %v6331_v3, 16 }
 0x345   : > { %3785 = vst [vmem:[%s10783_s30 + $0xbc] sm:$0xf] %v9301_v19  ;;  %3768 = vst [vmem:[%s10783_s30 + $0x78] sm:$0xf] %v9284_v56  ;;  %v5750_v16 = vcombine.low %v4956_v31, %v4963_v47  ;;  %v9346_v2 = vcombine.high %v4956_v31, %v4963_v47  ;;  %v5766_v24 = vcombine.low %v4972_v55, %v4979_v29  ;;  %v6383_v21 = vshrl.u32 %v6325_v1, 16 }
 0x346   : > { %3769 = vst [vmem:[%s10783_s30 + $0x7c] sm:$0xf] %v9285_v48  ;;  %3800 = vst [vmem:[%s10783_s30 + $0xf8] sm:$0xf] %v9316_v57  ;;  %v5022_v49 = vrot.slane %v5014_v59, %v10651_v23  ;;  %v5030_v14 = vcombine.low %v11769_v45, %v5013_v62  ;;  %v5031_v4 = vcombine.high %v11769_v45, %v5013_v62  ;;  %v6382_v19 = vshrl.u32 %v12623_v30, 16  ;;  %v12624_v57 = vld [vmem:[#allocation31_spill] sm:$0xff] }
 0x347   : > { %3801 = vst [vmem:[%s10783_s30 + $0xfc] sm:$0xf] %v9317_v41  ;;  %v5029_v54 = vrot.slane %v5015_v0, %v10651_v23  ;;  %v5757_v33 = vrot.slane %v5750_v16, %v10645_v35  ;;  %v5765_v51 = vrot.slane %v9346_v2, %v10645_v35  ;;  %v9347_v17 = vcombine.high %v4972_v55, %v4979_v29 }
 0x348   : > { %v5038_v36 = vrot.slane %v5030_v14, %v10651_v23  ;;  %v5045_v50 = vrot.slane %v5031_v4, %v10651_v23  ;;  %v5773_v63 = vrot.slane %v5766_v24, %v10645_v35  ;;  %v6556_v27 = vcombine.high %v11784_v32, %v10642_v37 }
 0x349   : > { %v5781_v28 = vrot.slane %v9347_v17, %v10645_v35  ;;  %v5782_v8 = vcombine.low %v5757_v33, %v5765_v51  ;;  %v5800_v61 = vcombine.low %v5022_v49, %v5029_v54  ;;  %v9348_v45 = vcombine.high %v5022_v49, %v5029_v54 }
 0x34a   : > { %v5816_v46 = vcombine.low %v5038_v36, %v5045_v50  ;;  %v9349_v13 = vcombine.high %v5038_v36, %v5045_v50  ;;  %v6432_v42 = vpack.i.b16 %v6431_v5, %v6430_v39  ;;  %v11832_v38 = vrot.slane %v6490_v18, %v10645_v35 }
 0x34b   : > { %v5790_v9 = vcombine.low %v5773_v63, %v5781_v28  ;;  %v5807_v40 = vrot.slane %v5800_v61, %v10645_v35  ;;  %v5815_v53 = vrot.slane %v9348_v45, %v10645_v35  ;;  %v11838_v34 = vrot.slane %v11784_v32, %v10645_v35 }
 0x34c   : > { %v5823_v60 = vrot.slane %v5816_v46, %v10645_v35  ;;  %v5831_v39 = vrot.slane %v9349_v13, %v10645_v35  ;;  %v7018_v10 = vcombine.high %v6428_v20, %v10642_v37  ;;  %v5789_v22 = vrot.slane %v5782_v8, %v10651_v23 }
 0x34d   : > { %v5797_v18 = vrot.slane %v5790_v9, %v10651_v23  ;;  %v5832_v44 = vcombine.low %v5807_v40, %v5815_v53  ;;  %v7084_v58 = vcombine.high %v6432_v42, %v10642_v37  ;;  %v11847_v15 = vrot.slane %v6556_v27, %v10645_v35 }
 0x34e   : > { %v5840_v12 = vcombine.low %v5823_v60, %v5831_v39  ;;  %v6380_v32 = vpack.i.b16 %v6325_v1, %v12623_v30  ;;  %v11851_v26 = vrot.slane %v6428_v20, %v10645_v35  ;;  %v11857_v31 = vrot.slane %v7018_v10, %v10645_v35 }
 0x34f   : > { %v5798_v52 = vcombine.low %v5789_v22, %v5797_v18  ;;  %v5799_v43 = vcombine.high %v5789_v22, %v5797_v18  ;;  %v5839_v7 = vrot.slane %v5832_v44, %v10651_v23  ;;  %v11860_v47 = vrot.slane %v6432_v42, %v10645_v35  ;;  %v6333_v22 = vpop.permute.xlu1 %6332 }
 0x350   : > { %v5847_v11 = vrot.slane %v5840_v12, %v10651_v23  ;;  %v11863_v3 = vrot.slane %v7084_v58, %v10645_v35  ;;  %v11865_v56 = vpack.i.b16 %v6383_v21, %v6382_v19  ;;  %v6622_v48 = vcombine.high %v6380_v32, %v10642_v37  ;;  %v12625_v12 = vld [vmem:[#allocation34_spill] sm:$0xff] }
 0x351   : > { %v6372_v41 = vpack.i.b16 %v6347_v25, %v12624_v57  ;;  %v5937_v62 = vshrl.u32 %v5798_v52, 16  ;;  %v5943_v59 = vshrl.u32 %v5799_v43, 16  ;;  %v6374_v0 = vshrl.u32 %v12624_v57, 16 }
 0x352   : > { %v5848_v55 = vcombine.low %v5839_v7, %v5847_v11  ;;  %v5849_v29 = vcombine.high %v5839_v7, %v5847_v11  ;;  %v6375_v16 = vshrl.u32 %v6347_v25, 16  ;;  %v11873_v54 = vrot.slane %v6380_v32, %v10645_v35 }
 0x353   : > { %v6505_v2 = vcombine.high %v6372_v41, %v10642_v37  ;;  %v6512_v20 = vrot.slane %v6372_v41, %v10645_v35  ;;  %v11896_v18 = vrot.slane %v6622_v48, %v10645_v35  ;;  %v6688_v44 = vcombine.high %v11865_v56, %v10642_v37 }
 0x354   : > { %v5936_v49 = vpack.i.b16 %v5848_v55, %v5798_v52  ;;  %v5938_v14 = vshrl.u32 %v5848_v55, 16  ;;  %v5942_v4 = vpack.i.b16 %v5849_v29, %v5799_v43  ;;  %v5944_v24 = vshrl.u32 %v5849_v29, 16 }
 0x355   : > { %v6376_v33 = vpack.i.b16 %v6375_v16, %v6374_v0  ;;  %v6519_v51 = vrot.slane %v6505_v2, %v10645_v35  ;;  %v6520_v17 = vcombine.low %v11782_v6, %v6512_v20  ;;  %v6521_v13 = vcombine.high %v11782_v6, %v6512_v20 }
 0x356   : > { %v5939_v36 = vpack.i.b16 %v5938_v14, %v5937_v62  ;;  %v5945_v50 = vpack.i.b16 %v5944_v24, %v5943_v59  ;;  %v5961_v63 = vsel %vm3449_vm0, %v5936_v49, 0  ;;  %v5993_v5 = vsel %vm3449_vm0, %v5942_v4, 0 }
 0x357   : > { %v9364_v28 = vcombine.low %v5961_v63, %v5961_v63  ;;  %v9365_v8 = vcombine.high %v5961_v63, %v5961_v63  ;;  %v9396_v61 = vcombine.low %v5993_v5, %v5993_v5  ;;  %v9397_v45 = vcombine.high %v5993_v5, %v5993_v5 }
 0x358   : > { %v5977_v27 = vsel %vm3449_vm0, %v5939_v36, 0  ;;  %v6009_v46 = vsel %vm3449_vm0, %v5945_v50, 0  ;;  %v6528_v42 = vrot.slane %v6520_v17, %v10651_v23  ;;  %v6535_v60 = vrot.slane %v6521_v13, %v10651_v23  ;;  %v6355_v17 = vpop.permute.xlu0 %6354  ;;  %v12626_v13 = vld [vmem:[#allocation32_spill] sm:$0xff] }
 0x359   : > { %v9380_v9 = vcombine.low %v5977_v27, %v5977_v27  ;;  %v9381_v40 = vcombine.high %v5977_v27, %v5977_v27  ;;  %v9412_v53 = vcombine.low %v6009_v46, %v6009_v46  ;;  %v9413_v1 = vcombine.high %v6009_v46, %v6009_v46  ;;  %6248 = vst [vmem:[%s10853_s14 + $0x38] sm:$0xf] %v9364_v28 }
 0x35a   : > { %6249 = vst [vmem:[%s10853_s14 + $0x3c] sm:$0xf] %v9365_v8  ;;  %6280 = vst [vmem:[%s10853_s14 + $0xb8] sm:$0xf] %v9396_v61  ;;  %v6536_v39 = vcombine.low %v11832_v38, %v6519_v51  ;;  %v6537_v10 = vcombine.high %v11832_v38, %v6519_v51  ;;  %v6571_v6 = vcombine.high %v6376_v33, %v10642_v37  ;;  %v6446_v30 = vshrl.u32 %v12625_v12, 16 }
 0x35b   : > { %6281 = vst [vmem:[%s10853_s14 + $0xbc] sm:$0xf] %v9397_v45  ;;  %6264 = vst [vmem:[%s10853_s14 + $0x78] sm:$0xf] %v9380_v9  ;;  %v6578_v58 = vrot.slane %v6376_v33, %v10645_v35  ;;  %v7546_v25 = vcombine.low %v6528_v42, %v6535_v60  ;;  %v9414_v19 = vcombine.high %v6528_v42, %v6535_v60  ;;  %v6447_v7 = vshrl.u32 %v6333_v22, 16  ;;  %v11942_v9 = vpop.permute.xlu1 %6348  ;;  %v12627_v60 = vld [vmem:[#allocation35_spill] sm:$0xff] }
 0x35c   : > { %6265 = vst [vmem:[%s10853_s14 + $0x7c] sm:$0xf] %v9381_v40  ;;  %6296 = vst [vmem:[%s10853_s14 + $0xf8] sm:$0xf] %v9412_v53  ;;  %v6544_v32 = vrot.slane %v6536_v39, %v10651_v23  ;;  %v6551_v38 = vrot.slane %v6537_v10, %v10651_v23  ;;  %v6585_v21 = vrot.slane %v6571_v6, %v10645_v35  ;;  %v6438_v53 = vshrl.u32 %v12626_v13, 16 }
 0x35d   : > { %6297 = vst [vmem:[%s10853_s14 + $0xfc] sm:$0xf] %v9413_v1  ;;  %v6586_v52 = vcombine.low %v11838_v34, %v6578_v58  ;;  %v6587_v43 = vcombine.high %v11838_v34, %v6578_v58  ;;  %v7553_v57 = vrot.slane %v7546_v25, %v10645_v35  ;;  %v7561_v62 = vrot.slane %v9414_v19, %v10645_v35 }
 0x35e   : > { %v6602_v11 = vcombine.low %v11847_v15, %v6585_v21  ;;  %v6603_v48 = vcombine.high %v11847_v15, %v6585_v21  ;;  %v7562_v41 = vcombine.low %v6544_v32, %v6551_v38  ;;  %v9415_v59 = vcombine.high %v6544_v32, %v6551_v38 }
 0x35f   : > { %v6594_v55 = vrot.slane %v6586_v52, %v10651_v23  ;;  %v6601_v29 = vrot.slane %v6587_v43, %v10651_v23  ;;  %v11917_v2 = vpack.i.b16 %v6333_v22, %v12625_v12  ;;  %v7578_v20 = vcombine.low %v7553_v57, %v7561_v62 }
 0x360   : > { %v6610_v0 = vrot.slane %v6602_v11, %v10651_v23  ;;  %v6617_v34 = vrot.slane %v6603_v48, %v10651_v23  ;;  %v7569_v16 = vrot.slane %v7562_v41, %v10645_v35  ;;  %v7577_v15 = vrot.slane %v9415_v59, %v10645_v35 }
 0x361   : > { %v7596_v49 = vcombine.low %v6594_v55, %v6601_v29  ;;  %v9416_v14 = vcombine.high %v6594_v55, %v6601_v29  ;;  %v11922_v4 = vrot.slane %v11865_v56, %v10645_v35  ;;  %v11925_v24 = vrot.slane %v6688_v44, %v10645_v35 }
 0x362   : > { %v7612_v33 = vcombine.low %v6610_v0, %v6617_v34  ;;  %v9417_v51 = vcombine.high %v6610_v0, %v6617_v34  ;;  %v7586_v36 = vcombine.low %v7569_v16, %v7577_v15  ;;  %v11929_v5 = vpack.i.b16 %v6447_v7, %v6446_v30 }
 0x363   : > { %v7603_v50 = vrot.slane %v7596_v49, %v10645_v35  ;;  %v7611_v63 = vrot.slane %v9416_v14, %v10645_v35  ;;  %v7150_v56 = vcombine.high %v11917_v2, %v10642_v37  ;;  %v11937_v61 = vrot.slane %v11917_v2, %v10645_v35 }
 0x364   : > { %v7619_v28 = vrot.slane %v7612_v33, %v10645_v35  ;;  %v7627_v8 = vrot.slane %v9417_v51, %v10645_v35  ;;  %v7585_v45 = vrot.slane %v7578_v20, %v10651_v23  ;;  %v7593_v27 = vrot.slane %v7586_v36, %v10651_v23 }
 0x365   : > { %v7628_v46 = vcombine.low %v7603_v50, %v7611_v63  ;;  %v6436_v42 = vpack.i.b16 %v6355_v17, %v12626_v13  ;;  %v6439_v1 = vshrl.u32 %v6355_v17, 16  ;;  %v6390_v39 = vshrl.u32 %v12627_v60, 16 }
 0x366   : > { %v7636_v40 = vcombine.low %v7619_v28, %v7627_v8  ;;  %v7594_v10 = vcombine.low %v7585_v45, %v7593_v27  ;;  %v7595_v6 = vcombine.high %v7585_v45, %v7593_v27  ;;  %v11952_v32 = vpack.i.b16 %v11942_v9, %v12627_v60 }
 0x367   : > { %v7635_v22 = vrot.slane %v7628_v46, %v10651_v23  ;;  %v7033_v44 = vcombine.high %v6436_v42, %v10642_v37  ;;  %v6440_v12 = vpack.i.b16 %v6439_v1, %v6438_v53  ;;  %v7040_v30 = vrot.slane %v6436_v42, %v10645_v35 }
 0x368   : > { %v7643_v58 = vrot.slane %v7636_v40, %v10651_v23  ;;  %v8349_v38 = vshrl.u32 %v7594_v10, 16  ;;  %v8355_v21 = vshrl.u32 %v7595_v6, 16  ;;  %v6391_v52 = vshrl.u32 %v11942_v9, 16 }
 0x369   : > { %v7047_v25 = vrot.slane %v7033_v44, %v10645_v35  ;;  %v7048_v7 = vcombine.low %v11851_v26, %v7040_v30  ;;  %v7049_v11 = vcombine.high %v11851_v26, %v7040_v30  ;;  %v7099_v41 = vcombine.high %v6440_v12, %v10642_v37 }
 0x36a   : > { %v7644_v43 = vcombine.low %v7635_v22, %v7643_v58  ;;  %v7645_v19 = vcombine.high %v7635_v22, %v7643_v58  ;;  %v7106_v55 = vrot.slane %v6440_v12, %v10645_v35  ;;  %v6392_v12 = vpack.i.b16 %v6391_v52, %v6390_v39 }
 0x36b   : > { %v7064_v48 = vcombine.low %v11857_v31, %v7047_v25  ;;  %v7065_v57 = vcombine.high %v11857_v31, %v7047_v25  ;;  %v7056_v34 = vrot.slane %v7048_v7, %v10651_v23  ;;  %v7063_v16 = vrot.slane %v7049_v11, %v10651_v23 }
 0x36c   : > { %v8348_v29 = vpack.i.b16 %v7644_v43, %v7594_v10  ;;  %v8350_v62 = vshrl.u32 %v7644_v43, 16  ;;  %v8354_v59 = vpack.i.b16 %v7645_v19, %v7595_v6  ;;  %v8356_v0 = vshrl.u32 %v7645_v19, 16 }
 0x36d   : > { %v7072_v15 = vrot.slane %v7064_v48, %v10651_v23  ;;  %v7079_v26 = vrot.slane %v7065_v57, %v10651_v23  ;;  %v7113_v28 = vrot.slane %v7099_v41, %v10645_v35  ;;  %v7114_v8 = vcombine.low %v11860_v47, %v7106_v55 }
 0x36e   : > { %v8351_v20 = vpack.i.b16 %v8350_v62, %v8349_v38  ;;  %v8357_v49 = vpack.i.b16 %v8356_v0, %v8355_v21  ;;  %v8443_v31 = vsel %vm3449_vm0, %v8348_v29, 0  ;;  %v8475_v14 = vsel %vm3449_vm0, %v8354_v59, 0 }
 0x36f   : > { %v9446_v33 = vcombine.low %v8443_v31, %v8443_v31  ;;  %v9447_v51 = vcombine.high %v8443_v31, %v8443_v31  ;;  %v9478_v17 = vcombine.low %v8475_v14, %v8475_v14  ;;  %v9479_v36 = vcombine.high %v8475_v14, %v8475_v14 }
 0x370   : > { %v8459_v50 = vsel %vm3449_vm0, %v8351_v20, 0  ;;  %v8491_v63 = vsel %vm3449_vm0, %v8357_v49, 0  ;;  %v7115_v42 = vcombine.high %v11860_v47, %v7106_v55  ;;  %v7122_v9 = vrot.slane %v7114_v8, %v10651_v23 }
 0x371   : > { %v9462_v45 = vcombine.low %v8459_v50, %v8459_v50  ;;  %v9463_v27 = vcombine.high %v8459_v50, %v8459_v50  ;;  %v9494_v46 = vcombine.low %v8491_v63, %v8491_v63  ;;  %v9495_v13 = vcombine.high %v8491_v63, %v8491_v63  ;;  %8730 = vst [vmem:[%s11973_s27] sm:$0xf] %v9446_v33 }
 0x372   : > { %8731 = vst [vmem:[%s11973_s27 + $0x4] sm:$0xf] %v9447_v51  ;;  %8762 = vst [vmem:[%s11973_s27 + $0x80] sm:$0xf] %v9478_v17  ;;  %v7130_v40 = vcombine.low %v11863_v3, %v7113_v28  ;;  %v7131_v53 = vcombine.high %v11863_v3, %v7113_v28  ;;  %v7946_v1 = vcombine.low %v7056_v34, %v7063_v16 }
 0x373   : > { %8763 = vst [vmem:[%s11973_s27 + $0x84] sm:$0xf] %v9479_v36  ;;  %8746 = vst [vmem:[%s11973_s27 + $0x40] sm:$0xf] %v9462_v45  ;;  %v9430_v10 = vcombine.high %v7056_v34, %v7063_v16  ;;  %v7962_v6 = vcombine.low %v7072_v15, %v7079_v26  ;;  %v9431_v22 = vcombine.high %v7072_v15, %v7079_v26 }
 0x374   : > { %8747 = vst [vmem:[%s11973_s27 + $0x44] sm:$0xf] %v9463_v27  ;;  %8778 = vst [vmem:[%s11973_s27 + $0xc0] sm:$0xf] %v9494_v46  ;;  %v7129_v44 = vrot.slane %v7115_v42, %v10651_v23  ;;  %v7138_v58 = vrot.slane %v7130_v40, %v10651_v23  ;;  %v7145_v47 = vrot.slane %v7131_v53, %v10651_v23 }
 0x375   : > { %8779 = vst [vmem:[%s11973_s27 + $0xc4] sm:$0xf] %v9495_v13  ;;  %v7953_v30 = vrot.slane %v7946_v1, %v10645_v35  ;;  %v7961_v3 = vrot.slane %v9430_v10, %v10645_v35  ;;  %v7969_v38 = vrot.slane %v7962_v6, %v10645_v35  ;;  %v7977_v21 = vrot.slane %v9431_v22, %v10645_v35 }
 0x376   : > { %v7996_v25 = vcombine.low %v7122_v9, %v7129_v44  ;;  %v9432_v43 = vcombine.high %v7122_v9, %v7129_v44  ;;  %v8012_v19 = vcombine.low %v7138_v58, %v7145_v47  ;;  %v9433_v7 = vcombine.high %v7138_v58, %v7145_v47 }
 0x377   : > { %v7978_v11 = vcombine.low %v7953_v30, %v7961_v3  ;;  %v7986_v48 = vcombine.low %v7969_v38, %v7977_v21  ;;  %v6637_v57 = vcombine.high %v11952_v32, %v10642_v37  ;;  %v6644_v60 = vrot.slane %v11952_v32, %v10645_v35 }
 0x378   : > { %v8003_v39 = vrot.slane %v7996_v25, %v10645_v35  ;;  %v8011_v52 = vrot.slane %v9432_v43, %v10645_v35  ;;  %v8019_v41 = vrot.slane %v8012_v19, %v10645_v35  ;;  %v8027_v55 = vrot.slane %v9433_v7, %v10645_v35 }
 0x379   : > { %v7985_v29 = vrot.slane %v7978_v11, %v10651_v23  ;;  %v7993_v62 = vrot.slane %v7986_v48, %v10651_v23  ;;  %v6651_v59 = vrot.slane %v6637_v57, %v10645_v35  ;;  %v6652_v0 = vcombine.low %v11873_v54, %v6644_v60 }
 0x37a   : > { %v8028_v34 = vcombine.low %v8003_v39, %v8011_v52  ;;  %v8036_v16 = vcombine.low %v8019_v41, %v8027_v55  ;;  %v6653_v32 = vcombine.high %v11873_v54, %v6644_v60  ;;  %v6703_v15 = vcombine.high %v6392_v12, %v10642_v37 }
 0x37b   : > { %v7994_v26 = vcombine.low %v7985_v29, %v7993_v62  ;;  %v7995_v20 = vcombine.high %v7985_v29, %v7993_v62  ;;  %v6660_v49 = vrot.slane %v6652_v0, %v10651_v23  ;;  %v6668_v31 = vcombine.low %v11896_v18, %v6651_v59  ;;  %v6327_v0 = vpop.permute.xlu0 %6326 }
 0x37c   : > { %v8035_v14 = vrot.slane %v8028_v34, %v10651_v23  ;;  %v8043_v33 = vrot.slane %v8036_v16, %v10651_v23  ;;  %v6667_v51 = vrot.slane %v6653_v32, %v10651_v23  ;;  %v6669_v17 = vcombine.high %v11896_v18, %v6651_v59 }
 0x37d   : > { %v8397_v36 = vshrl.u32 %v7994_v26, 16  ;;  %v8403_v50 = vshrl.u32 %v7995_v20, 16  ;;  %v6676_v54 = vrot.slane %v6668_v31, %v10651_v23  ;;  %v6710_v63 = vrot.slane %v6392_v12, %v10645_v35 }
 0x37e   : > { %v8044_v28 = vcombine.low %v8035_v14, %v8043_v33  ;;  %v8045_v8 = vcombine.high %v8035_v14, %v8043_v33  ;;  %v6683_v45 = vrot.slane %v6669_v17, %v10651_v23  ;;  %v6717_v27 = vrot.slane %v6703_v15, %v10645_v35 }
 0x37f   : > { %v6718_v46 = vcombine.low %v11922_v4, %v6710_v63  ;;  %v6719_v13 = vcombine.high %v11922_v4, %v6710_v63  ;;  %v7646_v42 = vcombine.low %v6660_v49, %v6667_v51  ;;  %v9418_v9 = vcombine.high %v6660_v49, %v6667_v51  ;;  %v12628_v63 = vld [vmem:[#allocation37_spill] sm:$0xff] }
 0x380   : > { %v8396_v18 = vpack.i.b16 %v8044_v28, %v7994_v26  ;;  %v8398_v40 = vshrl.u32 %v8044_v28, 16  ;;  %v8402_v53 = vpack.i.b16 %v8045_v8, %v7995_v20  ;;  %v8404_v1 = vshrl.u32 %v8045_v8, 16  ;;  %v6357_v26 = vpop.permute.xlu1 %6356  ;;  %v12629_v8 = vld [vmem:[#allocation36_spill] sm:$0xff] }
 0x381   : > { %v6726_v10 = vrot.slane %v6718_v46, %v10651_v23  ;;  %v6733_v6 = vrot.slane %v6719_v13, %v10651_v23  ;;  %v6734_v22 = vcombine.low %v11925_v24, %v6717_v27  ;;  %v6735_v44 = vcombine.high %v11925_v24, %v6717_v27 }
 0x382   : > { %v8399_v58 = vpack.i.b16 %v8398_v40, %v8397_v36  ;;  %v8405_v47 = vpack.i.b16 %v8404_v1, %v8403_v50  ;;  %v8451_v4 = vsel %vm3449_vm0, %v8396_v18, 0  ;;  %v8483_v12 = vsel %vm3449_vm0, %v8402_v53, 0 }
 0x383   : > { %v9454_v30 = vcombine.low %v8451_v4, %v8451_v4  ;;  %v9455_v3 = vcombine.high %v8451_v4, %v8451_v4  ;;  %v9486_v38 = vcombine.low %v8483_v12, %v8483_v12  ;;  %v9487_v21 = vcombine.high %v8483_v12, %v8483_v12 }
 0x384   : > { %v8467_v25 = vsel %vm3449_vm0, %v8399_v58, 0  ;;  %v8499_v43 = vsel %vm3449_vm0, %v8405_v47, 0  ;;  %v6742_v24 = vrot.slane %v6734_v22, %v10651_v23  ;;  %v6749_v19 = vrot.slane %v6735_v44, %v10651_v23 }
 0x385   : > { %v9470_v7 = vcombine.low %v8467_v25, %v8467_v25  ;;  %v9471_v11 = vcombine.high %v8467_v25, %v8467_v25  ;;  %v9502_v48 = vcombine.low %v8499_v43, %v8499_v43  ;;  %v9503_v57 = vcombine.high %v8499_v43, %v8499_v43  ;;  %8738 = vst [vmem:[%s11973_s27 + $0x20] sm:$0xf] %v9454_v30 }
 0x386   : > { %8739 = vst [vmem:[%s11973_s27 + $0x24] sm:$0xf] %v9455_v3  ;;  %8770 = vst [vmem:[%s11973_s27 + $0xa0] sm:$0xf] %v9486_v38  ;;  %v7653_v60 = vrot.slane %v7646_v42, %v10645_v35  ;;  %v7661_v39 = vrot.slane %v9418_v9, %v10645_v35  ;;  %v7662_v52 = vcombine.low %v6676_v54, %v6683_v45  ;;  %v6399_v36 = vshrl.u32 %v6327_v0, 16 }
 0x387   : > { %8771 = vst [vmem:[%s11973_s27 + $0xa4] sm:$0xf] %v9487_v21  ;;  %v9419_v41 = vcombine.high %v6676_v54, %v6683_v45  ;;  %8754 = vst [vmem:[%s11973_s27 + $0x60] sm:$0xf] %v9470_v7  ;;  %v7696_v55 = vcombine.low %v6726_v10, %v6733_v6  ;;  %v9420_v29 = vcombine.high %v6726_v10, %v6733_v6  ;;  %v6398_v46 = vshrl.u32 %v12628_v63, 16 }
 0x388   : > { %8755 = vst [vmem:[%s11973_s27 + $0x64] sm:$0xf] %v9471_v11  ;;  %8786 = vst [vmem:[%s11973_s27 + $0xe0] sm:$0xf] %v9502_v48  ;;  %v7712_v62 = vcombine.low %v6742_v24, %v6749_v19  ;;  %v9421_v59 = vcombine.high %v6742_v24, %v6749_v19  ;;  %v7216_v34 = vcombine.high %v11929_v5, %v10642_v37  ;;  %v6454_v42 = vshrl.u32 %v12629_v8, 16 }
 0x389   : > { %8787 = vst [vmem:[%s11973_s27 + $0xe4] sm:$0xf] %v9503_v57  ;;  %v7669_v16 = vrot.slane %v7662_v52, %v10645_v35  ;;  %v7677_v32 = vrot.slane %v9419_v41, %v10645_v35  ;;  %v7678_v15 = vcombine.low %v7653_v60, %v7661_v39  ;;  %v7703_v20 = vrot.slane %v7696_v55, %v10645_v35 }
 0x38a   : > { %v7711_v49 = vrot.slane %v9420_v29, %v10645_v35  ;;  %v7719_v31 = vrot.slane %v7712_v62, %v10645_v35  ;;  %v7727_v14 = vrot.slane %v9421_v59, %v10645_v35  ;;  %v12055_v33 = vrot.slane %v7150_v56, %v10645_v35  ;;  %v6335_v59 = vpop.permute.xlu0 %6334 }
 0x38b   : > { %v12059_v51 = vrot.slane %v11929_v5, %v10645_v35  ;;  %v7686_v17 = vcombine.low %v7669_v16, %v7677_v32  ;;  %v12062_v28 = vpack.i.b16 %v6327_v0, %v12628_v63  ;;  %v6452_v45 = vpack.i.b16 %v6357_v26, %v12629_v8 }
 0x38c   : > { %v7728_v50 = vcombine.low %v7703_v20, %v7711_v49  ;;  %v7736_v54 = vcombine.low %v7719_v31, %v7727_v14  ;;  %v12066_v27 = vrot.slane %v7216_v34, %v10645_v35  ;;  %v7685_v2 = vrot.slane %v7678_v15, %v10651_v23 }
 0x38d   : > { %v7693_v56 = vrot.slane %v7686_v17, %v10651_v23  ;;  %v6455_v9 = vshrl.u32 %v6357_v26, 16  ;;  %v12074_v53 = vpack.i.b16 %v6399_v36, %v6398_v46  ;;  %v7165_v1 = vcombine.high %v6452_v45, %v10642_v37  ;;  %v12630_v17 = vld [vmem:[#allocation38_spill] sm:$0xff] }
 0x38e   : > { %v7735_v5 = vrot.slane %v7728_v50, %v10651_v23  ;;  %v7743_v13 = vrot.slane %v7736_v54, %v10651_v23  ;;  %v6754_v22 = vcombine.high %v12062_v28, %v10642_v37  ;;  %v12081_v4 = vrot.slane %v12062_v28, %v10645_v35 }
 0x38f   : > { %v7694_v18 = vcombine.low %v7685_v2, %v7693_v56  ;;  %v7695_v40 = vcombine.high %v7685_v2, %v7693_v56  ;;  %v6456_v44 = vpack.i.b16 %v6455_v9, %v6454_v42  ;;  %v7172_v12 = vrot.slane %v6452_v45, %v10645_v35 }
 0x390   : > { %v7744_v10 = vcombine.low %v7735_v5, %v7743_v13  ;;  %v7745_v6 = vcombine.high %v7735_v5, %v7743_v13  ;;  %v7179_v25 = vrot.slane %v7165_v1, %v10645_v35  ;;  %v6462_v36 = vshrl.u32 %v12630_v17, 16 }
 0x391   : > { %v8361_v58 = vshrl.u32 %v7694_v18, 16  ;;  %v8367_v47 = vshrl.u32 %v7695_v40, 16  ;;  %v7180_v43 = vcombine.low %v11937_v61, %v7172_v12  ;;  %v7181_v24 = vcombine.high %v11937_v61, %v7172_v12 }
 0x392   : > { %v8360_v30 = vpack.i.b16 %v7744_v10, %v7694_v18  ;;  %v8362_v3 = vshrl.u32 %v7744_v10, 16  ;;  %v8366_v38 = vpack.i.b16 %v7745_v6, %v7695_v40  ;;  %v8368_v21 = vshrl.u32 %v7745_v6, 16 }
 0x393   : > { %v7231_v19 = vcombine.high %v6456_v44, %v10642_v37  ;;  %v7188_v29 = vrot.slane %v7180_v43, %v10651_v23  ;;  %v7195_v62 = vrot.slane %v7181_v24, %v10651_v23  ;;  %v7196_v15 = vcombine.low %v12055_v33, %v7179_v25  ;;  %v6329_v43 = vpop.permute.xlu1 %6328 }
 0x394   : > { %v8363_v7 = vpack.i.b16 %v8362_v3, %v8361_v58  ;;  %v8369_v11 = vpack.i.b16 %v8368_v21, %v8367_v47  ;;  %v8445_v48 = vsel %vm3449_vm0, %v8360_v30, 0  ;;  %v8477_v57 = vsel %vm3449_vm0, %v8366_v38, 0 }
 0x395   : > { %v9448_v60 = vcombine.low %v8445_v48, %v8445_v48  ;;  %v9449_v39 = vcombine.high %v8445_v48, %v8445_v48  ;;  %v9480_v52 = vcombine.low %v8477_v57, %v8477_v57  ;;  %v9481_v41 = vcombine.high %v8477_v57, %v8477_v57 }
 0x396   : > { %v8461_v55 = vsel %vm3449_vm0, %v8363_v7, 0  ;;  %v8493_v61 = vsel %vm3449_vm0, %v8369_v11, 0  ;;  %v7197_v26 = vcombine.high %v12055_v33, %v7179_v25  ;;  %v7238_v20 = vrot.slane %v6456_v44, %v10645_v35 }
 0x397   : > { %v9464_v0 = vcombine.low %v8461_v55, %v8461_v55  ;;  %v9465_v34 = vcombine.high %v8461_v55, %v8461_v55  ;;  %v9496_v16 = vcombine.low %v8493_v61, %v8493_v61  ;;  %v9497_v32 = vcombine.high %v8493_v61, %v8493_v61  ;;  %8732 = vst [vmem:[%s11973_s27 + $0x8] sm:$0xf] %v9448_v60  ;;  %v6351_v61 = vpop.permute.xlu0 %6350 }
 0x398   : > { %8733 = vst [vmem:[%s11973_s27 + $0xc] sm:$0xf] %v9449_v39  ;;  %8764 = vst [vmem:[%s11973_s27 + $0x88] sm:$0xf] %v9480_v52  ;;  %v7245_v49 = vrot.slane %v7231_v19, %v10645_v35  ;;  %v8046_v31 = vcombine.low %v7188_v29, %v7195_v62  ;;  %v9434_v14 = vcombine.high %v7188_v29, %v7195_v62 }
 0x399   : > { %8765 = vst [vmem:[%s11973_s27 + $0x8c] sm:$0xf] %v9481_v41  ;;  %8748 = vst [vmem:[%s11973_s27 + $0x48] sm:$0xf] %v9464_v0  ;;  %v6460_v50 = vpack.i.b16 %v6335_v59, %v12630_v17  ;;  %v7204_v54 = vrot.slane %v7196_v15, %v10651_v23  ;;  %v7211_v63 = vrot.slane %v7197_v26, %v10651_v23  ;;  %v12631_v41 = vld [vmem:[#allocation41_spill] sm:$0xff]  ;;  %v6415_v15 = vshrl.u32 %v6329_v43, 16 }
 0x39a   : > { %8749 = vst [vmem:[%s11973_s27 + $0x4c] sm:$0xf] %v9465_v34  ;;  %8780 = vst [vmem:[%s11973_s27 + $0xc8] sm:$0xf] %v9496_v16  ;;  %v7246_v33 = vcombine.low %v12059_v51, %v7238_v20  ;;  %v7247_v8 = vcombine.high %v12059_v51, %v7238_v20  ;;  %v7262_v45 = vcombine.low %v12066_v27, %v7245_v49  ;;  %v6463_v51 = vshrl.u32 %v6335_v59, 16 }
 0x39b   : > { %8781 = vst [vmem:[%s11973_s27 + $0xcc] sm:$0xf] %v9497_v32  ;;  %v7263_v2 = vcombine.high %v12066_v27, %v7245_v49  ;;  %v8053_v56 = vrot.slane %v8046_v31, %v10645_v35  ;;  %v8061_v46 = vrot.slane %v9434_v14, %v10645_v35  ;;  %v8062_v42 = vcombine.low %v7204_v54, %v7211_v63  ;;  %v12632_v49 = vld [vmem:[#allocation39_spill] sm:$0xff] }
 0x39c   : > { %v7254_v5 = vrot.slane %v7246_v33, %v10651_v23  ;;  %v7261_v13 = vrot.slane %v7247_v8, %v10651_v23  ;;  %v9435_v9 = vcombine.high %v7204_v54, %v7211_v63  ;;  %v7270_v18 = vrot.slane %v7262_v45, %v10651_v23 }
 0x39d   : > { %v7277_v40 = vrot.slane %v7263_v2, %v10651_v23  ;;  %v8078_v1 = vcombine.low %v8053_v56, %v8061_v46  ;;  %v8069_v10 = vrot.slane %v8062_v42, %v10645_v35  ;;  %v6820_v58 = vcombine.high %v12074_v53, %v10642_v37 }
 0x39e   : > { %v8077_v27 = vrot.slane %v9435_v9, %v10645_v35  ;;  %v8096_v6 = vcombine.low %v7254_v5, %v7261_v13  ;;  %v9436_v44 = vcombine.high %v7254_v5, %v7261_v13  ;;  %v6464_v30 = vpack.i.b16 %v6463_v51, %v6462_v36 }
 0x39f   : > { %v8112_v47 = vcombine.low %v7270_v18, %v7277_v40  ;;  %v9437_v12 = vcombine.high %v7270_v18, %v7277_v40  ;;  %v7282_v25 = vcombine.high %v6460_v50, %v10642_v37  ;;  %v12131_v24 = vrot.slane %v6754_v22, %v10645_v35 }
 0x3a0   : > { %v8086_v3 = vcombine.low %v8069_v10, %v8077_v27  ;;  %v8103_v38 = vrot.slane %v8096_v6, %v10645_v35  ;;  %v8111_v21 = vrot.slane %v9436_v44, %v10645_v35  ;;  %v7348_v11 = vcombine.high %v6464_v30, %v10642_v37 }
 0x3a1   : > { %v8119_v19 = vrot.slane %v8112_v47, %v10645_v35  ;;  %v8127_v7 = vrot.slane %v9437_v12, %v10645_v35  ;;  %v12138_v48 = vrot.slane %v12074_v53, %v10645_v35  ;;  %v8085_v57 = vrot.slane %v8078_v1, %v10651_v23 }
 0x3a2   : > { %v8093_v60 = vrot.slane %v8086_v3, %v10651_v23  ;;  %v8128_v39 = vcombine.low %v8103_v38, %v8111_v21  ;;  %v12143_v52 = vrot.slane %v6820_v58, %v10645_v35  ;;  %v12146_v22 = vrot.slane %v6460_v50, %v10645_v35 }
 0x3a3   : > { %v8136_v28 = vcombine.low %v8119_v19, %v8127_v7  ;;  %v6412_v55 = vpack.i.b16 %v6329_v43, %v12631_v41  ;;  %v12150_v53 = vrot.slane %v7282_v25, %v10645_v35  ;;  %v12153_v59 = vrot.slane %v6464_v30, %v10645_v35 }
 0x3a4   : > { %v8094_v29 = vcombine.low %v8085_v57, %v8093_v60  ;;  %v8095_v62 = vcombine.high %v8085_v57, %v8093_v60  ;;  %v8135_v0 = vrot.slane %v8128_v39, %v10651_v23  ;;  %v12158_v16 = vrot.slane %v7348_v11, %v10645_v35  ;;  %v6337_v11 = vpop.permute.xlu1 %6336 }
 0x3a5   : > { %v8143_v34 = vrot.slane %v8136_v28, %v10651_v23  ;;  %v6414_v32 = vshrl.u32 %v12631_v41, 16  ;;  %v6886_v26 = vcombine.high %v6412_v55, %v10642_v37  ;;  %v12163_v20 = vrot.slane %v6412_v55, %v10645_v35  ;;  %v12633_v28 = vld [vmem:[#allocation42_spill] sm:$0xff] }
 0x3a6   : > { %v6404_v31 = vpack.i.b16 %v6351_v61, %v12632_v49  ;;  %v6406_v36 = vshrl.u32 %v12632_v49, 16  ;;  %v6407_v50 = vshrl.u32 %v6351_v61, 16  ;;  %v8409_v54 = vshrl.u32 %v8094_v29, 16 }
 0x3a7   : > { %v8144_v14 = vcombine.low %v8135_v0, %v8143_v34  ;;  %v8145_v17 = vcombine.high %v8135_v0, %v8143_v34  ;;  %v8415_v63 = vshrl.u32 %v8095_v62, 16  ;;  %v12169_v5 = vpack.i.b16 %v6415_v15, %v6414_v32 }
 0x3a8   : > { %v6769_v33 = vcombine.high %v6404_v31, %v10642_v37  ;;  %v6776_v8 = vrot.slane %v6404_v31, %v10645_v35  ;;  %v6408_v13 = vpack.i.b16 %v6407_v50, %v6406_v36  ;;  %v12192_v57 = vrot.slane %v6886_v26, %v10645_v35 }
 0x3a9   : > { %v8408_v45 = vpack.i.b16 %v8144_v14, %v8094_v29  ;;  %v8410_v2 = vshrl.u32 %v8144_v14, 16  ;;  %v8414_v56 = vpack.i.b16 %v8145_v17, %v8095_v62  ;;  %v8416_v46 = vshrl.u32 %v8145_v17, 16 }
 0x3aa   : > { %v6783_v42 = vrot.slane %v6769_v33, %v10645_v35  ;;  %v6784_v9 = vcombine.low %v12081_v4, %v6776_v8  ;;  %v6785_v12 = vcombine.high %v12081_v4, %v6776_v8  ;;  %v6835_v4 = vcombine.high %v6408_v13, %v10642_v37 }
 0x3ab   : > { %v8411_v18 = vpack.i.b16 %v8410_v2, %v8409_v54  ;;  %v8417_v40 = vpack.i.b16 %v8416_v46, %v8415_v63  ;;  %v8453_v1 = vsel %vm3449_vm0, %v8408_v45, 0  ;;  %v8485_v51 = vsel %vm3449_vm0, %v8414_v56, 0 }
 0x3ac   : > { %v9456_v10 = vcombine.low %v8453_v1, %v8453_v1  ;;  %v9457_v27 = vcombine.high %v8453_v1, %v8453_v1  ;;  %v9488_v6 = vcombine.low %v8485_v51, %v8485_v51  ;;  %v9489_v44 = vcombine.high %v8485_v51, %v8485_v51 }
 0x3ad   : > { %v8469_v58 = vsel %vm3449_vm0, %v8411_v18, 0  ;;  %v8501_v47 = vsel %vm3449_vm0, %v8417_v40, 0  ;;  %v6792_v30 = vrot.slane %v6784_v9, %v10651_v23  ;;  %v6799_v43 = vrot.slane %v6785_v12, %v10651_v23  ;;  %v6359_v9 = vpop.permute.xlu0 %6358  ;;  %v12634_v12 = vld [vmem:[#allocation40_spill] sm:$0xff] }
 0x3ae   : > { %v9472_v3 = vcombine.low %v8469_v58, %v8469_v58  ;;  %v9473_v38 = vcombine.high %v8469_v58, %v8469_v58  ;;  %v9504_v21 = vcombine.low %v8501_v47, %v8501_v47  ;;  %v9505_v25 = vcombine.high %v8501_v47, %v8501_v47  ;;  %8740 = vst [vmem:[%s11973_s27 + $0x28] sm:$0xf] %v9456_v10 }
 0x3af   : > { %8741 = vst [vmem:[%s11973_s27 + $0x2c] sm:$0xf] %v9457_v27  ;;  %8772 = vst [vmem:[%s11973_s27 + $0xa8] sm:$0xf] %v9488_v6  ;;  %v6800_v19 = vcombine.low %v12131_v24, %v6783_v42  ;;  %v6801_v7 = vcombine.high %v12131_v24, %v6783_v42  ;;  %v6952_v60 = vcombine.high %v12169_v5, %v10642_v37  ;;  %v6478_v41 = vshrl.u32 %v12633_v28, 16 }
 0x3b0   : > { %8773 = vst [vmem:[%s11973_s27 + $0xac] sm:$0xf] %v9489_v44  ;;  %8756 = vst [vmem:[%s11973_s27 + $0x68] sm:$0xf] %v9472_v3  ;;  %v6842_v39 = vrot.slane %v6408_v13, %v10645_v35  ;;  %v6849_v61 = vrot.slane %v6835_v4, %v10645_v35  ;;  %v7746_v29 = vcombine.low %v6792_v30, %v6799_v43  ;;  %v6479_v32 = vshrl.u32 %v6337_v11, 16  ;;  %v12238_v3 = vpop.permute.xlu1 %6352 }
 0x3b1   : > { %8757 = vst [vmem:[%s11973_s27 + $0x6c] sm:$0xf] %v9473_v38  ;;  %8788 = vst [vmem:[%s11973_s27 + $0xe8] sm:$0xf] %v9504_v21  ;;  %v6808_v55 = vrot.slane %v6800_v19, %v10651_v23  ;;  %v6815_v24 = vrot.slane %v6801_v7, %v10651_v23  ;;  %v9422_v34 = vcombine.high %v6792_v30, %v6799_v43  ;;  %v6470_v21 = vshrl.u32 %v12634_v12, 16  ;;  %v12635_v43 = vld [vmem:[#allocation43_spill] sm:$0xff] }
 0x3b2   : > { %8789 = vst [vmem:[%s11973_s27 + $0xec] sm:$0xf] %v9505_v25  ;;  %v6850_v62 = vcombine.low %v12138_v48, %v6842_v39  ;;  %v6851_v0 = vcombine.high %v12138_v48, %v6842_v39  ;;  %v6866_v15 = vcombine.low %v12143_v52, %v6849_v61  ;;  %v6867_v26 = vcombine.high %v12143_v52, %v6849_v61 }
 0x3b3   : > { %v7753_v49 = vrot.slane %v7746_v29, %v10645_v35  ;;  %v7762_v31 = vcombine.low %v6808_v55, %v6815_v24  ;;  %v7761_v36 = vrot.slane %v9422_v34, %v10645_v35  ;;  %v9423_v50 = vcombine.high %v6808_v55, %v6815_v24 }
 0x3b4   : > { %v6858_v14 = vrot.slane %v6850_v62, %v10651_v23  ;;  %v6865_v17 = vrot.slane %v6851_v0, %v10651_v23  ;;  %v6874_v54 = vrot.slane %v6866_v15, %v10651_v23  ;;  %v6881_v48 = vrot.slane %v6867_v26, %v10651_v23 }
 0x3b5   : > { %v7769_v63 = vrot.slane %v7762_v31, %v10645_v35  ;;  %v12213_v33 = vpack.i.b16 %v6337_v11, %v12633_v28  ;;  %v7777_v52 = vrot.slane %v9423_v50, %v10645_v35  ;;  %v7778_v8 = vcombine.low %v7753_v49, %v7761_v36 }
 0x3b6   : > { %v7796_v45 = vcombine.low %v6858_v14, %v6865_v17  ;;  %v9424_v2 = vcombine.high %v6858_v14, %v6865_v17  ;;  %v12218_v56 = vrot.slane %v12169_v5, %v10645_v35  ;;  %v12221_v46 = vrot.slane %v6952_v60, %v10645_v35 }
 0x3b7   : > { %v7812_v13 = vcombine.low %v6874_v54, %v6881_v48  ;;  %v9425_v42 = vcombine.high %v6874_v54, %v6881_v48  ;;  %v7786_v18 = vcombine.low %v7769_v63, %v7777_v52  ;;  %v12225_v51 = vpack.i.b16 %v6479_v32, %v6478_v41 }
 0x3b8   : > { %v7803_v40 = vrot.slane %v7796_v45, %v10645_v35  ;;  %v7811_v1 = vrot.slane %v9424_v2, %v10645_v35  ;;  %v7414_v5 = vcombine.high %v12213_v33, %v10642_v37  ;;  %v12233_v6 = vrot.slane %v12213_v33, %v10645_v35 }
 0x3b9   : > { %v7819_v10 = vrot.slane %v7812_v13, %v10645_v35  ;;  %v7827_v27 = vrot.slane %v9425_v42, %v10645_v35  ;;  %v7785_v44 = vrot.slane %v7778_v8, %v10651_v23  ;;  %v7793_v58 = vrot.slane %v7786_v18, %v10651_v23 }
 0x3ba   : > { %v7828_v47 = vcombine.low %v7803_v40, %v7811_v1  ;;  %v6468_v30 = vpack.i.b16 %v6359_v9, %v12634_v12  ;;  %v6471_v25 = vshrl.u32 %v6359_v9, 16  ;;  %v6422_v19 = vshrl.u32 %v12635_v43, 16 }
 0x3bb   : > { %v7836_v38 = vcombine.low %v7819_v10, %v7827_v27  ;;  %v7794_v7 = vcombine.low %v7785_v44, %v7793_v58  ;;  %v7795_v4 = vcombine.high %v7785_v44, %v7793_v58  ;;  %v12248_v55 = vpack.i.b16 %v12238_v3, %v12635_v43 }
 0x3bc   : > { %v7835_v11 = vrot.slane %v7828_v47, %v10651_v23  ;;  %v7297_v60 = vcombine.high %v6468_v30, %v10642_v37  ;;  %v6472_v28 = vpack.i.b16 %v6471_v25, %v6470_v21  ;;  %v7304_v41 = vrot.slane %v6468_v30, %v10645_v35 }
 0x3bd   : > { %v7843_v39 = vrot.slane %v7836_v38, %v10651_v23  ;;  %v8373_v24 = vshrl.u32 %v7794_v7, 16  ;;  %v8379_v61 = vshrl.u32 %v7795_v4, 16  ;;  %v6423_v62 = vshrl.u32 %v12238_v3, 16 }
 0x3be   : > { %v7311_v29 = vrot.slane %v7297_v60, %v10645_v35  ;;  %v7312_v32 = vcombine.low %v12146_v22, %v7304_v41  ;;  %v7313_v15 = vcombine.high %v12146_v22, %v7304_v41  ;;  %v7363_v31 = vcombine.high %v6472_v28, %v10642_v37 }
 0x3bf   : > { %v7844_v0 = vcombine.low %v7835_v11, %v7843_v39  ;;  %v7845_v34 = vcombine.high %v7835_v11, %v7843_v39  ;;  %v7370_v14 = vrot.slane %v6472_v28, %v10645_v35  ;;  %v6424_v28 = vpack.i.b16 %v6423_v62, %v6422_v19 }
 0x3c0   : > { %v7328_v26 = vcombine.low %v12150_v53, %v7311_v29  ;;  %v7329_v49 = vcombine.high %v12150_v53, %v7311_v29  ;;  %v7320_v48 = vrot.slane %v7312_v32, %v10651_v23  ;;  %v7327_v63 = vrot.slane %v7313_v15, %v10651_v23 }
 0x3c1   : > { %v8372_v17 = vpack.i.b16 %v7844_v0, %v7794_v7  ;;  %v8374_v36 = vshrl.u32 %v7844_v0, 16  ;;  %v8378_v50 = vpack.i.b16 %v7845_v34, %v7795_v4  ;;  %v8380_v54 = vshrl.u32 %v7845_v34, 16 }
 0x3c2   : > { %v7336_v52 = vrot.slane %v7328_v26, %v10651_v23  ;;  %v7343_v22 = vrot.slane %v7329_v49, %v10651_v23  ;;  %v7377_v10 = vrot.slane %v7363_v31, %v10645_v35  ;;  %v7378_v27 = vcombine.low %v12153_v59, %v7370_v14 }
 0x3c3   : > { %v8375_v8 = vpack.i.b16 %v8374_v36, %v8373_v24  ;;  %v8381_v45 = vpack.i.b16 %v8380_v54, %v8379_v61  ;;  %v8447_v53 = vsel %vm3449_vm0, %v8372_v17, 0  ;;  %v8479_v2 = vsel %vm3449_vm0, %v8378_v50, 0 }
 0x3c4   : > { %v9450_v13 = vcombine.low %v8447_v53, %v8447_v53  ;;  %v9451_v42 = vcombine.high %v8447_v53, %v8447_v53  ;;  %v9482_v9 = vcombine.low %v8479_v2, %v8479_v2  ;;  %v9483_v18 = vcombine.high %v8479_v2, %v8479_v2 }
 0x3c5   : > { %v8463_v40 = vsel %vm3449_vm0, %v8375_v8, 0  ;;  %v8495_v1 = vsel %vm3449_vm0, %v8381_v45, 0  ;;  %v7379_v30 = vcombine.high %v12153_v59, %v7370_v14  ;;  %v7386_v3 = vrot.slane %v7378_v27, %v10651_v23 }
 0x3c6   : > { %v9466_v44 = vcombine.low %v8463_v40, %v8463_v40  ;;  %v9467_v58 = vcombine.high %v8463_v40, %v8463_v40  ;;  %v9498_v47 = vcombine.low %v8495_v1, %v8495_v1  ;;  %v9499_v12 = vcombine.high %v8495_v1, %v8495_v1  ;;  %8734 = vst [vmem:[%s11973_s27 + $0x10] sm:$0xf] %v9450_v13 }
 0x3c7   : > { %8735 = vst [vmem:[%s11973_s27 + $0x14] sm:$0xf] %v9451_v42  ;;  %8766 = vst [vmem:[%s11973_s27 + $0x90] sm:$0xf] %v9482_v9  ;;  %v7394_v38 = vcombine.low %v12158_v16, %v7377_v10  ;;  %v7395_v21 = vcombine.high %v12158_v16, %v7377_v10  ;;  %v8146_v25 = vcombine.low %v7320_v48, %v7327_v63 }
 0x3c8   : > { %8767 = vst [vmem:[%s11973_s27 + $0x94] sm:$0xf] %v9483_v18  ;;  %8750 = vst [vmem:[%s11973_s27 + $0x50] sm:$0xf] %v9466_v44  ;;  %v9438_v7 = vcombine.high %v7320_v48, %v7327_v63  ;;  %v8162_v4 = vcombine.low %v7336_v52, %v7343_v22  ;;  %v9439_v11 = vcombine.high %v7336_v52, %v7343_v22 }
 0x3c9   : > { %8751 = vst [vmem:[%s11973_s27 + $0x54] sm:$0xf] %v9467_v58  ;;  %8782 = vst [vmem:[%s11973_s27 + $0xd0] sm:$0xf] %v9498_v47  ;;  %v7393_v60 = vrot.slane %v7379_v30, %v10651_v23  ;;  %v7402_v39 = vrot.slane %v7394_v38, %v10651_v23  ;;  %v7409_v59 = vrot.slane %v7395_v21, %v10651_v23 }
 0x3ca   : > { %8783 = vst [vmem:[%s11973_s27 + $0xd4] sm:$0xf] %v9499_v12  ;;  %v8153_v41 = vrot.slane %v8146_v25, %v10645_v35  ;;  %v8161_v16 = vrot.slane %v9438_v7, %v10645_v35  ;;  %v8169_v24 = vrot.slane %v8162_v4, %v10645_v35  ;;  %v8177_v61 = vrot.slane %v9439_v11, %v10645_v35 }
 0x3cb   : > { %v8196_v29 = vcombine.low %v7386_v3, %v7393_v60  ;;  %v9440_v0 = vcombine.high %v7386_v3, %v7393_v60  ;;  %v8212_v34 = vcombine.low %v7402_v39, %v7409_v59  ;;  %v9441_v32 = vcombine.high %v7402_v39, %v7409_v59 }
 0x3cc   : > { %v8178_v15 = vcombine.low %v8153_v41, %v8161_v16  ;;  %v8186_v26 = vcombine.low %v8169_v24, %v8177_v61  ;;  %v6901_v49 = vcombine.high %v12248_v55, %v10642_v37  ;;  %v6908_v43 = vrot.slane %v12248_v55, %v10645_v35 }
 0x3cd   : > { %v8203_v19 = vrot.slane %v8196_v29, %v10645_v35  ;;  %v8211_v62 = vrot.slane %v9440_v0, %v10645_v35  ;;  %v8219_v31 = vrot.slane %v8212_v34, %v10645_v35  ;;  %v8227_v14 = vrot.slane %v9441_v32, %v10645_v35 }
 0x3ce   : > { %v8185_v17 = vrot.slane %v8178_v15, %v10651_v23  ;;  %v8193_v36 = vrot.slane %v8186_v26, %v10651_v23  ;;  %v6915_v50 = vrot.slane %v6901_v49, %v10645_v35  ;;  %v6916_v54 = vcombine.low %v12163_v20, %v6908_v43 }
 0x3cf   : > { %v8228_v48 = vcombine.low %v8203_v19, %v8211_v62  ;;  %v8236_v63 = vcombine.low %v8219_v31, %v8227_v14  ;;  %v6917_v55 = vcombine.high %v12163_v20, %v6908_v43  ;;  %v6967_v52 = vcombine.high %v6424_v28, %v10642_v37 }
 0x3d0   : > { %v8194_v22 = vcombine.low %v8185_v17, %v8193_v36  ;;  %v8195_v8 = vcombine.high %v8185_v17, %v8193_v36  ;;  %v6924_v45 = vrot.slane %v6916_v54, %v10651_v23  ;;  %v6932_v53 = vcombine.low %v12192_v57, %v6915_v50  ;;  %v6361_v54 = vpop.permute.xlu1 %6360 }
 0x3d1   : > { %v8235_v2 = vrot.slane %v8228_v48, %v10651_v23  ;;  %v8243_v13 = vrot.slane %v8236_v63, %v10651_v23  ;;  %v6931_v42 = vrot.slane %v6917_v55, %v10651_v23  ;;  %v6933_v9 = vcombine.high %v12192_v57, %v6915_v50 }
 0x3d2   : > { %v8421_v18 = vshrl.u32 %v8194_v22, 16  ;;  %v8427_v40 = vshrl.u32 %v8195_v8, 16  ;;  %v6940_v20 = vrot.slane %v6932_v53, %v10651_v23  ;;  %v6974_v1 = vrot.slane %v6424_v28, %v10645_v35 }
 0x3d3   : > { %v8244_v10 = vcombine.low %v8235_v2, %v8243_v13  ;;  %v8245_v27 = vcombine.high %v8235_v2, %v8243_v13  ;;  %v6947_v44 = vrot.slane %v6933_v9, %v10651_v23  ;;  %v6981_v58 = vrot.slane %v6967_v52, %v10645_v35  ;;  %v12636_v13 = vld [vmem:[#allocation44_spill] sm:$0xff] }
 0x3d4   : > { %v6982_v47 = vcombine.low %v12218_v56, %v6974_v1  ;;  %v6983_v12 = vcombine.high %v12218_v56, %v6974_v1  ;;  %v7846_v30 = vcombine.low %v6924_v45, %v6931_v42  ;;  %v9426_v3 = vcombine.high %v6924_v45, %v6931_v42 }
 0x3d5   : > { %v8420_v38 = vpack.i.b16 %v8244_v10, %v8194_v22  ;;  %v8422_v57 = vshrl.u32 %v8244_v10, 16  ;;  %v8426_v21 = vpack.i.b16 %v8245_v27, %v8195_v8  ;;  %v8428_v25 = vshrl.u32 %v8245_v27, 16 }
 0x3d6   : > { %v6990_v7 = vrot.slane %v6982_v47, %v10651_v23  ;;  %v6997_v4 = vrot.slane %v6983_v12, %v10651_v23  ;;  %v6998_v11 = vcombine.low %v12221_v46, %v6981_v58  ;;  %v6999_v60 = vcombine.high %v12221_v46, %v6981_v58 }
 0x3d7   : > { %v8423_v39 = vpack.i.b16 %v8422_v57, %v8421_v18  ;;  %v8429_v59 = vpack.i.b16 %v8428_v25, %v8427_v40  ;;  %v8455_v56 = vsel %vm3449_vm0, %v8420_v38, 0  ;;  %v8487_v28 = vsel %vm3449_vm0, %v8426_v21, 0 }
 0x3d8   : > { %v9458_v41 = vcombine.low %v8455_v56, %v8455_v56  ;;  %v9459_v16 = vcombine.high %v8455_v56, %v8455_v56  ;;  %v9490_v24 = vcombine.low %v8487_v28, %v8487_v28  ;;  %v9491_v61 = vcombine.high %v8487_v28, %v8487_v28 }
 0x3d9   : > { %v8471_v29 = vsel %vm3449_vm0, %v8423_v39, 0  ;;  %v8503_v0 = vsel %vm3449_vm0, %v8429_v59, 0  ;;  %v7006_v46 = vrot.slane %v6998_v11, %v10651_v23  ;;  %v7013_v34 = vrot.slane %v6999_v60, %v10651_v23 }
 0x3da   : > { %v9474_v32 = vcombine.low %v8471_v29, %v8471_v29  ;;  %v9475_v15 = vcombine.high %v8471_v29, %v8471_v29  ;;  %v9506_v26 = vcombine.low %v8503_v0, %v8503_v0  ;;  %v9507_v49 = vcombine.high %v8503_v0, %v8503_v0  ;;  %8742 = vst [vmem:[%s11973_s27 + $0x30] sm:$0xf] %v9458_v41 }
 0x3db   : > { %8743 = vst [vmem:[%s11973_s27 + $0x34] sm:$0xf] %v9459_v16  ;;  %8774 = vst [vmem:[%s11973_s27 + $0xb0] sm:$0xf] %v9490_v24  ;;  %v7853_v43 = vrot.slane %v7846_v30, %v10645_v35  ;;  %v7861_v19 = vrot.slane %v9426_v3, %v10645_v35  ;;  %v7862_v62 = vcombine.low %v6940_v20, %v6947_v44  ;;  %v6486_v42 = vshrl.u32 %v12636_v13, 16 }
 0x3dc   : > { %8775 = vst [vmem:[%s11973_s27 + $0xb4] sm:$0xf] %v9491_v61  ;;  %v9427_v31 = vcombine.high %v6940_v20, %v6947_v44  ;;  %8758 = vst [vmem:[%s11973_s27 + $0x70] sm:$0xf] %v9474_v32  ;;  %v7896_v14 = vcombine.low %v6990_v7, %v6997_v4  ;;  %v9428_v17 = vcombine.high %v6990_v7, %v6997_v4  ;;  %v6487_v18 = vshrl.u32 %v6361_v54, 16 }
 0x3dd   : > { %8759 = vst [vmem:[%s11973_s27 + $0x74] sm:$0xf] %v9475_v15  ;;  %8790 = vst [vmem:[%s11973_s27 + $0xf0] sm:$0xf] %v9506_v26  ;;  %v7912_v36 = vcombine.low %v7006_v46, %v7013_v34  ;;  %v9429_v50 = vcombine.high %v7006_v46, %v7013_v34  ;;  %v7480_v48 = vcombine.high %v12225_v51, %v10642_v37 }
 0x3de   : > { %8791 = vst [vmem:[%s11973_s27 + $0xf4] sm:$0xf] %v9507_v49  ;;  %v7869_v63 = vrot.slane %v7862_v62, %v10645_v35  ;;  %v7877_v55 = vrot.slane %v9427_v31, %v10645_v35  ;;  %v7878_v52 = vcombine.low %v7853_v43, %v7861_v19  ;;  %v7903_v22 = vrot.slane %v7896_v14, %v10645_v35 }
 0x3df   : > { %v7911_v8 = vrot.slane %v9428_v17, %v10645_v35  ;;  %v7919_v45 = vrot.slane %v7912_v36, %v10645_v35  ;;  %v7927_v53 = vrot.slane %v9429_v50, %v10645_v35  ;;  %v6484_v9 = vpack.i.b16 %v6361_v54, %v12636_v13 }
 0x3e0   : > { %v7886_v2 = vcombine.low %v7869_v63, %v7877_v55  ;;  %v7428_v40 = vrot.slane %v7414_v5, %v10645_v35  ;;  %v7885_v20 = vrot.slane %v7878_v52, %v10651_v23  ;;  %v6488_v44 = vpack.i.b16 %v6487_v18, %v6486_v42 }
 0x3e1   : > { %v7928_v1 = vcombine.low %v7903_v22, %v7911_v8  ;;  %v7936_v10 = vcombine.low %v7919_v45, %v7927_v53  ;;  %v7429_v58 = vcombine.high %v6484_v9, %v10642_v37  ;;  %v7436_v47 = vrot.slane %v6484_v9, %v10645_v35 }
 0x3e2   : > { %v7893_v27 = vrot.slane %v7886_v2, %v10651_v23  ;;  %v7487_v12 = vrot.slane %v12225_v51, %v10645_v35  ;;  %v7494_v30 = vrot.slane %v7480_v48, %v10645_v35  ;;  %v7495_v11 = vcombine.high %v6488_v44, %v10642_v37 }
 0x3e3   : > { %v7935_v3 = vrot.slane %v7928_v1, %v10651_v23  ;;  %v7943_v33 = vrot.slane %v7936_v10, %v10651_v23  ;;  %v7443_v57 = vrot.slane %v7429_v58, %v10645_v35  ;;  %v7444_v21 = vcombine.low %v12233_v6, %v7436_v47 }
 0x3e4   : > { %v7894_v5 = vcombine.low %v7885_v20, %v7893_v27  ;;  %v7895_v38 = vcombine.high %v7885_v20, %v7893_v27  ;;  %v7445_v4 = vcombine.high %v12233_v6, %v7436_v47  ;;  %v7502_v0 = vrot.slane %v6488_v44, %v10645_v35 }
 0x3e5   : > { %v7944_v25 = vcombine.low %v7935_v3, %v7943_v33  ;;  %v7945_v7 = vcombine.high %v7935_v3, %v7943_v33  ;;  %v7452_v39 = vrot.slane %v7444_v21, %v10651_v23  ;;  %v7460_v59 = vcombine.low %v7428_v40, %v7443_v57 }
 0x3e6   : > { %v8385_v60 = vshrl.u32 %v7894_v5, 16  ;;  %v8391_v51 = vshrl.u32 %v7895_v38, 16  ;;  %v7459_v24 = vrot.slane %v7445_v4, %v10651_v23  ;;  %v7461_v61 = vcombine.high %v7428_v40, %v7443_v57 }
 0x3e7   : > { %v8384_v56 = vpack.i.b16 %v7944_v25, %v7894_v5  ;;  %v8386_v28 = vshrl.u32 %v7944_v25, 16  ;;  %v8390_v41 = vpack.i.b16 %v7945_v7, %v7895_v38  ;;  %v8392_v16 = vshrl.u32 %v7945_v7, 16 }
 0x3e8   : > { %v7468_v29 = vrot.slane %v7460_v59, %v10651_v23  ;;  %v7475_v62 = vrot.slane %v7461_v61, %v10651_v23  ;;  %v7509_v31 = vrot.slane %v7495_v11, %v10645_v35  ;;  %v7510_v54 = vcombine.low %v7487_v12, %v7502_v0 }
 0x3e9   : > { %v8387_v46 = vpack.i.b16 %v8386_v28, %v8385_v60  ;;  %v8393_v6 = vpack.i.b16 %v8392_v16, %v8391_v51  ;;  %v8449_v37 = vsel %vm3449_vm0, %v8384_v56, 0  ;;  %v8481_v34 = vsel %vm3449_vm0, %v8390_v41, 0 }
 0x3ea   : > { %v9452_v32 = vcombine.low %v8449_v37, %v8449_v37  ;;  %v9453_v15 = vcombine.high %v8449_v37, %v8449_v37  ;;  %v9484_v26 = vcombine.low %v8481_v34, %v8481_v34  ;;  %v9485_v49 = vcombine.high %v8481_v34, %v8481_v34 }
 0x3eb   : > { %v8465_v43 = vsel %vm3449_vm0, %v8387_v46, 0  ;;  %v8497_v19 = vsel %vm3449_vm0, %v8393_v6, 0  ;;  %v7511_v48 = vcombine.high %v7487_v12, %v7502_v0  ;;  %v7526_v63 = vcombine.low %v7494_v30, %v7509_v31 }
 0x3ec   : > { %v9468_v14 = vcombine.low %v8465_v43, %v8465_v43  ;;  %v9469_v17 = vcombine.high %v8465_v43, %v8465_v43  ;;  %v9500_v36 = vcombine.low %v8497_v19, %v8497_v19  ;;  %v9501_v50 = vcombine.high %v8497_v19, %v8497_v19  ;;  %8736 = vst [vmem:[%s11973_s27 + $0x18] sm:$0xf] %v9452_v32 }
 0x3ed   : > { %8737 = vst [vmem:[%s11973_s27 + $0x1c] sm:$0xf] %v9453_v15  ;;  %8768 = vst [vmem:[%s11973_s27 + $0x98] sm:$0xf] %v9484_v26  ;;  %v7527_v55 = vcombine.high %v7494_v30, %v7509_v31  ;;  %v8246_v52 = vcombine.low %v7452_v39, %v7459_v24  ;;  %v9442_v22 = vcombine.high %v7452_v39, %v7459_v24 }
 0x3ee   : > { %8769 = vst [vmem:[%s11973_s27 + $0x9c] sm:$0xf] %v9485_v49  ;;  %8752 = vst [vmem:[%s11973_s27 + $0x58] sm:$0xf] %v9468_v14  ;;  %v8262_v8 = vcombine.low %v7468_v29, %v7475_v62  ;;  %v9443_v45 = vcombine.high %v7468_v29, %v7475_v62  ;;  %v7518_v53 = vrot.slane %v7510_v54, %v10651_v23 }
 0x3ef   : > { %8753 = vst [vmem:[%s11973_s27 + $0x5c] sm:$0xf] %v9469_v17  ;;  %8784 = vst [vmem:[%s11973_s27 + $0xd8] sm:$0xf] %v9500_v36  ;;  %v7525_v2 = vrot.slane %v7511_v48, %v10651_v23  ;;  %v7534_v13 = vrot.slane %v7526_v63, %v10651_v23  ;;  %v7541_v42 = vrot.slane %v7527_v55, %v10651_v23 }
 0x3f0   : > { %8785 = vst [vmem:[%s11973_s27 + $0xdc] sm:$0xf] %v9501_v50  ;;  %v8253_v9 = vrot.slane %v8246_v52, %v10645_v35  ;;  %v8261_v18 = vrot.slane %v9442_v22, %v10645_v35  ;;  %v8269_v40 = vrot.slane %v8262_v8, %v10645_v35  ;;  %v8277_v20 = vrot.slane %v9443_v45, %v10645_v35 }
 0x3f1   : > { %v8296_v1 = vcombine.low %v7518_v53, %v7525_v2  ;;  %v9444_v10 = vcombine.high %v7518_v53, %v7525_v2  ;;  %v8312_v27 = vcombine.low %v7534_v13, %v7541_v42  ;;  %v9445_v44 = vcombine.high %v7534_v13, %v7541_v42 }
 0x3f2   : > { %v8278_v58 = vcombine.low %v8253_v9, %v8261_v18  ;;  %v8286_v47 = vcombine.low %v8269_v40, %v8277_v20 }
 0x3f3   : > { %v8303_v12 = vrot.slane %v8296_v1, %v10645_v35  ;;  %v8311_v30 = vrot.slane %v9444_v10, %v10645_v35  ;;  %v8319_v3 = vrot.slane %v8312_v27, %v10645_v35  ;;  %v8327_v33 = vrot.slane %v9445_v44, %v10645_v35 }
 0x3f4   : > { %v8285_v5 = vrot.slane %v8278_v58, %v10651_v23  ;;  %v8293_v38 = vrot.slane %v8286_v47, %v10651_v23 }
 0x3f5   : > { %v8328_v57 = vcombine.low %v8303_v12, %v8311_v30  ;;  %v8336_v21 = vcombine.low %v8319_v3, %v8327_v33 }
 0x3f6   : > { %v8294_v25 = vcombine.low %v8285_v5, %v8293_v38  ;;  %v8295_v7 = vcombine.high %v8285_v5, %v8293_v38 }
 0x3f7   : > { %v8335_v4 = vrot.slane %v8328_v57, %v10651_v23  ;;  %v8343_v11 = vrot.slane %v8336_v21, %v10651_v23 }
 0x3f8   : > { %v8433_v39 = vshrl.u32 %v8294_v25, 16  ;;  %v8439_v59 = vshrl.u32 %v8295_v7, 16 }
 0x3f9   : > { %v8344_v60 = vcombine.low %v8335_v4, %v8343_v11  ;;  %v8345_v51 = vcombine.high %v8335_v4, %v8343_v11 }
 0x3fb   : > { %v8432_v56 = vpack.i.b16 %v8344_v60, %v8294_v25  ;;  %v8434_v28 = vshrl.u32 %v8344_v60, 16  ;;  %v8438_v41 = vpack.i.b16 %v8345_v51, %v8295_v7  ;;  %v8440_v35 = vshrl.u32 %v8345_v51, 16 }
 0x3fd   : > { %v8435_v16 = vpack.i.b16 %v8434_v28, %v8433_v39  ;;  %v8441_v24 = vpack.i.b16 %v8440_v35, %v8439_v59  ;;  %v8457_v61 = vsel %vm3449_vm0, %v8432_v56, 0  ;;  %v8489_v29 = vsel %vm3449_vm0, %v8438_v41, 0 }
 0x3fe   : > { %v9460_v23 = vcombine.low %v8457_v61, %v8457_v61  ;;  %v9461_v0 = vcombine.high %v8457_v61, %v8457_v61  ;;  %v9492_v46 = vcombine.low %v8489_v29, %v8489_v29  ;;  %v9493_v6 = vcombine.high %v8489_v29, %v8489_v29 }
 0x3ff   : > { %v8473_v37 = vsel %vm3449_vm0, %v8435_v16, 0  ;;  %v8505_v34 = vsel %vm3449_vm0, %v8441_v24, 0 }
 0x400   : > { %v9476_v32 = vcombine.low %v8473_v37, %v8473_v37  ;;  %v9477_v15 = vcombine.high %v8473_v37, %v8473_v37  ;;  %v9508_v26 = vcombine.low %v8505_v34, %v8505_v34  ;;  %v9509_v49 = vcombine.high %v8505_v34, %v8505_v34  ;;  %8744 = vst [vmem:[%s11973_s27 + $0x38] sm:$0xf] %v9460_v23 }
 0x401   : > { %8745 = vst [vmem:[%s11973_s27 + $0x3c] sm:$0xf] %v9461_v0  ;;  %8776 = vst [vmem:[%s11973_s27 + $0xb8] sm:$0xf] %v9492_v46 }
 0x402   : > { %8777 = vst [vmem:[%s11973_s27 + $0xbc] sm:$0xf] %v9493_v6  ;;  %8760 = vst [vmem:[%s11973_s27 + $0x78] sm:$0xf] %v9476_v32 }
 0x403   : > { %8761 = vst [vmem:[%s11973_s27 + $0x7c] sm:$0xf] %v9477_v15  ;;  %8792 = vst [vmem:[%s11973_s27 + $0xf8] sm:$0xf] %v9508_v26 }
 0x404   : > { %8793 = vst [vmem:[%s11973_s27 + $0xfc] sm:$0xf] %v9509_v49 }
 0x405   : > { %s9513_s16 = sshll.u32 %s9967_s21, 4  ;;  %s9514_s17 = sshll.u32 %s9971_s22, 8 }
 0x406   : > { %s8817_s6 = sadd.s32 %s9514_s17, %s9513_s16  ;;  %s8836_s9 = sshll.u32 %s10783_s30, 4  ;;  %s8837_s9 = int_to_ptr.vmem [resolvable:$true] %s8836_s9 }
 0x407   : > { %s12416_s10 = sshll.u32 %s8817_s6, 6  ;;  %s9995_s23 = smov 1024  }
 0x408   : > { %s8819_s13 = scalar_lea.hbm %s12509_s3, %s12416_s10  ;;  %9563 = sst [smem:[#allocation12]] (%p10149_p11), %s9995_s23 }
 0x409   : > { %s9996_s12 = smov 4096   ;;  %s9997_s21 = smov 16  }
 0x40a   : > { %9564 = sst [smem:[#allocation12 + $0x1]] (%p10149_p11), %s9996_s12  ;;  %s9998_s22 = smov 64  }
 0x40b   : > { %9565 = sst [smem:[#allocation12 + $0x2]] (%p10149_p11), %s9997_s21  ;;  %s9999_s1 = smov 4  }
 0x40c   : > { %9566 = sst [smem:[#allocation12 + $0x3]] (%p10149_p11), %s9998_s22  ;;  %s10000_s5 = smov [#allocation11]  }
 0x40d   : > { %9567 = sst [smem:[#allocation12 + $0x4]] (%p10149_p11), %s9998_s22  ;;  %s10001_s28 = smov 0  }
 0x40e   : > { %9568 = sst [smem:[#allocation12 + $0x5]] (%p10149_p11), %s9999_s1 }
 0x40f   : > { %9569 = dma.general (%p10149_p11), %s8837_s9, 4096, %s8819_s13, %s8795_s7, %s10000_s5, [#allocation12], %s10001_s28, 0  }
 0x410   : > { %s8866_s16 = scalar_lea.hbm %s12510_s4, %s12416_s10  ;;  %s8883_s17 = sshll.u32 %s10853_s14, 4  ;;  %s8884_s17 = int_to_ptr.vmem [resolvable:$true] %s8883_s17 }
 0x411   : > { %s10002_s6 = smov 1024   ;;  %s10003_s7 = smov 4096  }
 0x412   : > { %9570 = sst [smem:[#allocation14]] (%p10149_p11), %s10002_s6  ;;  %s10004_s9 = smov 16  }
 0x413   : > { %9571 = sst [smem:[#allocation14 + $0x1]] (%p10149_p11), %s10003_s7  ;;  %s10005_s26 = smov 64  }
 0x414   : > { %9572 = sst [smem:[#allocation14 + $0x2]] (%p10149_p11), %s10004_s9  ;;  %s10006_s29 = smov 4  }
 0x415   : > { %9573 = sst [smem:[#allocation14 + $0x3]] (%p10149_p11), %s10005_s26  ;;  %s10007_s13 = smov [#allocation13]  }
 0x416   : > { %9574 = sst [smem:[#allocation14 + $0x4]] (%p10149_p11), %s10005_s26  ;;  %s10008_s14 = smov 0  }
 0x417   : > { %9575 = sst [smem:[#allocation14 + $0x5]] (%p10149_p11), %s10006_s29 }
 0x418   : > { %9576 = dma.general (%p10149_p11), %s8884_s17, 4096, %s8866_s16, %s12411_s15, %s10007_s13, [#allocation14], %s10008_s14, 0  }
 0x419   : > { %s12637_s21 = sld [smem:[#allocation46_spill]]  ;;  %s8930_s1 = sshll.u32 %s11973_s27, 4  ;;  %s8931_s1 = int_to_ptr.vmem [resolvable:$true] %s8930_s1 }
 0x41a   : > { %s10009_s5 = smov 1024   ;;  %s10010_s28 = smov 4096  }
 0x41b   : > { %9577 = sst [smem:[#allocation16]] (%p10149_p11), %s10009_s5  ;;  %s10011_s30 = smov 16  }
 0x41c   : > { %9578 = sst [smem:[#allocation16 + $0x1]] (%p10149_p11), %s10010_s28  ;;  %s10012_s18 = smov 64  }
 0x41d   : > { %9579 = sst [smem:[#allocation16 + $0x2]] (%p10149_p11), %s10011_s30  ;;  %s10013_s16 = smov 4  }
 0x41e   : > { %9580 = sst [smem:[#allocation16 + $0x3]] (%p10149_p11), %s10012_s18  ;;  %s10015_s27 = smov 0  }
 0x41f   : > { %s8913_s22 = scalar_lea.hbm %s12637_s21, %s12416_s10  ;;  %9581 = sst [smem:[#allocation16 + $0x4]] (%p10149_p11), %s10012_s18 }
 0x420   : > { %9582 = sst [smem:[#allocation16 + $0x5]] (%p10149_p11), %s10013_s16  ;;  %s10014_s10 = smov [#allocation15]  }
 0x421   : > { %9583 = dma.general (%p10149_p11), %s8931_s1, 4096, %s8913_s22, %s12411_s15, %s10014_s10, [#allocation16], %s10015_s27, 0  }
 0x422 PF: > { %s12638_s17 = sld [smem:[#allocation21_spill]]  ;;  %s12639_s6 = sld [smem:[#allocation23_spill]] }
 0x423   : > { %p9608_p8 = scmp.ge.s32.totalorder %s9983_s25, 2 }
 0x428   : > { %s8958_s7 = sand.u32 1, %s12638_s17   ;;  %p12640_p10 = scmp.ne.s32.totalorder %s12639_s6, 0 }
 0x429   : > { %s8959_s9 = scalar_lea.sflag [#allocation4], %s8958_s7 }
 0x42a   : > { %p9596_p12 = pnand %p9608_p8, %p12640_p10 }
 0x42c   : > { %9946 = dma.done.wait (!%p9596_p12), %s8959_s9, 4096  }
 0x42d   : > { %9948 = vsyncadd (!%p9596_p12), %s8959_s9, 4294963200  ;;  %s12641_s26 = sadd.s32 4294967294, %s9983_s25  }
 0x42e   : > { %s8967_s29 = sand.u32 1, %s12641_s26  }
 0x42f   : > { %s8968_s13 = scalar_lea.sflag [#allocation9], %s8967_s29 }
 0x430   : > { %9950 = dma.done.wait (!%p9596_p12), %s8968_s13, 8192  }
 0x431   : > { %9952 = vsyncadd (!%p9596_p12), %s8968_s13, 4294959104  ;;  %s26_s25 = sadd.s32 1, %s9983_s25   ;;  %s12642_s21 = sld [smem:[#allocation22_spill]] }
 0x432   : > { %p23_p11 = scmp.ge.s32.totalorder %s26_s25, 10   ;;  %s12643_s23 = sld [smem:[#allocation24_spill]] }
 0x433   : > { %s12644_s8 = sld [smem:[#allocation25_spill]]  ;;  %s12645_s18 = smov %s9959_s19 }
 0x434   : > { %s12646_s19 = smov %s9963_s20  ;;  %s12647_s20 = smov %s10166_s11 }
 0x435   : > { %s12648_s22 = smov %s9979_s24  ;;  %25 = sbr.rel (!%p23_p11) target bundleno = 13 (0xd), region = 128 }
 0x439   : > { %s12649_s24 = smov %s12644_s8 }
 0x43c   :  { %8982 = vsyncpa [#allocation3], 1 }
 0x43d   :  { %8984 = vsyncpa [#allocation3 + $0x1], 1 }
 0x43e   :  { %8985 = vsyncpa [#allocation6], 1 }
 0x43f   :  { %8986 = vsyncpa [#allocation4], 1 }
 0x440   :  { %8988 = vsyncpa [#allocation4 + $0x1], 1 }
 0x441   :  { %8989 = vsyncpa [#allocation9], 1 }
 0x442   :  { %8991 = vsyncpa [#allocation9 + $0x1], 1 }

</bundles_post_ra>
